<compile_context>
chip_gen: v6e
topology: v6e:2x2x1
jax: 0.10.0
libtpu: 0.0.40
codegen_flags: <defaults>
</compile_context>

<pallas_src>
import functools

import jax
import jax.numpy as jnp
from jax.experimental import pallas as pl
from jax.experimental.pallas import tpu as pltpu  # noqa: F401  (TPU-specific params if needed)

LN_EPS = 1e-5        # torch.nn.LayerNorm default eps
NEG_SLOPE = 0.2      # PMA leaky_relu negative slope
LANE = 128           # lane (last-dim) padding target


def _round_up(n, m):
    return ((n + m - 1) // m) * m


def _layernorm_pad(x, gamma, beta, d_real):
    # x is zero in padded lanes, so full-width sums equal sums over the real dims.
    inv_d = 1.0 / float(d_real)
    mu = jnp.sum(x, axis=-1, keepdims=True) * inv_d
    var = jnp.maximum(jnp.sum(x * x, axis=-1, keepdims=True) * inv_d - mu * mu, 0.0)
    # gamma/beta are zero in padded lanes -> padded lanes stay exactly zero.
    return (x - mu) * jax.lax.rsqrt(var + LN_EPS) * gamma + beta


# ----------------------------------------------------------------------------
# Fused forward kernel: all PMA blocks + classifier in one invocation.
#   x_ref    : (S_pad, 128) f32          padded node features
#   mask_ref : (S_pad, S_pad) f32        incidence (rows = hyperedges, cols = nodes)
#   w_ref    : (num_pma, 3, 128, 128) f32  [Wcomb(=Wv|Wk@att_r), W1, W2] per block
#   v_ref    : (num_pma, 8, 128) f32       [bcomb, att_r, b1, b2, g0, be0, g1, be1]
#   cw_ref   : (2, 128, 128) f32           classifier [w1, w2]
#   cv_ref   : (4, 128) f32                classifier [b1, b2, gamma, beta]
#   o_ref    : (S_pad, 128) f32            logits (lane-dense block)
# ----------------------------------------------------------------------------
def setgnn_kernel(x_ref, mask_ref, w_ref, v_ref, cw_ref, cv_ref, o_ref,
                  *, num_pma, d_hidden, d_clf, num_nodes, num_hyperedges):
    h = x_ref[...]
    mask = mask_ref[...]                        # resident once, reused by every block
    s_pad = h.shape[0]
    a_lane = d_hidden                           # attention-logit column of Wcomb
    c_lane = d_hidden + 1                       # softmax-denominator carrier column
    lane = jax.lax.broadcasted_iota(jnp.int32, (1, LANE), 1)
    row = jax.lax.broadcasted_iota(jnp.int32, (s_pad, 1), 0)

    for blk in range(num_pma):                  # static unroll: v2e, e2v, v2e, e2v
        v2e = (blk % 2 == 0)
        n_src = num_nodes if v2e else num_hyperedges

        wc = w_ref[blk, 0]                      # (128, 128) combined [Wv | Wk@att_r]
        w1 = w_ref[blk, 1]
        w2 = w_ref[blk, 2]
        vb = v_ref[blk]                         # (8, 128)
        bc, attr = vb[0:1], vb[1:2]             # combined bias, seed vector
        b1, b2 = vb[2:3], vb[3:4]
        g0, be0, g1, be1 = vb[4:5], vb[5:6], vb[6:7], vb[7:8]

        # One matmul yields V (lanes [0,d_hidden)) and the attention logit (lane a_lane).
        vv = jnp.dot(h, wc, preferred_element_type=jnp.float32) + bc       # (S, 128)

        alpha = vv[:, a_lane:a_lane + 1]                                   # (S, 1)
        a = jnp.where(alpha >= 0, alpha, NEG_SLOPE * alpha)                # leaky_relu
        src_ok = row < n_src                                               # mask padded rows
        a = jnp.where(src_ok, a, -1e30)
        m = jnp.max(a, axis=0, keepdims=True)                              # global max shift
        e = jnp.where(src_ok, jnp.exp(a - m), 0.0)                         # (S, 1)

        # payload lanes: [0,d_hidden) = V*e, a_lane = 0, c_lane = e, rest 0.
        payload = jnp.where(lane == a_lane, 0.0,
                            jnp.where(lane == c_lane, 1.0, vv)) * e

        # Single mask matmul gives softmax numerator AND denominator (carrier lane).
        if v2e:
            agg = jnp.dot(mask, payload, preferred_element_type=jnp.float32)
        else:  # contract on dim 0 of the same resident mask (no transposed copy)
            agg = jax.lax.dot_general(mask, payload, (((0,), (0,)), ((), ())),
                                      preferred_element_type=jnp.float32)

        denom = agg[:, c_lane:c_lane + 1]
        agg = agg * (1.0 / jnp.maximum(denom, 1e-30))    # empty-group guard -> 0
        agg = jnp.where(lane == c_lane, 0.0, agg)        # clear carrier lane

        out = agg + attr                                 # += seed
        out = _layernorm_pad(out, g0, be0, d_hidden)     # ln0

        # rFF MLP (2 layers, Normalization='None', dropout=0 in eval)
        hh = jnp.maximum(jnp.dot(out, w1, preferred_element_type=jnp.float32) + b1, 0.0)
        ff = jnp.dot(hh, w2, preferred_element_type=jnp.float32) + b2

        y = _layernorm_pad(out + jnp.maximum(ff, 0.0), g1, be1, d_hidden)  # ln1
        h = jnp.maximum(y, 0.0)                          # F.relu after each conv

    # Classifier MLP (2 layers, 'ln' normalization, InputNorm=False, eval mode)
    cw1, cw2 = cw_ref[0], cw_ref[1]
    cb1, cb2, cg, cbe = cv_ref[0:1], cv_ref[1:2], cv_ref[2:3], cv_ref[3:4]
    hc = jnp.maximum(jnp.dot(h, cw1, preferred_element_type=jnp.float32) + cb1, 0.0)
    hc = _layernorm_pad(hc, cg, cbe, d_clf)
    o_ref[...] = jnp.dot(hc, cw2, preferred_element_type=jnp.float32) + cb2


def _full_spec(shape):
    n = len(shape)
    return pl.BlockSpec(shape, lambda i, n=n: (0,) * n)


# ----------------------------------------------------------------------------
# Parameter construction (synthetic; mirrors module shapes) + lane padding/packing
# ----------------------------------------------------------------------------
def init_linear(key, fan_in, fan_out):
    k1, k2 = jax.random.split(key)
    bound = 1.0 / jnp.sqrt(jnp.float32(fan_in))
    w = jax.random.uniform(k1, (fan_in, fan_out), jnp.float32, -bound, bound)
    b = jax.random.uniform(k2, (fan_out,), jnp.float32, -bound, bound)
    return w, b


def init_pma(key, in_dim, hid_dim):
    ks = jax.random.split(key, 5)
    wk, bk = init_linear(ks[0], in_dim, hid_dim)
    wv, bv = init_linear(ks[1], in_dim, hid_dim)
    att_r = jax.random.normal(ks[2], (hid_dim,), jnp.float32) / jnp.sqrt(jnp.float32(hid_dim))
    w1, b1 = init_linear(ks[3], hid_dim, hid_dim)
    w2, b2 = init_linear(ks[4], hid_dim, hid_dim)
    return dict(wk=wk, bk=bk, wv=wv, bv=bv, att_r=att_r,
                w1=w1, b1=b1, w2=w2, b2=b2,
                g0=jnp.ones((hid_dim,), jnp.float32), be0=jnp.zeros((hid_dim,), jnp.float32),
                g1=jnp.ones((hid_dim,), jnp.float32), be1=jnp.zeros((hid_dim,), jnp.float32))


def init_setgnn(key, num_features, num_classes, mlp_hidden, clf_hidden, all_num_layers):
    keys = jax.random.split(key, 2 * all_num_layers + 2)
    layers = []
    in_dim = num_features
    for l in range(all_num_layers):
        v2e = init_pma(keys[2 * l], in_dim, mlp_hidden)
        e2v = init_pma(keys[2 * l + 1], mlp_hidden, mlp_hidden)
        layers.append(dict(v2e=v2e, e2v=e2v))
        in_dim = mlp_hidden
    w1, b1 = init_linear(keys[-2], mlp_hidden, clf_hidden)
    w2, b2 = init_linear(keys[-1], clf_hidden, num_classes)
    clf = dict(w1=w1, b1=b1, w2=w2, b2=b2,
               g=jnp.ones((clf_hidden,), jnp.float32), be=jnp.zeros((clf_hidden,), jnp.float32))
    return dict(layers=layers, clf=clf)


def _pad_vec(v):
    return jnp.pad(v, (0, LANE - v.shape[0]))


def _pad_mat(w):
    return jnp.pad(w, ((0, LANE - w.shape[0]), (0, LANE - w.shape[1])))


def pack_setgnn(params, d_hidden):
    """Pad to 128 lanes; fold att_r into the V projection (alpha column = Wk @ att_r)."""
    assert d_hidden + 2 <= LANE, "need spare lanes for alpha + carrier columns"
    a_lane = d_hidden
    blocks = []
    for lp in params["layers"]:
        blocks += [lp["v2e"], lp["e2v"]]
    Ws, Vs = [], []
    for b in blocks:
        in_dim = b["wv"].shape[0]
        wcomb = jnp.zeros((LANE, LANE), jnp.float32)
        wcomb = wcomb.at[:in_dim, :d_hidden].set(b["wv"])
        wcomb = wcomb.at[:in_dim, a_lane].set(b["wk"] @ b["att_r"])
        bcomb = jnp.zeros((LANE,), jnp.float32)
        bcomb = bcomb.at[:d_hidden].set(b["bv"])
        bcomb = bcomb.at[a_lane].set(jnp.dot(b["bk"], b["att_r"]))
        Ws.append(jnp.stack([wcomb, _pad_mat(b["w1"]), _pad_mat(b["w2"])]))
        Vs.append(jnp.stack([bcomb, _pad_vec(b["att_r"]), _pad_vec(b["b1"]), _pad_vec(b["b2"]),
                             _pad_vec(b["g0"]), _pad_vec(b["be0"]),
                             _pad_vec(b["g1"]), _pad_vec(b["be1"])]))
    W = jnp.stack(Ws)                                   # (P, 3, 128, 128) f32
    V = jnp.stack(Vs)                                   # (P, 8, 128)     f32
    c = params["clf"]
    CW = jnp.stack([_pad_mat(c["w1"]), _pad_mat(c["w2"])])          # (2, 128, 128)
    CV = jnp.stack([_pad_vec(c["b1"]), _pad_vec(c["b2"]),
                    _pad_vec(c["g"]), _pad_vec(c["be"])])            # (4, 128)
    return dict(W=W, V=V, CW=CW, CV=CV)


# ----------------------------------------------------------------------------
# SetGNN forward (eval mode: all dropout layers are identity)
# ----------------------------------------------------------------------------
def setgnn_forward(packed, x, edge_index, *, num_nodes, num_hyperedges, num_classes,
                   mlp_hidden, clf_hidden):
    s_pad = max(_round_up(num_nodes, 8), _round_up(num_hyperedges, 8), 8)

    nodes = edge_index[0]
    edges = edge_index[1] - jnp.min(edge_index[1])   # mirrors `cidx = edge_index[1].min(); edge_index[1] -= cidx`
    # Dense incidence (rows = hyperedges, cols = nodes); equivalent to PyG
    # scatter-softmax when there are no duplicate (node, hyperedge) pairs.
    inc_v2e = jnp.zeros((s_pad, s_pad), jnp.float32).at[edges, nodes].set(1.0)

    x_pad = jnp.zeros((s_pad, LANE), jnp.float32).at[:num_nodes, :x.shape[1]].set(x)

    num_pma = packed["W"].shape[0]
    kernel = functools.partial(setgnn_kernel, num_pma=num_pma, d_hidden=mlp_hidden,
                               d_clf=clf_hidden, num_nodes=num_nodes,
                               num_hyperedges=num_hyperedges)
    args = (x_pad, inc_v2e, packed["W"], packed["V"], packed["CW"], packed["CV"])

    out = pl.pallas_call(
        kernel,
        out_shape=jax.ShapeDtypeStruct((s_pad, LANE), jnp.float32),
        grid=(1,),
        in_specs=[_full_spec(a.shape) for a in args],
        out_specs=_full_spec((s_pad, LANE)),
    )(*args)
    return out[:num_nodes, :num_classes]


if __name__ == "__main__":
    # small shapes: 16 nodes, 8 hyperedges, 16 input features, hidden 64, 4 classes
    N, M = 16, 8
    NUM_FEATURES, NUM_CLASSES = 16, 4
    MLP_HIDDEN, CLF_HIDDEN, ALL_NUM_LAYERS = 64, 64, 2

    key = jax.random.PRNGKey(0)
    k_x, k_p = jax.random.split(key)

    x = jax.random.normal(k_x, (N, NUM_FEATURES), jnp.float32)

    # each node belongs to two distinct hyperedges; no duplicate (node, edge) pairs
    node_ids = jnp.concatenate([jnp.arange(N, dtype=jnp.int32),
                                jnp.arange(N, dtype=jnp.int32)])
    edge_ids = jnp.concatenate([jnp.arange(N, dtype=jnp.int32) % M,
                                (3 * jnp.arange(N, dtype=jnp.int32) + 1) % M])
    edge_index = jnp.stack([node_ids, edge_ids], axis=0)   # (2, 32)

    params = init_setgnn(k_p, NUM_FEATURES, NUM_CLASSES, MLP_HIDDEN, CLF_HIDDEN, ALL_NUM_LAYERS)
    packed = pack_setgnn(params, MLP_HIDDEN)

    fwd = jax.jit(functools.partial(
        setgnn_forward, num_nodes=N, num_hyperedges=M, num_classes=NUM_CLASSES,
        mlp_hidden=MLP_HIDDEN, clf_hidden=CLF_HIDDEN))
    out = fwd(packed, x, edge_index)
    jax.block_until_ready(out)
    assert out.shape == (N, NUM_CLASSES) and bool(jnp.all(jnp.isfinite(out)))
    print("KERNEL_OK")
</pallas_src>

<mosaic_0001>
module attributes {stable_mosaic.version = 11 : i64} {
  func.func @setgnn_kernel(%arg0: i32, %arg1: memref<16x128xf32, #tpu.memory_space<vmem>>, %arg2: memref<16x16xf32, #tpu.memory_space<vmem>>, %arg3: memref<4x3x128x128xf32, #tpu.memory_space<vmem>>, %arg4: memref<4x8x128xf32, #tpu.memory_space<vmem>>, %arg5: memref<2x128x128xf32, #tpu.memory_space<vmem>>, %arg6: memref<4x128xf32, #tpu.memory_space<vmem>>, %arg7: memref<16x128xf32, #tpu.memory_space<vmem>>) attributes {dimension_semantics = [#tpu.dimension_semantics<arbitrary>], iteration_bounds = array<i64: 1>, scalar_prefetch = 0 : i64, scratch_operands = 0 : i64, tpu.core_type = #tpu.core_type<tc>, window_params = [{pipeline_mode = #tpu.pipeline_mode<synchronous>, transform_indices = @transform_0, window_bounds = array<i64: 16, 128>}, {pipeline_mode = #tpu.pipeline_mode<synchronous>, transform_indices = @transform_1, window_bounds = array<i64: 16, 16>}, {pipeline_mode = #tpu.pipeline_mode<synchronous>, transform_indices = @transform_2, window_bounds = array<i64: 4, 3, 128, 128>}, {pipeline_mode = #tpu.pipeline_mode<synchronous>, transform_indices = @transform_3, window_bounds = array<i64: 4, 8, 128>}, {pipeline_mode = #tpu.pipeline_mode<synchronous>, transform_indices = @transform_4, window_bounds = array<i64: 2, 128, 128>}, {pipeline_mode = #tpu.pipeline_mode<synchronous>, transform_indices = @transform_5, window_bounds = array<i64: 4, 128>}, {pipeline_mode = #tpu.pipeline_mode<synchronous>, transform_indices = @transform_6, window_bounds = array<i64: 16, 128>}]} {
    %c0 = arith.constant 0 : index
    %c0_0 = arith.constant 0 : index
    %0 = vector.load %arg1[%c0, %c0_0] : memref<16x128xf32, #tpu.memory_space<vmem>>, vector<16x128xf32>
    %c0_1 = arith.constant 0 : index
    %c0_2 = arith.constant 0 : index
    %1 = vector.load %arg2[%c0_1, %c0_2] : memref<16x16xf32, #tpu.memory_space<vmem>>, vector<16x16xf32>
    %2 = tpu.iota {dimensions = array<i32: 1>} : vector<1x128xi32>
    %3 = tpu.iota {dimensions = array<i32: 0>} : vector<16x1xi32>
    %c0_3 = arith.constant 0 : index
    %c0_4 = arith.constant 0 : index
    %c0_5 = arith.constant 0 : index
    %c0_6 = arith.constant 0 : index
    %4 = vector.load %arg3[%c0_3, %c0_4, %c0_5, %c0_6] : memref<4x3x128x128xf32, #tpu.memory_space<vmem>>, vector<1x1x128x128xf32>
    %5 = vector.shape_cast %4 : vector<1x1x128x128xf32> to vector<128x128xf32>
    %c0_7 = arith.constant 0 : index
    %c1 = arith.constant 1 : index
    %c0_8 = arith.constant 0 : index
    %c0_9 = arith.constant 0 : index
    %6 = vector.load %arg3[%c0_7, %c1, %c0_8, %c0_9] : memref<4x3x128x128xf32, #tpu.memory_space<vmem>>, vector<1x1x128x128xf32>
    %7 = vector.shape_cast %6 : vector<1x1x128x128xf32> to vector<128x128xf32>
    %c0_10 = arith.constant 0 : index
    %c2 = arith.constant 2 : index
    %c0_11 = arith.constant 0 : index
    %c0_12 = arith.constant 0 : index
    %8 = vector.load %arg3[%c0_10, %c2, %c0_11, %c0_12] : memref<4x3x128x128xf32, #tpu.memory_space<vmem>>, vector<1x1x128x128xf32>
    %9 = vector.shape_cast %8 : vector<1x1x128x128xf32> to vector<128x128xf32>
    %c0_13 = arith.constant 0 : index
    %c0_14 = arith.constant 0 : index
    %c0_15 = arith.constant 0 : index
    %10 = vector.load %arg4[%c0_13, %c0_14, %c0_15] : memref<4x8x128xf32, #tpu.memory_space<vmem>>, vector<1x8x128xf32>
    %11 = vector.shape_cast %10 : vector<1x8x128xf32> to vector<8x128xf32>
    %12 = vector.extract_strided_slice %11 {offsets = [0, 0], sizes = [1, 128], strides = [1, 1]} : vector<8x128xf32> to vector<1x128xf32>
    %13 = vector.extract_strided_slice %11 {offsets = [1, 0], sizes = [1, 128], strides = [1, 1]} : vector<8x128xf32> to vector<1x128xf32>
    %14 = vector.extract_strided_slice %11 {offsets = [2, 0], sizes = [1, 128], strides = [1, 1]} : vector<8x128xf32> to vector<1x128xf32>
    %15 = vector.extract_strided_slice %11 {offsets = [3, 0], sizes = [1, 128], strides = [1, 1]} : vector<8x128xf32> to vector<1x128xf32>
    %16 = vector.extract_strided_slice %11 {offsets = [4, 0], sizes = [1, 128], strides = [1, 1]} : vector<8x128xf32> to vector<1x128xf32>
    %17 = vector.extract_strided_slice %11 {offsets = [5, 0], sizes = [1, 128], strides = [1, 1]} : vector<8x128xf32> to vector<1x128xf32>
    %18 = vector.extract_strided_slice %11 {offsets = [6, 0], sizes = [1, 128], strides = [1, 1]} : vector<8x128xf32> to vector<1x128xf32>
    %19 = vector.extract_strided_slice %11 {offsets = [7, 0], sizes = [1, 128], strides = [1, 1]} : vector<8x128xf32> to vector<1x128xf32>
    %cst = arith.constant dense<0.000000e+00> : vector<16x128xf32>
    %20 = tpu.matmul %0, %5, %cst {dimension_numbers = #tpu.dot_dimension_numbers<[1], [0], [0], [1], [0, 0, 1, 1], [], []>} : vector<16x128xf32>, vector<128x128xf32>, vector<16x128xf32> -> vector<16x128xf32>
    %21 = vector.broadcast %12 : vector<1x128xf32> to vector<16x128xf32>
    %22 = arith.addf %20, %21 : vector<16x128xf32>
    %23 = vector.extract_strided_slice %22 {offsets = [0, 64], sizes = [16, 1], strides = [1, 1]} : vector<16x128xf32> to vector<16x1xf32>
    %cst_16 = arith.constant 0.000000e+00 : f32
    %24 = vector.broadcast %cst_16 : f32 to vector<16x1xf32>
    %25 = arith.cmpf oge, %23, %24 : vector<16x1xf32>
    %cst_17 = arith.constant 2.000000e-01 : f32
    %26 = vector.broadcast %cst_17 : f32 to vector<16x1xf32>
    %27 = arith.mulf %26, %23 : vector<16x1xf32>
    %28 = arith.select %25, %23, %27 : vector<16x1xi1>, vector<16x1xf32>
    %c16_i32 = arith.constant 16 : i32
    %29 = vector.broadcast %c16_i32 : i32 to vector<16x1xi32>
    %30 = arith.cmpi slt, %3, %29 : vector<16x1xi32>
    %cst_18 = arith.constant -1.000000e+30 : f32
    %31 = vector.broadcast %cst_18 : f32 to vector<16x1xf32>
    %32 = arith.select %30, %28, %31 : vector<16x1xi1>, vector<16x1xf32>
    %cst_19 = arith.constant dense<0xFF800000> : vector<1xf32>
    %33 = vector.multi_reduction <maximumf>, %32, %cst_19 [0] : vector<16x1xf32> to vector<1xf32>
    %34 = vector.shape_cast %33 : vector<1xf32> to vector<1x1xf32>
    %35 = vector.broadcast %34 : vector<1x1xf32> to vector<16x1xf32>
    %36 = arith.subf %32, %35 : vector<16x1xf32>
    %37 = math.exp %36 : vector<16x1xf32>
    %cst_20 = arith.constant 0.000000e+00 : f32
    %38 = vector.broadcast %cst_20 : f32 to vector<16x1xf32>
    %39 = arith.select %30, %37, %38 : vector<16x1xi1>, vector<16x1xf32>
    %c64_i32 = arith.constant 64 : i32
    %40 = vector.broadcast %c64_i32 : i32 to vector<1x128xi32>
    %41 = arith.cmpi eq, %2, %40 : vector<1x128xi32>
    %c65_i32 = arith.constant 65 : i32
    %42 = vector.broadcast %c65_i32 : i32 to vector<1x128xi32>
    %43 = arith.cmpi eq, %2, %42 : vector<1x128xi32>
    %cst_21 = arith.constant 1.000000e+00 : f32
    %44 = vector.shape_cast %43 : vector<1x128xi1> to vector<1x128xi1>
    %45 = vector.broadcast %44 : vector<1x128xi1> to vector<16x128xi1>
    %46 = vector.broadcast %cst_21 : f32 to vector<16x128xf32>
    %47 = arith.select %45, %46, %22 : vector<16x128xi1>, vector<16x128xf32>
    %cst_22 = arith.constant 0.000000e+00 : f32
    %48 = vector.shape_cast %41 : vector<1x128xi1> to vector<1x128xi1>
    %49 = vector.broadcast %48 : vector<1x128xi1> to vector<16x128xi1>
    %50 = vector.broadcast %cst_22 : f32 to vector<16x128xf32>
    %51 = arith.select %49, %50, %47 : vector<16x128xi1>, vector<16x128xf32>
    %52 = vector.broadcast %39 : vector<16x1xf32> to vector<16x128xf32>
    %53 = arith.mulf %51, %52 : vector<16x128xf32>
    %cst_23 = arith.constant dense<0.000000e+00> : vector<16x128xf32>
    %54 = tpu.matmul %1, %53, %cst_23 {dimension_numbers = #tpu.dot_dimension_numbers<[1], [0], [0], [1], [0, 0, 1, 1], [], []>} : vector<16x16xf32>, vector<16x128xf32>, vector<16x128xf32> -> vector<16x128xf32>
    %55 = vector.extract_strided_slice %54 {offsets = [0, 65], sizes = [16, 1], strides = [1, 1]} : vector<16x128xf32> to vector<16x1xf32>
    %cst_24 = arith.constant 1.000000e-30 : f32
    %56 = vector.broadcast %cst_24 : f32 to vector<16x1xf32>
    %57 = arith.maximumf %55, %56 : vector<16x1xf32>
    %cst_25 = arith.constant 1.000000e+00 : f32
    %58 = vector.broadcast %cst_25 : f32 to vector<16x1xf32>
    %59 = arith.divf %58, %57 : vector<16x1xf32>
    %60 = vector.broadcast %59 : vector<16x1xf32> to vector<16x128xf32>
    %61 = arith.mulf %54, %60 : vector<16x128xf32>
    %c65_i32_26 = arith.constant 65 : i32
    %62 = vector.broadcast %c65_i32_26 : i32 to vector<1x128xi32>
    %63 = arith.cmpi eq, %2, %62 : vector<1x128xi32>
    %cst_27 = arith.constant 0.000000e+00 : f32
    %64 = vector.shape_cast %63 : vector<1x128xi1> to vector<1x128xi1>
    %65 = vector.broadcast %64 : vector<1x128xi1> to vector<16x128xi1>
    %66 = vector.broadcast %cst_27 : f32 to vector<16x128xf32>
    %67 = arith.select %65, %66, %61 : vector<16x128xi1>, vector<16x128xf32>
    %68 = vector.broadcast %13 : vector<1x128xf32> to vector<16x128xf32>
    %69 = arith.addf %67, %68 : vector<16x128xf32>
    %cst_28 = arith.constant dense<0.000000e+00> : vector<16xf32>
    %70 = vector.multi_reduction <add>, %69, %cst_28 [1] : vector<16x128xf32> to vector<16xf32>
    %71 = vector.shape_cast %70 : vector<16xf32> to vector<16x1xf32>
    %cst_29 = arith.constant 1.562500e-02 : f32
    %72 = vector.broadcast %cst_29 : f32 to vector<16x1xf32>
    %73 = arith.mulf %71, %72 : vector<16x1xf32>
    %74 = arith.mulf %69, %69 : vector<16x128xf32>
    %cst_30 = arith.constant dense<0.000000e+00> : vector<16xf32>
    %75 = vector.multi_reduction <add>, %74, %cst_30 [1] : vector<16x128xf32> to vector<16xf32>
    %76 = vector.shape_cast %75 : vector<16xf32> to vector<16x1xf32>
    %cst_31 = arith.constant 1.562500e-02 : f32
    %77 = vector.broadcast %cst_31 : f32 to vector<16x1xf32>
    %78 = arith.mulf %76, %77 : vector<16x1xf32>
    %79 = arith.mulf %73, %73 : vector<16x1xf32>
    %80 = arith.subf %78, %79 : vector<16x1xf32>
    %cst_32 = arith.constant 0.000000e+00 : f32
    %81 = vector.broadcast %cst_32 : f32 to vector<16x1xf32>
    %82 = arith.maximumf %80, %81 : vector<16x1xf32>
    %83 = vector.broadcast %73 : vector<16x1xf32> to vector<16x128xf32>
    %84 = arith.subf %69, %83 : vector<16x128xf32>
    %cst_33 = arith.constant 9.99999974E-6 : f32
    %85 = vector.broadcast %cst_33 : f32 to vector<16x1xf32>
    %86 = arith.addf %82, %85 : vector<16x1xf32>
    %87 = math.rsqrt %86 : vector<16x1xf32>
    %88 = vector.broadcast %87 : vector<16x1xf32> to vector<16x128xf32>
    %89 = arith.mulf %84, %88 : vector<16x128xf32>
    %90 = vector.broadcast %16 : vector<1x128xf32> to vector<16x128xf32>
    %91 = arith.mulf %89, %90 : vector<16x128xf32>
    %92 = vector.broadcast %17 : vector<1x128xf32> to vector<16x128xf32>
    %93 = arith.addf %91, %92 : vector<16x128xf32>
    %cst_34 = arith.constant dense<0.000000e+00> : vector<16x128xf32>
    %94 = tpu.matmul %93, %7, %cst_34 {dimension_numbers = #tpu.dot_dimension_numbers<[1], [0], [0], [1], [0, 0, 1, 1], [], []>} : vector<16x128xf32>, vector<128x128xf32>, vector<16x128xf32> -> vector<16x128xf32>
    %95 = vector.broadcast %14 : vector<1x128xf32> to vector<16x128xf32>
    %96 = arith.addf %94, %95 : vector<16x128xf32>
    %cst_35 = arith.constant 0.000000e+00 : f32
    %97 = vector.broadcast %cst_35 : f32 to vector<16x128xf32>
    %98 = arith.maximumf %96, %97 : vector<16x128xf32>
    %cst_36 = arith.constant dense<0.000000e+00> : vector<16x128xf32>
    %99 = tpu.matmul %98, %9, %cst_36 {dimension_numbers = #tpu.dot_dimension_numbers<[1], [0], [0], [1], [0, 0, 1, 1], [], []>} : vector<16x128xf32>, vector<128x128xf32>, vector<16x128xf32> -> vector<16x128xf32>
    %100 = vector.broadcast %15 : vector<1x128xf32> to vector<16x128xf32>
    %101 = arith.addf %99, %100 : vector<16x128xf32>
    %cst_37 = arith.constant 0.000000e+00 : f32
    %102 = vector.broadcast %cst_37 : f32 to vector<16x128xf32>
    %103 = arith.maximumf %101, %102 : vector<16x128xf32>
    %104 = arith.addf %93, %103 : vector<16x128xf32>
    %cst_38 = arith.constant dense<0.000000e+00> : vector<16xf32>
    %105 = vector.multi_reduction <add>, %104, %cst_38 [1] : vector<16x128xf32> to vector<16xf32>
    %106 = vector.shape_cast %105 : vector<16xf32> to vector<16x1xf32>
    %cst_39 = arith.constant 1.562500e-02 : f32
    %107 = vector.broadcast %cst_39 : f32 to vector<16x1xf32>
    %108 = arith.mulf %106, %107 : vector<16x1xf32>
    %109 = arith.mulf %104, %104 : vector<16x128xf32>
    %cst_40 = arith.constant dense<0.000000e+00> : vector<16xf32>
    %110 = vector.multi_reduction <add>, %109, %cst_40 [1] : vector<16x128xf32> to vector<16xf32>
    %111 = vector.shape_cast %110 : vector<16xf32> to vector<16x1xf32>
    %cst_41 = arith.constant 1.562500e-02 : f32
    %112 = vector.broadcast %cst_41 : f32 to vector<16x1xf32>
    %113 = arith.mulf %111, %112 : vector<16x1xf32>
    %114 = arith.mulf %108, %108 : vector<16x1xf32>
    %115 = arith.subf %113, %114 : vector<16x1xf32>
    %cst_42 = arith.constant 0.000000e+00 : f32
    %116 = vector.broadcast %cst_42 : f32 to vector<16x1xf32>
    %117 = arith.maximumf %115, %116 : vector<16x1xf32>
    %118 = vector.broadcast %108 : vector<16x1xf32> to vector<16x128xf32>
    %119 = arith.subf %104, %118 : vector<16x128xf32>
    %cst_43 = arith.constant 9.99999974E-6 : f32
    %120 = vector.broadcast %cst_43 : f32 to vector<16x1xf32>
    %121 = arith.addf %117, %120 : vector<16x1xf32>
    %122 = math.rsqrt %121 : vector<16x1xf32>
    %123 = vector.broadcast %122 : vector<16x1xf32> to vector<16x128xf32>
    %124 = arith.mulf %119, %123 : vector<16x128xf32>
    %125 = vector.broadcast %18 : vector<1x128xf32> to vector<16x128xf32>
    %126 = arith.mulf %124, %125 : vector<16x128xf32>
    %127 = vector.broadcast %19 : vector<1x128xf32> to vector<16x128xf32>
    %128 = arith.addf %126, %127 : vector<16x128xf32>
    %cst_44 = arith.constant 0.000000e+00 : f32
    %129 = vector.broadcast %cst_44 : f32 to vector<16x128xf32>
    %130 = arith.maximumf %128, %129 : vector<16x128xf32>
    %c1_45 = arith.constant 1 : index
    %c0_46 = arith.constant 0 : index
    %c0_47 = arith.constant 0 : index
    %c0_48 = arith.constant 0 : index
    %131 = vector.load %arg3[%c1_45, %c0_46, %c0_47, %c0_48] : memref<4x3x128x128xf32, #tpu.memory_space<vmem>>, vector<1x1x128x128xf32>
    %132 = vector.shape_cast %131 : vector<1x1x128x128xf32> to vector<128x128xf32>
    %c1_49 = arith.constant 1 : index
    %c1_50 = arith.constant 1 : index
    %c0_51 = arith.constant 0 : index
    %c0_52 = arith.constant 0 : index
    %133 = vector.load %arg3[%c1_49, %c1_50, %c0_51, %c0_52] : memref<4x3x128x128xf32, #tpu.memory_space<vmem>>, vector<1x1x128x128xf32>
    %134 = vector.shape_cast %133 : vector<1x1x128x128xf32> to vector<128x128xf32>
    %c1_53 = arith.constant 1 : index
    %c2_54 = arith.constant 2 : index
    %c0_55 = arith.constant 0 : index
    %c0_56 = arith.constant 0 : index
    %135 = vector.load %arg3[%c1_53, %c2_54, %c0_55, %c0_56] : memref<4x3x128x128xf32, #tpu.memory_space<vmem>>, vector<1x1x128x128xf32>
    %136 = vector.shape_cast %135 : vector<1x1x128x128xf32> to vector<128x128xf32>
    %c1_57 = arith.constant 1 : index
    %c0_58 = arith.constant 0 : index
    %c0_59 = arith.constant 0 : index
    %137 = vector.load %arg4[%c1_57, %c0_58, %c0_59] : memref<4x8x128xf32, #tpu.memory_space<vmem>>, vector<1x8x128xf32>
    %138 = vector.shape_cast %137 : vector<1x8x128xf32> to vector<8x128xf32>
    %139 = vector.extract_strided_slice %138 {offsets = [0, 0], sizes = [1, 128], strides = [1, 1]} : vector<8x128xf32> to vector<1x128xf32>
    %140 = vector.extract_strided_slice %138 {offsets = [1, 0], sizes = [1, 128], strides = [1, 1]} : vector<8x128xf32> to vector<1x128xf32>
    %141 = vector.extract_strided_slice %138 {offsets = [2, 0], sizes = [1, 128], strides = [1, 1]} : vector<8x128xf32> to vector<1x128xf32>
    %142 = vector.extract_strided_slice %138 {offsets = [3, 0], sizes = [1, 128], strides = [1, 1]} : vector<8x128xf32> to vector<1x128xf32>
    %143 = vector.extract_strided_slice %138 {offsets = [4, 0], sizes = [1, 128], strides = [1, 1]} : vector<8x128xf32> to vector<1x128xf32>
    %144 = vector.extract_strided_slice %138 {offsets = [5, 0], sizes = [1, 128], strides = [1, 1]} : vector<8x128xf32> to vector<1x128xf32>
    %145 = vector.extract_strided_slice %138 {offsets = [6, 0], sizes = [1, 128], strides = [1, 1]} : vector<8x128xf32> to vector<1x128xf32>
    %146 = vector.extract_strided_slice %138 {offsets = [7, 0], sizes = [1, 128], strides = [1, 1]} : vector<8x128xf32> to vector<1x128xf32>
    %cst_60 = arith.constant dense<0.000000e+00> : vector<16x128xf32>
    %147 = tpu.matmul %130, %132, %cst_60 {dimension_numbers = #tpu.dot_dimension_numbers<[1], [0], [0], [1], [0, 0, 1, 1], [], []>} : vector<16x128xf32>, vector<128x128xf32>, vector<16x128xf32> -> vector<16x128xf32>
    %148 = vector.broadcast %139 : vector<1x128xf32> to vector<16x128xf32>
    %149 = arith.addf %147, %148 : vector<16x128xf32>
    %150 = vector.extract_strided_slice %149 {offsets = [0, 64], sizes = [16, 1], strides = [1, 1]} : vector<16x128xf32> to vector<16x1xf32>
    %cst_61 = arith.constant 0.000000e+00 : f32
    %151 = vector.broadcast %cst_61 : f32 to vector<16x1xf32>
    %152 = arith.cmpf oge, %150, %151 : vector<16x1xf32>
    %cst_62 = arith.constant 2.000000e-01 : f32
    %153 = vector.broadcast %cst_62 : f32 to vector<16x1xf32>
    %154 = arith.mulf %153, %150 : vector<16x1xf32>
    %155 = arith.select %152, %150, %154 : vector<16x1xi1>, vector<16x1xf32>
    %c8_i32 = arith.constant 8 : i32
    %156 = vector.broadcast %c8_i32 : i32 to vector<16x1xi32>
    %157 = arith.cmpi slt, %3, %156 : vector<16x1xi32>
    %cst_63 = arith.constant -1.000000e+30 : f32
    %158 = vector.broadcast %cst_63 : f32 to vector<16x1xf32>
    %159 = arith.select %157, %155, %158 : vector<16x1xi1>, vector<16x1xf32>
    %cst_64 = arith.constant dense<0xFF800000> : vector<1xf32>
    %160 = vector.multi_reduction <maximumf>, %159, %cst_64 [0] : vector<16x1xf32> to vector<1xf32>
    %161 = vector.shape_cast %160 : vector<1xf32> to vector<1x1xf32>
    %162 = vector.broadcast %161 : vector<1x1xf32> to vector<16x1xf32>
    %163 = arith.subf %159, %162 : vector<16x1xf32>
    %164 = math.exp %163 : vector<16x1xf32>
    %cst_65 = arith.constant 0.000000e+00 : f32
    %165 = vector.broadcast %cst_65 : f32 to vector<16x1xf32>
    %166 = arith.select %157, %164, %165 : vector<16x1xi1>, vector<16x1xf32>
    %c64_i32_66 = arith.constant 64 : i32
    %167 = vector.broadcast %c64_i32_66 : i32 to vector<1x128xi32>
    %168 = arith.cmpi eq, %2, %167 : vector<1x128xi32>
    %c65_i32_67 = arith.constant 65 : i32
    %169 = vector.broadcast %c65_i32_67 : i32 to vector<1x128xi32>
    %170 = arith.cmpi eq, %2, %169 : vector<1x128xi32>
    %cst_68 = arith.constant 1.000000e+00 : f32
    %171 = vector.shape_cast %170 : vector<1x128xi1> to vector<1x128xi1>
    %172 = vector.broadcast %171 : vector<1x128xi1> to vector<16x128xi1>
    %173 = vector.broadcast %cst_68 : f32 to vector<16x128xf32>
    %174 = arith.select %172, %173, %149 : vector<16x128xi1>, vector<16x128xf32>
    %cst_69 = arith.constant 0.000000e+00 : f32
    %175 = vector.shape_cast %168 : vector<1x128xi1> to vector<1x128xi1>
    %176 = vector.broadcast %175 : vector<1x128xi1> to vector<16x128xi1>
    %177 = vector.broadcast %cst_69 : f32 to vector<16x128xf32>
    %178 = arith.select %176, %177, %174 : vector<16x128xi1>, vector<16x128xf32>
    %179 = vector.broadcast %166 : vector<16x1xf32> to vector<16x128xf32>
    %180 = arith.mulf %178, %179 : vector<16x128xf32>
    %cst_70 = arith.constant dense<0.000000e+00> : vector<16x128xf32>
    %181 = tpu.matmul %1, %180, %cst_70 {dimension_numbers = #tpu.dot_dimension_numbers<[0], [0], [1], [1], [0, 1, 1, 1], [], []>} : vector<16x16xf32>, vector<16x128xf32>, vector<16x128xf32> -> vector<16x128xf32>
    %182 = vector.extract_strided_slice %181 {offsets = [0, 65], sizes = [16, 1], strides = [1, 1]} : vector<16x128xf32> to vector<16x1xf32>
    %cst_71 = arith.constant 1.000000e-30 : f32
    %183 = vector.broadcast %cst_71 : f32 to vector<16x1xf32>
    %184 = arith.maximumf %182, %183 : vector<16x1xf32>
    %cst_72 = arith.constant 1.000000e+00 : f32
    %185 = vector.broadcast %cst_72 : f32 to vector<16x1xf32>
    %186 = arith.divf %185, %184 : vector<16x1xf32>
    %187 = vector.broadcast %186 : vector<16x1xf32> to vector<16x128xf32>
    %188 = arith.mulf %181, %187 : vector<16x128xf32>
    %c65_i32_73 = arith.constant 65 : i32
    %189 = vector.broadcast %c65_i32_73 : i32 to vector<1x128xi32>
    %190 = arith.cmpi eq, %2, %189 : vector<1x128xi32>
    %cst_74 = arith.constant 0.000000e+00 : f32
    %191 = vector.shape_cast %190 : vector<1x128xi1> to vector<1x128xi1>
    %192 = vector.broadcast %191 : vector<1x128xi1> to vector<16x128xi1>
    %193 = vector.broadcast %cst_74 : f32 to vector<16x128xf32>
    %194 = arith.select %192, %193, %188 : vector<16x128xi1>, vector<16x128xf32>
    %195 = vector.broadcast %140 : vector<1x128xf32> to vector<16x128xf32>
    %196 = arith.addf %194, %195 : vector<16x128xf32>
    %cst_75 = arith.constant dense<0.000000e+00> : vector<16xf32>
    %197 = vector.multi_reduction <add>, %196, %cst_75 [1] : vector<16x128xf32> to vector<16xf32>
    %198 = vector.shape_cast %197 : vector<16xf32> to vector<16x1xf32>
    %cst_76 = arith.constant 1.562500e-02 : f32
    %199 = vector.broadcast %cst_76 : f32 to vector<16x1xf32>
    %200 = arith.mulf %198, %199 : vector<16x1xf32>
    %201 = arith.mulf %196, %196 : vector<16x128xf32>
    %cst_77 = arith.constant dense<0.000000e+00> : vector<16xf32>
    %202 = vector.multi_reduction <add>, %201, %cst_77 [1] : vector<16x128xf32> to vector<16xf32>
    %203 = vector.shape_cast %202 : vector<16xf32> to vector<16x1xf32>
    %cst_78 = arith.constant 1.562500e-02 : f32
    %204 = vector.broadcast %cst_78 : f32 to vector<16x1xf32>
    %205 = arith.mulf %203, %204 : vector<16x1xf32>
    %206 = arith.mulf %200, %200 : vector<16x1xf32>
    %207 = arith.subf %205, %206 : vector<16x1xf32>
    %cst_79 = arith.constant 0.000000e+00 : f32
    %208 = vector.broadcast %cst_79 : f32 to vector<16x1xf32>
    %209 = arith.maximumf %207, %208 : vector<16x1xf32>
    %210 = vector.broadcast %200 : vector<16x1xf32> to vector<16x128xf32>
    %211 = arith.subf %196, %210 : vector<16x128xf32>
    %cst_80 = arith.constant 9.99999974E-6 : f32
    %212 = vector.broadcast %cst_80 : f32 to vector<16x1xf32>
    %213 = arith.addf %209, %212 : vector<16x1xf32>
    %214 = math.rsqrt %213 : vector<16x1xf32>
    %215 = vector.broadcast %214 : vector<16x1xf32> to vector<16x128xf32>
    %216 = arith.mulf %211, %215 : vector<16x128xf32>
    %217 = vector.broadcast %143 : vector<1x128xf32> to vector<16x128xf32>
    %218 = arith.mulf %216, %217 : vector<16x128xf32>
    %219 = vector.broadcast %144 : vector<1x128xf32> to vector<16x128xf32>
    %220 = arith.addf %218, %219 : vector<16x128xf32>
    %cst_81 = arith.constant dense<0.000000e+00> : vector<16x128xf32>
    %221 = tpu.matmul %220, %134, %cst_81 {dimension_numbers = #tpu.dot_dimension_numbers<[1], [0], [0], [1], [0, 0, 1, 1], [], []>} : vector<16x128xf32>, vector<128x128xf32>, vector<16x128xf32> -> vector<16x128xf32>
    %222 = vector.broadcast %141 : vector<1x128xf32> to vector<16x128xf32>
    %223 = arith.addf %221, %222 : vector<16x128xf32>
    %cst_82 = arith.constant 0.000000e+00 : f32
    %224 = vector.broadcast %cst_82 : f32 to vector<16x128xf32>
    %225 = arith.maximumf %223, %224 : vector<16x128xf32>
    %cst_83 = arith.constant dense<0.000000e+00> : vector<16x128xf32>
    %226 = tpu.matmul %225, %136, %cst_83 {dimension_numbers = #tpu.dot_dimension_numbers<[1], [0], [0], [1], [0, 0, 1, 1], [], []>} : vector<16x128xf32>, vector<128x128xf32>, vector<16x128xf32> -> vector<16x128xf32>
    %227 = vector.broadcast %142 : vector<1x128xf32> to vector<16x128xf32>
    %228 = arith.addf %226, %227 : vector<16x128xf32>
    %cst_84 = arith.constant 0.000000e+00 : f32
    %229 = vector.broadcast %cst_84 : f32 to vector<16x128xf32>
    %230 = arith.maximumf %228, %229 : vector<16x128xf32>
    %231 = arith.addf %220, %230 : vector<16x128xf32>
    %cst_85 = arith.constant dense<0.000000e+00> : vector<16xf32>
    %232 = vector.multi_reduction <add>, %231, %cst_85 [1] : vector<16x128xf32> to vector<16xf32>
    %233 = vector.shape_cast %232 : vector<16xf32> to vector<16x1xf32>
    %cst_86 = arith.constant 1.562500e-02 : f32
    %234 = vector.broadcast %cst_86 : f32 to vector<16x1xf32>
    %235 = arith.mulf %233, %234 : vector<16x1xf32>
    %236 = arith.mulf %231, %231 : vector<16x128xf32>
    %cst_87 = arith.constant dense<0.000000e+00> : vector<16xf32>
    %237 = vector.multi_reduction <add>, %236, %cst_87 [1] : vector<16x128xf32> to vector<16xf32>
    %238 = vector.shape_cast %237 : vector<16xf32> to vector<16x1xf32>
    %cst_88 = arith.constant 1.562500e-02 : f32
    %239 = vector.broadcast %cst_88 : f32 to vector<16x1xf32>
    %240 = arith.mulf %238, %239 : vector<16x1xf32>
    %241 = arith.mulf %235, %235 : vector<16x1xf32>
    %242 = arith.subf %240, %241 : vector<16x1xf32>
    %cst_89 = arith.constant 0.000000e+00 : f32
    %243 = vector.broadcast %cst_89 : f32 to vector<16x1xf32>
    %244 = arith.maximumf %242, %243 : vector<16x1xf32>
    %245 = vector.broadcast %235 : vector<16x1xf32> to vector<16x128xf32>
    %246 = arith.subf %231, %245 : vector<16x128xf32>
    %cst_90 = arith.constant 9.99999974E-6 : f32
    %247 = vector.broadcast %cst_90 : f32 to vector<16x1xf32>
    %248 = arith.addf %244, %247 : vector<16x1xf32>
    %249 = math.rsqrt %248 : vector<16x1xf32>
    %250 = vector.broadcast %249 : vector<16x1xf32> to vector<16x128xf32>
    %251 = arith.mulf %246, %250 : vector<16x128xf32>
    %252 = vector.broadcast %145 : vector<1x128xf32> to vector<16x128xf32>
    %253 = arith.mulf %251, %252 : vector<16x128xf32>
    %254 = vector.broadcast %146 : vector<1x128xf32> to vector<16x128xf32>
    %255 = arith.addf %253, %254 : vector<16x128xf32>
    %cst_91 = arith.constant 0.000000e+00 : f32
    %256 = vector.broadcast %cst_91 : f32 to vector<16x128xf32>
    %257 = arith.maximumf %255, %256 : vector<16x128xf32>
    %c2_92 = arith.constant 2 : index
    %c0_93 = arith.constant 0 : index
    %c0_94 = arith.constant 0 : index
    %c0_95 = arith.constant 0 : index
    %258 = vector.load %arg3[%c2_92, %c0_93, %c0_94, %c0_95] : memref<4x3x128x128xf32, #tpu.memory_space<vmem>>, vector<1x1x128x128xf32>
    %259 = vector.shape_cast %258 : vector<1x1x128x128xf32> to vector<128x128xf32>
    %c2_96 = arith.constant 2 : index
    %c1_97 = arith.constant 1 : index
    %c0_98 = arith.constant 0 : index
    %c0_99 = arith.constant 0 : index
    %260 = vector.load %arg3[%c2_96, %c1_97, %c0_98, %c0_99] : memref<4x3x128x128xf32, #tpu.memory_space<vmem>>, vector<1x1x128x128xf32>
    %261 = vector.shape_cast %260 : vector<1x1x128x128xf32> to vector<128x128xf32>
    %c2_100 = arith.constant 2 : index
    %c2_101 = arith.constant 2 : index
    %c0_102 = arith.constant 0 : index
    %c0_103 = arith.constant 0 : index
    %262 = vector.load %arg3[%c2_100, %c2_101, %c0_102, %c0_103] : memref<4x3x128x128xf32, #tpu.memory_space<vmem>>, vector<1x1x128x128xf32>
    %263 = vector.shape_cast %262 : vector<1x1x128x128xf32> to vector<128x128xf32>
    %c2_104 = arith.constant 2 : index
    %c0_105 = arith.constant 0 : index
    %c0_106 = arith.constant 0 : index
    %264 = vector.load %arg4[%c2_104, %c0_105, %c0_106] : memref<4x8x128xf32, #tpu.memory_space<vmem>>, vector<1x8x128xf32>
    %265 = vector.shape_cast %264 : vector<1x8x128xf32> to vector<8x128xf32>
    %266 = vector.extract_strided_slice %265 {offsets = [0, 0], sizes = [1, 128], strides = [1, 1]} : vector<8x128xf32> to vector<1x128xf32>
    %267 = vector.extract_strided_slice %265 {offsets = [1, 0], sizes = [1, 128], strides = [1, 1]} : vector<8x128xf32> to vector<1x128xf32>
    %268 = vector.extract_strided_slice %265 {offsets = [2, 0], sizes = [1, 128], strides = [1, 1]} : vector<8x128xf32> to vector<1x128xf32>
    %269 = vector.extract_strided_slice %265 {offsets = [3, 0], sizes = [1, 128], strides = [1, 1]} : vector<8x128xf32> to vector<1x128xf32>
    %270 = vector.extract_strided_slice %265 {offsets = [4, 0], sizes = [1, 128], strides = [1, 1]} : vector<8x128xf32> to vector<1x128xf32>
    %271 = vector.extract_strided_slice %265 {offsets = [5, 0], sizes = [1, 128], strides = [1, 1]} : vector<8x128xf32> to vector<1x128xf32>
    %272 = vector.extract_strided_slice %265 {offsets = [6, 0], sizes = [1, 128], strides = [1, 1]} : vector<8x128xf32> to vector<1x128xf32>
    %273 = vector.extract_strided_slice %265 {offsets = [7, 0], sizes = [1, 128], strides = [1, 1]} : vector<8x128xf32> to vector<1x128xf32>
    %cst_107 = arith.constant dense<0.000000e+00> : vector<16x128xf32>
    %274 = tpu.matmul %257, %259, %cst_107 {dimension_numbers = #tpu.dot_dimension_numbers<[1], [0], [0], [1], [0, 0, 1, 1], [], []>} : vector<16x128xf32>, vector<128x128xf32>, vector<16x128xf32> -> vector<16x128xf32>
    %275 = vector.broadcast %266 : vector<1x128xf32> to vector<16x128xf32>
    %276 = arith.addf %274, %275 : vector<16x128xf32>
    %277 = vector.extract_strided_slice %276 {offsets = [0, 64], sizes = [16, 1], strides = [1, 1]} : vector<16x128xf32> to vector<16x1xf32>
    %cst_108 = arith.constant 0.000000e+00 : f32
    %278 = vector.broadcast %cst_108 : f32 to vector<16x1xf32>
    %279 = arith.cmpf oge, %277, %278 : vector<16x1xf32>
    %cst_109 = arith.constant 2.000000e-01 : f32
    %280 = vector.broadcast %cst_109 : f32 to vector<16x1xf32>
    %281 = arith.mulf %280, %277 : vector<16x1xf32>
    %282 = arith.select %279, %277, %281 : vector<16x1xi1>, vector<16x1xf32>
    %c16_i32_110 = arith.constant 16 : i32
    %283 = vector.broadcast %c16_i32_110 : i32 to vector<16x1xi32>
    %284 = arith.cmpi slt, %3, %283 : vector<16x1xi32>
    %cst_111 = arith.constant -1.000000e+30 : f32
    %285 = vector.broadcast %cst_111 : f32 to vector<16x1xf32>
    %286 = arith.select %284, %282, %285 : vector<16x1xi1>, vector<16x1xf32>
    %cst_112 = arith.constant dense<0xFF800000> : vector<1xf32>
    %287 = vector.multi_reduction <maximumf>, %286, %cst_112 [0] : vector<16x1xf32> to vector<1xf32>
    %288 = vector.shape_cast %287 : vector<1xf32> to vector<1x1xf32>
    %289 = vector.broadcast %288 : vector<1x1xf32> to vector<16x1xf32>
    %290 = arith.subf %286, %289 : vector<16x1xf32>
    %291 = math.exp %290 : vector<16x1xf32>
    %cst_113 = arith.constant 0.000000e+00 : f32
    %292 = vector.broadcast %cst_113 : f32 to vector<16x1xf32>
    %293 = arith.select %284, %291, %292 : vector<16x1xi1>, vector<16x1xf32>
    %c64_i32_114 = arith.constant 64 : i32
    %294 = vector.broadcast %c64_i32_114 : i32 to vector<1x128xi32>
    %295 = arith.cmpi eq, %2, %294 : vector<1x128xi32>
    %c65_i32_115 = arith.constant 65 : i32
    %296 = vector.broadcast %c65_i32_115 : i32 to vector<1x128xi32>
    %297 = arith.cmpi eq, %2, %296 : vector<1x128xi32>
    %cst_116 = arith.constant 1.000000e+00 : f32
    %298 = vector.shape_cast %297 : vector<1x128xi1> to vector<1x128xi1>
    %299 = vector.broadcast %298 : vector<1x128xi1> to vector<16x128xi1>
    %300 = vector.broadcast %cst_116 : f32 to vector<16x128xf32>
    %301 = arith.select %299, %300, %276 : vector<16x128xi1>, vector<16x128xf32>
    %cst_117 = arith.constant 0.000000e+00 : f32
    %302 = vector.shape_cast %295 : vector<1x128xi1> to vector<1x128xi1>
    %303 = vector.broadcast %302 : vector<1x128xi1> to vector<16x128xi1>
    %304 = vector.broadcast %cst_117 : f32 to vector<16x128xf32>
    %305 = arith.select %303, %304, %301 : vector<16x128xi1>, vector<16x128xf32>
    %306 = vector.broadcast %293 : vector<16x1xf32> to vector<16x128xf32>
    %307 = arith.mulf %305, %306 : vector<16x128xf32>
    %cst_118 = arith.constant dense<0.000000e+00> : vector<16x128xf32>
    %308 = tpu.matmul %1, %307, %cst_118 {dimension_numbers = #tpu.dot_dimension_numbers<[1], [0], [0], [1], [0, 0, 1, 1], [], []>} : vector<16x16xf32>, vector<16x128xf32>, vector<16x128xf32> -> vector<16x128xf32>
    %309 = vector.extract_strided_slice %308 {offsets = [0, 65], sizes = [16, 1], strides = [1, 1]} : vector<16x128xf32> to vector<16x1xf32>
    %cst_119 = arith.constant 1.000000e-30 : f32
    %310 = vector.broadcast %cst_119 : f32 to vector<16x1xf32>
    %311 = arith.maximumf %309, %310 : vector<16x1xf32>
    %cst_120 = arith.constant 1.000000e+00 : f32
    %312 = vector.broadcast %cst_120 : f32 to vector<16x1xf32>
    %313 = arith.divf %312, %311 : vector<16x1xf32>
    %314 = vector.broadcast %313 : vector<16x1xf32> to vector<16x128xf32>
    %315 = arith.mulf %308, %314 : vector<16x128xf32>
    %c65_i32_121 = arith.constant 65 : i32
    %316 = vector.broadcast %c65_i32_121 : i32 to vector<1x128xi32>
    %317 = arith.cmpi eq, %2, %316 : vector<1x128xi32>
    %cst_122 = arith.constant 0.000000e+00 : f32
    %318 = vector.shape_cast %317 : vector<1x128xi1> to vector<1x128xi1>
    %319 = vector.broadcast %318 : vector<1x128xi1> to vector<16x128xi1>
    %320 = vector.broadcast %cst_122 : f32 to vector<16x128xf32>
    %321 = arith.select %319, %320, %315 : vector<16x128xi1>, vector<16x128xf32>
    %322 = vector.broadcast %267 : vector<1x128xf32> to vector<16x128xf32>
    %323 = arith.addf %321, %322 : vector<16x128xf32>
    %cst_123 = arith.constant dense<0.000000e+00> : vector<16xf32>
    %324 = vector.multi_reduction <add>, %323, %cst_123 [1] : vector<16x128xf32> to vector<16xf32>
    %325 = vector.shape_cast %324 : vector<16xf32> to vector<16x1xf32>
    %cst_124 = arith.constant 1.562500e-02 : f32
    %326 = vector.broadcast %cst_124 : f32 to vector<16x1xf32>
    %327 = arith.mulf %325, %326 : vector<16x1xf32>
    %328 = arith.mulf %323, %323 : vector<16x128xf32>
    %cst_125 = arith.constant dense<0.000000e+00> : vector<16xf32>
    %329 = vector.multi_reduction <add>, %328, %cst_125 [1] : vector<16x128xf32> to vector<16xf32>
    %330 = vector.shape_cast %329 : vector<16xf32> to vector<16x1xf32>
    %cst_126 = arith.constant 1.562500e-02 : f32
    %331 = vector.broadcast %cst_126 : f32 to vector<16x1xf32>
    %332 = arith.mulf %330, %331 : vector<16x1xf32>
    %333 = arith.mulf %327, %327 : vector<16x1xf32>
    %334 = arith.subf %332, %333 : vector<16x1xf32>
    %cst_127 = arith.constant 0.000000e+00 : f32
    %335 = vector.broadcast %cst_127 : f32 to vector<16x1xf32>
    %336 = arith.maximumf %334, %335 : vector<16x1xf32>
    %337 = vector.broadcast %327 : vector<16x1xf32> to vector<16x128xf32>
    %338 = arith.subf %323, %337 : vector<16x128xf32>
    %cst_128 = arith.constant 9.99999974E-6 : f32
    %339 = vector.broadcast %cst_128 : f32 to vector<16x1xf32>
    %340 = arith.addf %336, %339 : vector<16x1xf32>
    %341 = math.rsqrt %340 : vector<16x1xf32>
    %342 = vector.broadcast %341 : vector<16x1xf32> to vector<16x128xf32>
    %343 = arith.mulf %338, %342 : vector<16x128xf32>
    %344 = vector.broadcast %270 : vector<1x128xf32> to vector<16x128xf32>
    %345 = arith.mulf %343, %344 : vector<16x128xf32>
    %346 = vector.broadcast %271 : vector<1x128xf32> to vector<16x128xf32>
    %347 = arith.addf %345, %346 : vector<16x128xf32>
    %cst_129 = arith.constant dense<0.000000e+00> : vector<16x128xf32>
    %348 = tpu.matmul %347, %261, %cst_129 {dimension_numbers = #tpu.dot_dimension_numbers<[1], [0], [0], [1], [0, 0, 1, 1], [], []>} : vector<16x128xf32>, vector<128x128xf32>, vector<16x128xf32> -> vector<16x128xf32>
    %349 = vector.broadcast %268 : vector<1x128xf32> to vector<16x128xf32>
    %350 = arith.addf %348, %349 : vector<16x128xf32>
    %cst_130 = arith.constant 0.000000e+00 : f32
    %351 = vector.broadcast %cst_130 : f32 to vector<16x128xf32>
    %352 = arith.maximumf %350, %351 : vector<16x128xf32>
    %cst_131 = arith.constant dense<0.000000e+00> : vector<16x128xf32>
    %353 = tpu.matmul %352, %263, %cst_131 {dimension_numbers = #tpu.dot_dimension_numbers<[1], [0], [0], [1], [0, 0, 1, 1], [], []>} : vector<16x128xf32>, vector<128x128xf32>, vector<16x128xf32> -> vector<16x128xf32>
    %354 = vector.broadcast %269 : vector<1x128xf32> to vector<16x128xf32>
    %355 = arith.addf %353, %354 : vector<16x128xf32>
    %cst_132 = arith.constant 0.000000e+00 : f32
    %356 = vector.broadcast %cst_132 : f32 to vector<16x128xf32>
    %357 = arith.maximumf %355, %356 : vector<16x128xf32>
    %358 = arith.addf %347, %357 : vector<16x128xf32>
    %cst_133 = arith.constant dense<0.000000e+00> : vector<16xf32>
    %359 = vector.multi_reduction <add>, %358, %cst_133 [1] : vector<16x128xf32> to vector<16xf32>
    %360 = vector.shape_cast %359 : vector<16xf32> to vector<16x1xf32>
    %cst_134 = arith.constant 1.562500e-02 : f32
    %361 = vector.broadcast %cst_134 : f32 to vector<16x1xf32>
    %362 = arith.mulf %360, %361 : vector<16x1xf32>
    %363 = arith.mulf %358, %358 : vector<16x128xf32>
    %cst_135 = arith.constant dense<0.000000e+00> : vector<16xf32>
    %364 = vector.multi_reduction <add>, %363, %cst_135 [1] : vector<16x128xf32> to vector<16xf32>
    %365 = vector.shape_cast %364 : vector<16xf32> to vector<16x1xf32>
    %cst_136 = arith.constant 1.562500e-02 : f32
    %366 = vector.broadcast %cst_136 : f32 to vector<16x1xf32>
    %367 = arith.mulf %365, %366 : vector<16x1xf32>
    %368 = arith.mulf %362, %362 : vector<16x1xf32>
    %369 = arith.subf %367, %368 : vector<16x1xf32>
    %cst_137 = arith.constant 0.000000e+00 : f32
    %370 = vector.broadcast %cst_137 : f32 to vector<16x1xf32>
    %371 = arith.maximumf %369, %370 : vector<16x1xf32>
    %372 = vector.broadcast %362 : vector<16x1xf32> to vector<16x128xf32>
    %373 = arith.subf %358, %372 : vector<16x128xf32>
    %cst_138 = arith.constant 9.99999974E-6 : f32
    %374 = vector.broadcast %cst_138 : f32 to vector<16x1xf32>
    %375 = arith.addf %371, %374 : vector<16x1xf32>
    %376 = math.rsqrt %375 : vector<16x1xf32>
    %377 = vector.broadcast %376 : vector<16x1xf32> to vector<16x128xf32>
    %378 = arith.mulf %373, %377 : vector<16x128xf32>
    %379 = vector.broadcast %272 : vector<1x128xf32> to vector<16x128xf32>
    %380 = arith.mulf %378, %379 : vector<16x128xf32>
    %381 = vector.broadcast %273 : vector<1x128xf32> to vector<16x128xf32>
    %382 = arith.addf %380, %381 : vector<16x128xf32>
    %cst_139 = arith.constant 0.000000e+00 : f32
    %383 = vector.broadcast %cst_139 : f32 to vector<16x128xf32>
    %384 = arith.maximumf %382, %383 : vector<16x128xf32>
    %c3 = arith.constant 3 : index
    %c0_140 = arith.constant 0 : index
    %c0_141 = arith.constant 0 : index
    %c0_142 = arith.constant 0 : index
    %385 = vector.load %arg3[%c3, %c0_140, %c0_141, %c0_142] : memref<4x3x128x128xf32, #tpu.memory_space<vmem>>, vector<1x1x128x128xf32>
    %386 = vector.shape_cast %385 : vector<1x1x128x128xf32> to vector<128x128xf32>
    %c3_143 = arith.constant 3 : index
    %c1_144 = arith.constant 1 : index
    %c0_145 = arith.constant 0 : index
    %c0_146 = arith.constant 0 : index
    %387 = vector.load %arg3[%c3_143, %c1_144, %c0_145, %c0_146] : memref<4x3x128x128xf32, #tpu.memory_space<vmem>>, vector<1x1x128x128xf32>
    %388 = vector.shape_cast %387 : vector<1x1x128x128xf32> to vector<128x128xf32>
    %c3_147 = arith.constant 3 : index
    %c2_148 = arith.constant 2 : index
    %c0_149 = arith.constant 0 : index
    %c0_150 = arith.constant 0 : index
    %389 = vector.load %arg3[%c3_147, %c2_148, %c0_149, %c0_150] : memref<4x3x128x128xf32, #tpu.memory_space<vmem>>, vector<1x1x128x128xf32>
    %390 = vector.shape_cast %389 : vector<1x1x128x128xf32> to vector<128x128xf32>
    %c3_151 = arith.constant 3 : index
    %c0_152 = arith.constant 0 : index
    %c0_153 = arith.constant 0 : index
    %391 = vector.load %arg4[%c3_151, %c0_152, %c0_153] : memref<4x8x128xf32, #tpu.memory_space<vmem>>, vector<1x8x128xf32>
    %392 = vector.shape_cast %391 : vector<1x8x128xf32> to vector<8x128xf32>
    %393 = vector.extract_strided_slice %392 {offsets = [0, 0], sizes = [1, 128], strides = [1, 1]} : vector<8x128xf32> to vector<1x128xf32>
    %394 = vector.extract_strided_slice %392 {offsets = [1, 0], sizes = [1, 128], strides = [1, 1]} : vector<8x128xf32> to vector<1x128xf32>
    %395 = vector.extract_strided_slice %392 {offsets = [2, 0], sizes = [1, 128], strides = [1, 1]} : vector<8x128xf32> to vector<1x128xf32>
    %396 = vector.extract_strided_slice %392 {offsets = [3, 0], sizes = [1, 128], strides = [1, 1]} : vector<8x128xf32> to vector<1x128xf32>
    %397 = vector.extract_strided_slice %392 {offsets = [4, 0], sizes = [1, 128], strides = [1, 1]} : vector<8x128xf32> to vector<1x128xf32>
    %398 = vector.extract_strided_slice %392 {offsets = [5, 0], sizes = [1, 128], strides = [1, 1]} : vector<8x128xf32> to vector<1x128xf32>
    %399 = vector.extract_strided_slice %392 {offsets = [6, 0], sizes = [1, 128], strides = [1, 1]} : vector<8x128xf32> to vector<1x128xf32>
    %400 = vector.extract_strided_slice %392 {offsets = [7, 0], sizes = [1, 128], strides = [1, 1]} : vector<8x128xf32> to vector<1x128xf32>
    %cst_154 = arith.constant dense<0.000000e+00> : vector<16x128xf32>
    %401 = tpu.matmul %384, %386, %cst_154 {dimension_numbers = #tpu.dot_dimension_numbers<[1], [0], [0], [1], [0, 0, 1, 1], [], []>} : vector<16x128xf32>, vector<128x128xf32>, vector<16x128xf32> -> vector<16x128xf32>
    %402 = vector.broadcast %393 : vector<1x128xf32> to vector<16x128xf32>
    %403 = arith.addf %401, %402 : vector<16x128xf32>
    %404 = vector.extract_strided_slice %403 {offsets = [0, 64], sizes = [16, 1], strides = [1, 1]} : vector<16x128xf32> to vector<16x1xf32>
    %cst_155 = arith.constant 0.000000e+00 : f32
    %405 = vector.broadcast %cst_155 : f32 to vector<16x1xf32>
    %406 = arith.cmpf oge, %404, %405 : vector<16x1xf32>
    %cst_156 = arith.constant 2.000000e-01 : f32
    %407 = vector.broadcast %cst_156 : f32 to vector<16x1xf32>
    %408 = arith.mulf %407, %404 : vector<16x1xf32>
    %409 = arith.select %406, %404, %408 : vector<16x1xi1>, vector<16x1xf32>
    %c8_i32_157 = arith.constant 8 : i32
    %410 = vector.broadcast %c8_i32_157 : i32 to vector<16x1xi32>
    %411 = arith.cmpi slt, %3, %410 : vector<16x1xi32>
    %cst_158 = arith.constant -1.000000e+30 : f32
    %412 = vector.broadcast %cst_158 : f32 to vector<16x1xf32>
    %413 = arith.select %411, %409, %412 : vector<16x1xi1>, vector<16x1xf32>
    %cst_159 = arith.constant dense<0xFF800000> : vector<1xf32>
    %414 = vector.multi_reduction <maximumf>, %413, %cst_159 [0] : vector<16x1xf32> to vector<1xf32>
    %415 = vector.shape_cast %414 : vector<1xf32> to vector<1x1xf32>
    %416 = vector.broadcast %415 : vector<1x1xf32> to vector<16x1xf32>
    %417 = arith.subf %413, %416 : vector<16x1xf32>
    %418 = math.exp %417 : vector<16x1xf32>
    %cst_160 = arith.constant 0.000000e+00 : f32
    %419 = vector.broadcast %cst_160 : f32 to vector<16x1xf32>
    %420 = arith.select %411, %418, %419 : vector<16x1xi1>, vector<16x1xf32>
    %c64_i32_161 = arith.constant 64 : i32
    %421 = vector.broadcast %c64_i32_161 : i32 to vector<1x128xi32>
    %422 = arith.cmpi eq, %2, %421 : vector<1x128xi32>
    %c65_i32_162 = arith.constant 65 : i32
    %423 = vector.broadcast %c65_i32_162 : i32 to vector<1x128xi32>
    %424 = arith.cmpi eq, %2, %423 : vector<1x128xi32>
    %cst_163 = arith.constant 1.000000e+00 : f32
    %425 = vector.shape_cast %424 : vector<1x128xi1> to vector<1x128xi1>
    %426 = vector.broadcast %425 : vector<1x128xi1> to vector<16x128xi1>
    %427 = vector.broadcast %cst_163 : f32 to vector<16x128xf32>
    %428 = arith.select %426, %427, %403 : vector<16x128xi1>, vector<16x128xf32>
    %cst_164 = arith.constant 0.000000e+00 : f32
    %429 = vector.shape_cast %422 : vector<1x128xi1> to vector<1x128xi1>
    %430 = vector.broadcast %429 : vector<1x128xi1> to vector<16x128xi1>
    %431 = vector.broadcast %cst_164 : f32 to vector<16x128xf32>
    %432 = arith.select %430, %431, %428 : vector<16x128xi1>, vector<16x128xf32>
    %433 = vector.broadcast %420 : vector<16x1xf32> to vector<16x128xf32>
    %434 = arith.mulf %432, %433 : vector<16x128xf32>
    %cst_165 = arith.constant dense<0.000000e+00> : vector<16x128xf32>
    %435 = tpu.matmul %1, %434, %cst_165 {dimension_numbers = #tpu.dot_dimension_numbers<[0], [0], [1], [1], [0, 1, 1, 1], [], []>} : vector<16x16xf32>, vector<16x128xf32>, vector<16x128xf32> -> vector<16x128xf32>
    %436 = vector.extract_strided_slice %435 {offsets = [0, 65], sizes = [16, 1], strides = [1, 1]} : vector<16x128xf32> to vector<16x1xf32>
    %cst_166 = arith.constant 1.000000e-30 : f32
    %437 = vector.broadcast %cst_166 : f32 to vector<16x1xf32>
    %438 = arith.maximumf %436, %437 : vector<16x1xf32>
    %cst_167 = arith.constant 1.000000e+00 : f32
    %439 = vector.broadcast %cst_167 : f32 to vector<16x1xf32>
    %440 = arith.divf %439, %438 : vector<16x1xf32>
    %441 = vector.broadcast %440 : vector<16x1xf32> to vector<16x128xf32>
    %442 = arith.mulf %435, %441 : vector<16x128xf32>
    %c65_i32_168 = arith.constant 65 : i32
    %443 = vector.broadcast %c65_i32_168 : i32 to vector<1x128xi32>
    %444 = arith.cmpi eq, %2, %443 : vector<1x128xi32>
    %cst_169 = arith.constant 0.000000e+00 : f32
    %445 = vector.shape_cast %444 : vector<1x128xi1> to vector<1x128xi1>
    %446 = vector.broadcast %445 : vector<1x128xi1> to vector<16x128xi1>
    %447 = vector.broadcast %cst_169 : f32 to vector<16x128xf32>
    %448 = arith.select %446, %447, %442 : vector<16x128xi1>, vector<16x128xf32>
    %449 = vector.broadcast %394 : vector<1x128xf32> to vector<16x128xf32>
    %450 = arith.addf %448, %449 : vector<16x128xf32>
    %cst_170 = arith.constant dense<0.000000e+00> : vector<16xf32>
    %451 = vector.multi_reduction <add>, %450, %cst_170 [1] : vector<16x128xf32> to vector<16xf32>
    %452 = vector.shape_cast %451 : vector<16xf32> to vector<16x1xf32>
    %cst_171 = arith.constant 1.562500e-02 : f32
    %453 = vector.broadcast %cst_171 : f32 to vector<16x1xf32>
    %454 = arith.mulf %452, %453 : vector<16x1xf32>
    %455 = arith.mulf %450, %450 : vector<16x128xf32>
    %cst_172 = arith.constant dense<0.000000e+00> : vector<16xf32>
    %456 = vector.multi_reduction <add>, %455, %cst_172 [1] : vector<16x128xf32> to vector<16xf32>
    %457 = vector.shape_cast %456 : vector<16xf32> to vector<16x1xf32>
    %cst_173 = arith.constant 1.562500e-02 : f32
    %458 = vector.broadcast %cst_173 : f32 to vector<16x1xf32>
    %459 = arith.mulf %457, %458 : vector<16x1xf32>
    %460 = arith.mulf %454, %454 : vector<16x1xf32>
    %461 = arith.subf %459, %460 : vector<16x1xf32>
    %cst_174 = arith.constant 0.000000e+00 : f32
    %462 = vector.broadcast %cst_174 : f32 to vector<16x1xf32>
    %463 = arith.maximumf %461, %462 : vector<16x1xf32>
    %464 = vector.broadcast %454 : vector<16x1xf32> to vector<16x128xf32>
    %465 = arith.subf %450, %464 : vector<16x128xf32>
    %cst_175 = arith.constant 9.99999974E-6 : f32
    %466 = vector.broadcast %cst_175 : f32 to vector<16x1xf32>
    %467 = arith.addf %463, %466 : vector<16x1xf32>
    %468 = math.rsqrt %467 : vector<16x1xf32>
    %469 = vector.broadcast %468 : vector<16x1xf32> to vector<16x128xf32>
    %470 = arith.mulf %465, %469 : vector<16x128xf32>
    %471 = vector.broadcast %397 : vector<1x128xf32> to vector<16x128xf32>
    %472 = arith.mulf %470, %471 : vector<16x128xf32>
    %473 = vector.broadcast %398 : vector<1x128xf32> to vector<16x128xf32>
    %474 = arith.addf %472, %473 : vector<16x128xf32>
    %cst_176 = arith.constant dense<0.000000e+00> : vector<16x128xf32>
    %475 = tpu.matmul %474, %388, %cst_176 {dimension_numbers = #tpu.dot_dimension_numbers<[1], [0], [0], [1], [0, 0, 1, 1], [], []>} : vector<16x128xf32>, vector<128x128xf32>, vector<16x128xf32> -> vector<16x128xf32>
    %476 = vector.broadcast %395 : vector<1x128xf32> to vector<16x128xf32>
    %477 = arith.addf %475, %476 : vector<16x128xf32>
    %cst_177 = arith.constant 0.000000e+00 : f32
    %478 = vector.broadcast %cst_177 : f32 to vector<16x128xf32>
    %479 = arith.maximumf %477, %478 : vector<16x128xf32>
    %cst_178 = arith.constant dense<0.000000e+00> : vector<16x128xf32>
    %480 = tpu.matmul %479, %390, %cst_178 {dimension_numbers = #tpu.dot_dimension_numbers<[1], [0], [0], [1], [0, 0, 1, 1], [], []>} : vector<16x128xf32>, vector<128x128xf32>, vector<16x128xf32> -> vector<16x128xf32>
    %481 = vector.broadcast %396 : vector<1x128xf32> to vector<16x128xf32>
    %482 = arith.addf %480, %481 : vector<16x128xf32>
    %cst_179 = arith.constant 0.000000e+00 : f32
    %483 = vector.broadcast %cst_179 : f32 to vector<16x128xf32>
    %484 = arith.maximumf %482, %483 : vector<16x128xf32>
    %485 = arith.addf %474, %484 : vector<16x128xf32>
    %cst_180 = arith.constant dense<0.000000e+00> : vector<16xf32>
    %486 = vector.multi_reduction <add>, %485, %cst_180 [1] : vector<16x128xf32> to vector<16xf32>
    %487 = vector.shape_cast %486 : vector<16xf32> to vector<16x1xf32>
    %cst_181 = arith.constant 1.562500e-02 : f32
    %488 = vector.broadcast %cst_181 : f32 to vector<16x1xf32>
    %489 = arith.mulf %487, %488 : vector<16x1xf32>
    %490 = arith.mulf %485, %485 : vector<16x128xf32>
    %cst_182 = arith.constant dense<0.000000e+00> : vector<16xf32>
    %491 = vector.multi_reduction <add>, %490, %cst_182 [1] : vector<16x128xf32> to vector<16xf32>
    %492 = vector.shape_cast %491 : vector<16xf32> to vector<16x1xf32>
    %cst_183 = arith.constant 1.562500e-02 : f32
    %493 = vector.broadcast %cst_183 : f32 to vector<16x1xf32>
    %494 = arith.mulf %492, %493 : vector<16x1xf32>
    %495 = arith.mulf %489, %489 : vector<16x1xf32>
    %496 = arith.subf %494, %495 : vector<16x1xf32>
    %cst_184 = arith.constant 0.000000e+00 : f32
    %497 = vector.broadcast %cst_184 : f32 to vector<16x1xf32>
    %498 = arith.maximumf %496, %497 : vector<16x1xf32>
    %499 = vector.broadcast %489 : vector<16x1xf32> to vector<16x128xf32>
    %500 = arith.subf %485, %499 : vector<16x128xf32>
    %cst_185 = arith.constant 9.99999974E-6 : f32
    %501 = vector.broadcast %cst_185 : f32 to vector<16x1xf32>
    %502 = arith.addf %498, %501 : vector<16x1xf32>
    %503 = math.rsqrt %502 : vector<16x1xf32>
    %504 = vector.broadcast %503 : vector<16x1xf32> to vector<16x128xf32>
    %505 = arith.mulf %500, %504 : vector<16x128xf32>
    %506 = vector.broadcast %399 : vector<1x128xf32> to vector<16x128xf32>
    %507 = arith.mulf %505, %506 : vector<16x128xf32>
    %508 = vector.broadcast %400 : vector<1x128xf32> to vector<16x128xf32>
    %509 = arith.addf %507, %508 : vector<16x128xf32>
    %cst_186 = arith.constant 0.000000e+00 : f32
    %510 = vector.broadcast %cst_186 : f32 to vector<16x128xf32>
    %511 = arith.maximumf %509, %510 : vector<16x128xf32>
    %c0_187 = arith.constant 0 : index
    %c0_188 = arith.constant 0 : index
    %c0_189 = arith.constant 0 : index
    %512 = vector.load %arg5[%c0_187, %c0_188, %c0_189] : memref<2x128x128xf32, #tpu.memory_space<vmem>>, vector<1x128x128xf32>
    %513 = vector.shape_cast %512 : vector<1x128x128xf32> to vector<128x128xf32>
    %c1_190 = arith.constant 1 : index
    %c0_191 = arith.constant 0 : index
    %c0_192 = arith.constant 0 : index
    %514 = vector.load %arg5[%c1_190, %c0_191, %c0_192] : memref<2x128x128xf32, #tpu.memory_space<vmem>>, vector<1x128x128xf32>
    %515 = vector.shape_cast %514 : vector<1x128x128xf32> to vector<128x128xf32>
    %c0_193 = arith.constant 0 : index
    %c0_194 = arith.constant 0 : index
    %516 = vector.load %arg6[%c0_193, %c0_194] : memref<4x128xf32, #tpu.memory_space<vmem>>, vector<1x128xf32>
    %c1_195 = arith.constant 1 : index
    %c0_196 = arith.constant 0 : index
    %517 = vector.load %arg6[%c1_195, %c0_196] : memref<4x128xf32, #tpu.memory_space<vmem>>, vector<1x128xf32>
    %c2_197 = arith.constant 2 : index
    %c0_198 = arith.constant 0 : index
    %518 = vector.load %arg6[%c2_197, %c0_198] : memref<4x128xf32, #tpu.memory_space<vmem>>, vector<1x128xf32>
    %c3_199 = arith.constant 3 : index
    %c0_200 = arith.constant 0 : index
    %519 = vector.load %arg6[%c3_199, %c0_200] : memref<4x128xf32, #tpu.memory_space<vmem>>, vector<1x128xf32>
    %cst_201 = arith.constant dense<0.000000e+00> : vector<16x128xf32>
    %520 = tpu.matmul %511, %513, %cst_201 {dimension_numbers = #tpu.dot_dimension_numbers<[1], [0], [0], [1], [0, 0, 1, 1], [], []>} : vector<16x128xf32>, vector<128x128xf32>, vector<16x128xf32> -> vector<16x128xf32>
    %521 = vector.broadcast %516 : vector<1x128xf32> to vector<16x128xf32>
    %522 = arith.addf %520, %521 : vector<16x128xf32>
    %cst_202 = arith.constant 0.000000e+00 : f32
    %523 = vector.broadcast %cst_202 : f32 to vector<16x128xf32>
    %524 = arith.maximumf %522, %523 : vector<16x128xf32>
    %cst_203 = arith.constant dense<0.000000e+00> : vector<16xf32>
    %525 = vector.multi_reduction <add>, %524, %cst_203 [1] : vector<16x128xf32> to vector<16xf32>
    %526 = vector.shape_cast %525 : vector<16xf32> to vector<16x1xf32>
    %cst_204 = arith.constant 1.562500e-02 : f32
    %527 = vector.broadcast %cst_204 : f32 to vector<16x1xf32>
    %528 = arith.mulf %526, %527 : vector<16x1xf32>
    %529 = arith.mulf %524, %524 : vector<16x128xf32>
    %cst_205 = arith.constant dense<0.000000e+00> : vector<16xf32>
    %530 = vector.multi_reduction <add>, %529, %cst_205 [1] : vector<16x128xf32> to vector<16xf32>
    %531 = vector.shape_cast %530 : vector<16xf32> to vector<16x1xf32>
    %cst_206 = arith.constant 1.562500e-02 : f32
    %532 = vector.broadcast %cst_206 : f32 to vector<16x1xf32>
    %533 = arith.mulf %531, %532 : vector<16x1xf32>
    %534 = arith.mulf %528, %528 : vector<16x1xf32>
    %535 = arith.subf %533, %534 : vector<16x1xf32>
    %cst_207 = arith.constant 0.000000e+00 : f32
    %536 = vector.broadcast %cst_207 : f32 to vector<16x1xf32>
    %537 = arith.maximumf %535, %536 : vector<16x1xf32>
    %538 = vector.broadcast %528 : vector<16x1xf32> to vector<16x128xf32>
    %539 = arith.subf %524, %538 : vector<16x128xf32>
    %cst_208 = arith.constant 9.99999974E-6 : f32
    %540 = vector.broadcast %cst_208 : f32 to vector<16x1xf32>
    %541 = arith.addf %537, %540 : vector<16x1xf32>
    %542 = math.rsqrt %541 : vector<16x1xf32>
    %543 = vector.broadcast %542 : vector<16x1xf32> to vector<16x128xf32>
    %544 = arith.mulf %539, %543 : vector<16x128xf32>
    %545 = vector.broadcast %518 : vector<1x128xf32> to vector<16x128xf32>
    %546 = arith.mulf %544, %545 : vector<16x128xf32>
    %547 = vector.broadcast %519 : vector<1x128xf32> to vector<16x128xf32>
    %548 = arith.addf %546, %547 : vector<16x128xf32>
    %cst_209 = arith.constant dense<0.000000e+00> : vector<16x128xf32>
    %549 = tpu.matmul %548, %515, %cst_209 {dimension_numbers = #tpu.dot_dimension_numbers<[1], [0], [0], [1], [0, 0, 1, 1], [], []>} : vector<16x128xf32>, vector<128x128xf32>, vector<16x128xf32> -> vector<16x128xf32>
    %550 = vector.broadcast %517 : vector<1x128xf32> to vector<16x128xf32>
    %551 = arith.addf %549, %550 : vector<16x128xf32>
    %c0_210 = arith.constant 0 : index
    %c0_211 = arith.constant 0 : index
    %552 = vector.load %arg7[%c0_210, %c0_211] : memref<16x128xf32, #tpu.memory_space<vmem>>, vector<16x128xf32>
    tpu.vector_store %arg7[%c0_210, %c0_211], %551 {strides = array<i32>} : memref<16x128xf32, #tpu.memory_space<vmem>>, vector<16x128xf32>,
    return
  }
  func.func @transform_0(%arg0: i32) -> (i32, i32) {
    %c0_i32 = arith.constant 0 : i32
    %c0_i32_0 = arith.constant 0 : i32
    %c0_i32_1 = arith.constant 0 : i32
    return %c0_i32, %c0_i32_0 : i32, i32
  }
  func.func @transform_1(%arg0: i32) -> (i32, i32) {
    %c0_i32 = arith.constant 0 : i32
    %c0_i32_0 = arith.constant 0 : i32
    %c0_i32_1 = arith.constant 0 : i32
    return %c0_i32, %c0_i32_0 : i32, i32
  }
  func.func @transform_2(%arg0: i32) -> (i32, i32, i32, i32) {
    %c0_i32 = arith.constant 0 : i32
    %c0_i32_0 = arith.constant 0 : i32
    %c0_i32_1 = arith.constant 0 : i32
    %c0_i32_2 = arith.constant 0 : i32
    %c0_i32_3 = arith.constant 0 : i32
    return %c0_i32, %c0_i32_0, %c0_i32_1, %c0_i32_2 : i32, i32, i32, i32
  }
  func.func @transform_3(%arg0: i32) -> (i32, i32, i32) {
    %c0_i32 = arith.constant 0 : i32
    %c0_i32_0 = arith.constant 0 : i32
    %c0_i32_1 = arith.constant 0 : i32
    %c0_i32_2 = arith.constant 0 : i32
    return %c0_i32, %c0_i32_0, %c0_i32_1 : i32, i32, i32
  }
  func.func @transform_4(%arg0: i32) -> (i32, i32, i32) {
    %c0_i32 = arith.constant 0 : i32
    %c0_i32_0 = arith.constant 0 : i32
    %c0_i32_1 = arith.constant 0 : i32
    %c0_i32_2 = arith.constant 0 : i32
    return %c0_i32, %c0_i32_0, %c0_i32_1 : i32, i32, i32
  }
  func.func @transform_5(%arg0: i32) -> (i32, i32) {
    %c0_i32 = arith.constant 0 : i32
    %c0_i32_0 = arith.constant 0 : i32
    %c0_i32_1 = arith.constant 0 : i32
    return %c0_i32, %c0_i32_0 : i32, i32
  }
  func.func @transform_6(%arg0: i32) -> (i32, i32) {
    %c0_i32 = arith.constant 0 : i32
    %c0_i32_0 = arith.constant 0 : i32
    %c0_i32_1 = arith.constant 0 : i32
    return %c0_i32, %c0_i32_0 : i32, i32
  }
}

</mosaic_0001>

<bundles_post_ra>
// kernel: setgnn_forward.1
= control target key start
LH: loop header
LB: loop body
LE: loop exit
PB: predicated region body
PF: predicated region fallthrough
CT: control target
= control target key end

     0   :  { %v3480_v18 = vmov 64   ;;  %v27_v19 = vlaneseq  ;;  %vm172_vm1 = vcmask 531968   ;;  %vm212_vm3 = vcmask 130048   ;;  %s4541_s2 = inlined_call_operand.vmem [shape: f32[4,3,128,128], index: 2, kind: input, shape index: {}]   ;;  %s4542_s0 = inlined_call_operand.vmem [shape: f32[16,128], index: 0, kind: input, shape index: {}]   ;;  %s4543_s3 = inlined_call_operand.vmem [shape: f32[4,8,128], index: 3, kind: input, shape index: {}]   ;;  %s4544_s1 = inlined_call_operand.vmem [shape: f32[16,16], index: 1, kind: input, shape index: {}]   ;;  %s4545_s4 = inlined_call_operand.vmem [shape: f32[2,128,128], index: 4, kind: input, shape index: {}]   ;;  %s4546_s5 = inlined_call_operand.vmem [shape: f32[4,128], index: 5, kind: input, shape index: {}]   ;;  %s4547_s6 = inlined_call_operand.vmem [shape: f32[16,128], index: 6, kind: output, shape index: {}]  }
   0x1   :  { %v47_v0 = vld [vmem:[%s4541_s2 + $0x78] sm:$0xff]  ;;  %v46_v1 = vld [vmem:[%s4541_s2 + $0x70] sm:$0xff]  ;;  %v45_v2 = vld [vmem:[%s4541_s2 + $0x68] sm:$0xff]  ;;  %3406 = vset.pattern.permute.xlu0 %v3480_v18  ;;  %v3481_v58 = vmov 65  }
   0x2   :  { %2884 = vmatprep.subr.mxu0 %v47_v0  ;;  %v44_v3 = vld [vmem:[%s4541_s2 + $0x60] sm:$0xff]  ;;  %v43_v5 = vld [vmem:[%s4541_s2 + $0x58] sm:$0xff]  ;;  %v42_v6 = vld [vmem:[%s4541_s2 + $0x50] sm:$0xff]  ;;  %v3574_v20 = vshrl.u32 %v27_v19, 7  ;;  %v3595_v48 = vand.u32 127, %v27_v19  ;;  %3407 = vset.pattern.permute.xlu1 %v3481_v58 }
   0x3   :  { %2885 = vmatpush3.msra.mxu0 %v47_v0  ;;  %v23_v4 = vld [vmem:[%s4542_s0] sm:$0xff]  ;;  %v41_v7 = vld [vmem:[%s4541_s2 + $0x48] sm:$0xff]  ;;  %v39_v9 = vld [vmem:[%s4541_s2 + $0x38] sm:$0xff] }
   0x4   :  { %2886 = vmatprep.subr.mxu0 %v46_v1  ;;  %2916 = vmatprep.mubr.f32.mxu0 %v23_v4  ;;  %v40_v8 = vld [vmem:[%s4541_s2 + $0x40] sm:$0xff]  ;;  %v38_v10 = vld [vmem:[%s4541_s2 + $0x30] sm:$0xff]  ;;  %v37_v11 = vld [vmem:[%s4541_s2 + $0x28] sm:$0xff]  ;;  %v3577_v21 = vsub.s32 0, %v3574_v20  ;;  %vm191_vm4 = vcmp.eq.s32.totalorder %v3595_v48, 65  ;;  %vm190_vm5 = vcmp.eq.s32.totalorder %v3595_v48, 64 }
   0x5   :  { %2887 = vmatpush3.msra.mxu0 %v46_v1  ;;  %v36_v12 = vld [vmem:[%s4541_s2 + $0x20] sm:$0xff]  ;;  %v35_v13 = vld [vmem:[%s4541_s2 + $0x18] sm:$0xff]  ;;  %v34_v14 = vld [vmem:[%s4541_s2 + $0x10] sm:$0xff]  ;;  %v3617_v1 = vsub.s32 1, %v3574_v20 }
   0x6   :  { %2888 = vmatprep.subr.mxu0 %v45_v2  ;;  %v33_v15 = vld [vmem:[%s4541_s2 + $0x8] sm:$0xff]  ;;  %v32_v16 = vld [vmem:[%s4541_s2] sm:$0xff]  ;;  %v2419_v19 = vld [vmem:[%s4541_s2 + $0xd0] sm:$0xff] }
   0x7   :  { %2889 = vmatpush3.msra.mxu0 %v45_v2  ;;  %v24_v17 = vld [vmem:[%s4542_s0 + $0x8] sm:$0xff]  ;;  %v3582_v22 = vld [vmem:[%s4543_s3] sm:$0xff]  ;;  %v2575_v48 = vld [vmem:[%s4541_s2 + $0x570] sm:$0xff] }
   0x8   :  { %2890 = vmatprep.subr.mxu0 %v44_v3  ;;  %v86_v23 = vrot.slane %v3582_v22, %v3577_v21  ;;  %v3591_v46 = vld [vmem:[%s4544_s1] sm:$0xff]  ;;  %v3610_v57 = vld [vmem:[%s4544_s1 + $0x8] sm:$0xff]  ;;  %v317_v2 = vrot.slane %v3582_v22, %v3617_v1 }
   0x9   :  { %2891 = vmatpush3.msra.mxu0 %v44_v3  ;;  %2923 = vmatprep.mubr.msk.f32.mxu1 %vm212_vm3, %v3591_v46 }
   0xa   :  { %2892 = vmatprep.subr.mxu0 %v43_v5 }
   0xb   :  { %2893 = vmatpush3.msra.mxu0 %v43_v5 }
   0xc   :  { %2894 = vmatprep.subr.mxu0 %v42_v6 }
   0xd   :  { %2895 = vmatpush3.msra.mxu0 %v42_v6 }
   0xe   :  { %2896 = vmatprep.subr.mxu0 %v41_v7 }
   0xf   :  { %2897 = vmatpush3.msra.mxu0 %v41_v7 }
  0x10   :  { %2898 = vmatprep.subr.mxu0 %v40_v8 }
  0x11   :  { %2899 = vmatpush3.msra.mxu0 %v40_v8 }
  0x12   :  { %2900 = vmatprep.subr.mxu0 %v39_v9 }
  0x13   :  { %2901 = vmatpush3.msra.mxu0 %v39_v9 }
  0x14   :  { %2902 = vmatprep.subr.mxu0 %v38_v10 }
  0x15   :  { %2903 = vmatpush3.msra.mxu0 %v38_v10 }
  0x16   :  { %2904 = vmatprep.subr.mxu0 %v37_v11 }
  0x17   :  { %2905 = vmatpush3.msra.mxu0 %v37_v11 }
  0x18   :  { %2906 = vmatprep.subr.mxu0 %v36_v12 }
  0x19   :  { %2907 = vmatpush3.msra.mxu0 %v36_v12 }
  0x1a   :  { %2908 = vmatprep.subr.mxu0 %v35_v13 }
  0x1b   :  { %2909 = vmatpush3.msra.mxu0 %v35_v13  ;;  %v2424_v13 = vld [vmem:[%s4541_s2 + $0xf8] sm:$0xff] }
  0x1c   :  { %2910 = vmatprep.subr.mxu0 %v34_v14 }
  0x1d   :  { %2911 = vmatpush3.msra.mxu0 %v34_v14  ;;  %v2423_v14 = vld [vmem:[%s4541_s2 + $0xf0] sm:$0xff] }
  0x1e   :  { %2912 = vmatprep.subr.mxu0 %v33_v15 }
  0x1f   :  { %2913 = vmatpush3.msra.mxu0 %v33_v15  ;;  %v2422_v15 = vld [vmem:[%s4541_s2 + $0xe8] sm:$0xff] }
  0x20   :  { %2914 = vmatprep.subr.mxu0 %v32_v16 }
  0x21   :  { %2915 = vmatpush3.msra.mxu0 %v32_v16  ;;  %v2421_v16 = vld [vmem:[%s4541_s2 + $0xe0] sm:$0xff] }
  0x22   :  { %2917 = vmatmul.mubr.f32.vlgmr.msra.gmra.mxu0 %v24_v17  ;;  %v2420_v17 = vld [vmem:[%s4541_s2 + $0xd8] sm:$0xff] }
  0xe2   :  { %v2918_v24 = vpop.f32.mrf.mxu0 }
  0xe3   :  { %v159_v25 = vadd.f32 %v2918_v24, %v86_v23  ;;  %v2417_v24 = vld [vmem:[%s4541_s2 + $0xc0] sm:$0xff] }
  0xe4   :  { %v153_v26 = vpop.f32.mrf.mxu0 }
  0xe5   :  { %vm163_vm0 = vcmp.ge.f32.partialorder %v159_v25, 0.0  ;;  %v165_v27 = vmul.f32 0.2, %v159_v25  ;;  %v154_v28 = vadd.f32 %v153_v26, %v86_v23  ;;  %v195_v49 = vsel %vm191_vm4, 1.0, %v159_v25  ;;  %v2418_v23 = vld [vmem:[%s4541_s2 + $0xc8] sm:$0xff]  ;;  %v2415_v26 = vld [vmem:[%s4541_s2 + $0xb0] sm:$0xff] }
  0xe6   :  { %v199_v50 = vsel %vm190_vm5, 0.0, %v195_v49 }
  0xe7   :  { %v167_v29 = vsel %vm163_vm0, %v159_v25, %v165_v27  ;;  %vm162_vm2 = vcmp.ge.f32.partialorder %v154_v28, 0.0  ;;  %v164_v30 = vmul.f32 0.2, %v154_v28  ;;  %v194_v53 = vsel %vm191_vm4, 1.0, %v154_v28  ;;  %v2416_v25 = vld [vmem:[%s4541_s2 + $0xb8] sm:$0xff]  ;;  %v2414_v27 = vld [vmem:[%s4541_s2 + $0xa8] sm:$0xff] }
  0xe8   :  { %v174_v32 = vsel %vm172_vm1, %v167_v29, -inf  ;;  %v198_v54 = vsel %vm190_vm5, 0.0, %v194_v53 }
  0xe9   :  { %v166_v31 = vsel %vm162_vm2, %v154_v28, %v164_v30  ;;  %v2413_v28 = vld [vmem:[%s4541_s2 + $0xa0] sm:$0xff]  ;;  %v2411_v30 = vld [vmem:[%s4541_s2 + $0x90] sm:$0xff] }
  0xea   :  { %v173_v33 = vsel %vm172_vm1, %v166_v31, -inf }
  0xeb   :  { %v175_v34 = vmax.f32 %v173_v33, %v174_v32  ;;  %v2409_v32 = vld [vmem:[%s4541_s2 + $0x80] sm:$0xff]  ;;  %v2440_v33 = vld [vmem:[%s4541_s2 + $0x178] sm:$0xff] }
  0xec   :  { %2961 = vmatprep.subr.mxu0 %v2440_v33 }
  0xed   :  { %v176_v35 = vrot.slane %v175_v34, 4  ;;  %2962 = vmatpush3.msra.mxu0 %v2440_v33 }
  0xef   :  { %v177_v36 = vmax.f32 %v175_v34, %v176_v35  ;;  %v2439_v34 = vld [vmem:[%s4541_s2 + $0x170] sm:$0xff]  ;;  %v2438_v35 = vld [vmem:[%s4541_s2 + $0x168] sm:$0xff] }
  0xf0   :  { %2963 = vmatprep.subr.mxu0 %v2439_v34 }
  0xf1   :  { %v178_v37 = vrot.slane %v177_v36, 2  ;;  %2964 = vmatpush3.msra.mxu0 %v2439_v34 }
  0xf2   :  { %2965 = vmatprep.subr.mxu0 %v2438_v35 }
  0xf3   :  { %v179_v38 = vmax.f32 %v177_v36, %v178_v37  ;;  %v2437_v36 = vld [vmem:[%s4541_s2 + $0x160] sm:$0xff]  ;;  %2966 = vmatpush3.msra.mxu0 %v2438_v35  ;;  %v2436_v37 = vld [vmem:[%s4541_s2 + $0x158] sm:$0xff] }
  0xf4   :  { %2967 = vmatprep.subr.mxu0 %v2437_v36 }
  0xf5   :  { %v180_v39 = vrot.slane %v179_v38, 1  ;;  %2968 = vmatpush3.msra.mxu0 %v2437_v36 }
  0xf6   :  { %2969 = vmatprep.subr.mxu0 %v2436_v37 }
  0xf7   :  { %v181_v40 = vmax.f32 %v179_v38, %v180_v39  ;;  %v2435_v38 = vld [vmem:[%s4541_s2 + $0x150] sm:$0xff]  ;;  %2970 = vmatpush3.msra.mxu0 %v2436_v37  ;;  %v2434_v39 = vld [vmem:[%s4541_s2 + $0x148] sm:$0xff] }
  0xf8   :  { %2971 = vmatprep.subr.mxu0 %v2435_v38 }
  0xf9   :  { %v183_v41 = vsub.f32 %v167_v29, %v181_v40  ;;  %v182_v42 = vsub.f32 %v166_v31, %v181_v40  ;;  %v2412_v29 = vld [vmem:[%s4541_s2 + $0x98] sm:$0xff]  ;;  %v2410_v31 = vld [vmem:[%s4541_s2 + $0x88] sm:$0xff]  ;;  %2972 = vmatpush3.msra.mxu0 %v2435_v38  ;;  %v2433_v40 = vld [vmem:[%s4541_s2 + $0x140] sm:$0xff] }
  0xfa   :  { %2973 = vmatprep.subr.mxu0 %v2434_v39 }
  0xfb   :  { %v186_v43 = vmul.f32 1.442695, %v183_v41  ;;  %v184_v44 = vmul.f32 1.442695, %v182_v42  ;;  %2974 = vmatpush3.msra.mxu0 %v2434_v39  ;;  %v2432_v41 = vld [vmem:[%s4541_s2 + $0x138] sm:$0xff]  ;;  %v2431_v42 = vld [vmem:[%s4541_s2 + $0x130] sm:$0xff] }
  0xfc   :  { %2975 = vmatprep.subr.mxu0 %v2433_v40 }
  0xfd   :  { %3415 = vpow2.f32 %v186_v43  ;;  %2976 = vmatpush3.msra.mxu0 %v2433_v40  ;;  %v2430_v43 = vld [vmem:[%s4541_s2 + $0x128] sm:$0xff] }
  0xfe   :  { %3417 = vpow2.f32 %v184_v44  ;;  %2977 = vmatprep.subr.mxu0 %v2432_v41  ;;  %v2429_v44 = vld [vmem:[%s4541_s2 + $0x120] sm:$0xff] }
  0xff   :  { %2978 = vmatpush3.msra.mxu0 %v2432_v41 }
 0x100   :  { %2979 = vmatprep.subr.mxu0 %v2431_v42 }
 0x101   :  { %2980 = vmatpush3.msra.mxu0 %v2431_v42 }
 0x102   :  { %2981 = vmatprep.subr.mxu0 %v2430_v43 }
 0x103   :  { %2982 = vmatpush3.msra.mxu0 %v2430_v43 }
 0x104   :  { %2983 = vmatprep.subr.mxu0 %v2429_v44 }
 0x105   :  { %2984 = vmatpush3.msra.mxu0 %v2429_v44  ;;  %v2458_v44 = vld [vmem:[%s4541_s2 + $0x1f8] sm:$0xff] }
 0x10a   :  { %v3416_v45 = vpop.eup %3415 }
 0x10b   :  { %207 = vperm.xlu0 %3406, %v3416_v45   ;;  %v3418_v47 = vpop.eup %3417 }
 0x10f   :  { %202 = vperm.xlu0 %3406, %v3418_v47  }
 0x186   :  { %v208_v51 = vpop.permute.xlu0 %207 }
 0x187   :  { %v211_v52 = vmul.f32 %v208_v51, %v199_v50 }
 0x189   :  { %2919 = vmatprep.subr.mxu1 %v211_v52 }
 0x18a   :  { %2920 = vmatpush3.msra.mxu1 %v211_v52  ;;  %v203_v55 = vpop.permute.xlu0 %202 }
 0x18b   :  { %v210_v56 = vmul.f32 %v203_v55, %v198_v54 }
 0x18d   :  { %2921 = vmatprep.subr.mxu1 %v210_v56 }
 0x18e   :  { %2922 = vmatpush3.msra.mxu1 %v210_v56 }
 0x18f   :  { %2924 = vmatmul.mubr.msk.f32.vlgmr.msra.gmra.mxu1 %vm212_vm3, %v3610_v57  ;;  %2926 = vmatprep.subr.mxu1 %v2424_v13 }
 0x190   :  { %2927 = vmatpush3.msra.mxu1 %v2424_v13 }
 0x191   :  { %2928 = vmatprep.subr.mxu1 %v2423_v14 }
 0x192   :  { %2929 = vmatpush3.msra.mxu1 %v2423_v14 }
 0x193   :  { %2930 = vmatprep.subr.mxu1 %v2422_v15 }
 0x194   :  { %2931 = vmatpush3.msra.mxu1 %v2422_v15 }
 0x195   :  { %2932 = vmatprep.subr.mxu1 %v2421_v16 }
 0x196   :  { %2933 = vmatpush3.msra.mxu1 %v2421_v16 }
 0x197   :  { %2934 = vmatprep.subr.mxu1 %v2420_v17 }
 0x198   :  { %2935 = vmatpush3.msra.mxu1 %v2420_v17 }
 0x199   :  { %2936 = vmatprep.subr.mxu1 %v2419_v19 }
 0x19a   :  { %2937 = vmatpush3.msra.mxu1 %v2419_v19  ;;  %v2427_v19 = vld [vmem:[%s4541_s2 + $0x110] sm:$0xff] }
 0x19b   :  { %2938 = vmatprep.subr.mxu1 %v2418_v23 }
 0x19c   :  { %2939 = vmatpush3.msra.mxu1 %v2418_v23  ;;  %v2425_v23 = vld [vmem:[%s4541_s2 + $0x100] sm:$0xff] }
 0x19d   :  { %2940 = vmatprep.subr.mxu1 %v2417_v24 }
 0x19e   :  { %2941 = vmatpush3.msra.mxu1 %v2417_v24  ;;  %v3744_v24 = vsub.s32 2, %v3574_v20 }
 0x19f   :  { %2942 = vmatprep.subr.mxu1 %v2416_v25 }
 0x1a0   :  { %2943 = vmatpush3.msra.mxu1 %v2416_v25  ;;  %v363_v25 = vrot.slane %v3582_v22, %v3744_v24 }
 0x1a1   :  { %2944 = vmatprep.subr.mxu1 %v2415_v26 }
 0x1a2   :  { %2945 = vmatpush3.msra.mxu1 %v2415_v26 }
 0x1a3   :  { %2946 = vmatprep.subr.mxu1 %v2414_v27 }
 0x1a4   :  { %2947 = vmatpush3.msra.mxu1 %v2414_v27 }
 0x1a5   :  { %2948 = vmatprep.subr.mxu1 %v2413_v28 }
 0x1a6   :  { %2949 = vmatpush3.msra.mxu1 %v2413_v28 }
 0x1a7   :  { %2950 = vmatprep.subr.mxu1 %v2412_v29 }
 0x1a8   :  { %2951 = vmatpush3.msra.mxu1 %v2412_v29 }
 0x1a9   :  { %2952 = vmatprep.subr.mxu1 %v2411_v30 }
 0x1aa   :  { %2953 = vmatpush3.msra.mxu1 %v2411_v30 }
 0x1ab   :  { %2954 = vmatprep.subr.mxu1 %v2410_v31 }
 0x1ac   :  { %2955 = vmatpush3.msra.mxu1 %v2410_v31 }
 0x1ad   :  { %2956 = vmatprep.subr.mxu1 %v2409_v32 }
 0x1ae   :  { %2957 = vmatpush3.msra.mxu1 %v2409_v32  ;;  %v3749_v32 = vsub.s32 3, %v3574_v20 }
 0x1af   :  { %2996 = vmatprep.subr.mxu1 %v2458_v44 }
 0x1b0   :  { %v444_v33 = vrot.slane %v3582_v22, %v3749_v32 }
 0x24f   :  { %v2925_v59 = vpop.f32.mrf.mxu1 }
 0x250   :  { %v295_v62 = vmax.f32 %v2925_v59, 1e-30 }
 0x251   :  { %v285_v60 = vpop.f32.mrf.mxu1 }
 0x252   :  { %v294_v61 = vmax.f32 %v285_v60, 1e-30 }
 0x254   :  { %3419 = vrcp.f32 %v294_v61 }
 0x255   :  { %3421 = vrcp.f32 %v295_v62 }
 0x261   :  { %v3420_v63 = vpop.eup %3419 }
 0x262   :  { %302 = vperm.xlu1 %3407, %v3420_v63   ;;  %v3422_v0 = vpop.eup %3421 }
 0x266   :  { %307 = vperm.xlu1 %3407, %v3422_v0  }
 0x26a   :  { %3408 = vset.pattern.permute.xlu1 %v3480_v18 }
 0x2dd   :  { %v303_v3 = vpop.permute.xlu1 %302 }
 0x2de   :  { %v310_v4 = vmul.f32 %v303_v3, %v285_v60  ;;  %v3723_v3 = vsub.s32 5, %v3574_v20 }
 0x2e0   :  { %v312_v5 = vsel %vm191_vm4, 0.0, %v310_v4 }
 0x2e1   :  { %v3623_v6 = vadd.f32 %v317_v2, %v312_v5  ;;  %v308_v7 = vpop.permute.xlu1 %307 }
 0x2e2   :  { %v311_v8 = vmul.f32 %v2925_v59, %v308_v7 }
 0x2e3   :  { %320 = vadd.xlane.f32.xlu0 %v3623_v6  ;;  %v326_v11 = vmul.f32 %v3623_v6, %v3623_v6 }
 0x2e4   :  { %v313_v9 = vsel %vm191_vm4, 0.0, %v311_v8 }
 0x2e5   :  { %v3628_v10 = vadd.f32 %v317_v2, %v313_v9  ;;  %v3720_v2 = vsub.s32 4, %v3574_v20  ;;  %v357_v9 = vrot.slane %v3582_v22, %v3723_v3 }
 0x2e7   :  { %328 = vadd.xlane.f32.xlu0 %v326_v11  ;;  %322 = vadd.xlane.f32.xlu1 %v3628_v10  ;;  %v327_v12 = vmul.f32 %v3628_v10, %v3628_v10  ;;  %v351_v5 = vrot.slane %v3582_v22, %v3720_v2 }
 0x2eb   :  { %330 = vadd.xlane.f32.xlu0 %v327_v12 }
 0x36c   :  { %v321_v45 = vpop.xlane.xlu0 %320 }
 0x36d   :  { %v324_v47 = vmul.f32 0.015625, %v321_v45  ;;  %v2457_v45 = vld [vmem:[%s4541_s2 + $0x1f0] sm:$0xff] }
 0x36f   :  { %v334_v51 = vmul.f32 %v324_v47, %v324_v47  ;;  %v340_v4 = vsub.f32 %v3623_v6, %v324_v47  ;;  %v2428_v6 = vld [vmem:[%s4541_s2 + $0x118] sm:$0xff]  ;;  %v2456_v47 = vld [vmem:[%s4541_s2 + $0x1e8] sm:$0xff] }
 0x370   :  { %v329_v49 = vpop.xlane.xlu0 %328  ;;  %v323_v50 = vpop.xlane.xlu1 %322  ;;  %2985 = vmatprep.subr.mxu0 %v2428_v6 }
 0x371   :  { %v332_v52 = vmul.f32 0.015625, %v329_v49  ;;  %v325_v53 = vmul.f32 0.015625, %v323_v50  ;;  %2986 = vmatpush3.msra.mxu0 %v2428_v6  ;;  %v2455_v49 = vld [vmem:[%s4541_s2 + $0x1e0] sm:$0xff]  ;;  %v2454_v50 = vld [vmem:[%s4541_s2 + $0x1d8] sm:$0xff] }
 0x372   :  { %2987 = vmatprep.subr.mxu0 %v2427_v19 }
 0x373   :  { %v336_v54 = vsub.f32 %v332_v52, %v334_v51  ;;  %v335_v59 = vmul.f32 %v325_v53, %v325_v53  ;;  %v341_v11 = vsub.f32 %v3628_v10, %v325_v53  ;;  %2988 = vmatpush3.msra.mxu0 %v2427_v19  ;;  %v2426_v10 = vld [vmem:[%s4541_s2 + $0x108] sm:$0xff]  ;;  %v2453_v51 = vld [vmem:[%s4541_s2 + $0x1d0] sm:$0xff]  ;;  %v2451_v53 = vld [vmem:[%s4541_s2 + $0x1c0] sm:$0xff] }
 0x374   :  { %v331_v55 = vpop.xlane.xlu0 %330  ;;  %2989 = vmatprep.subr.mxu0 %v2426_v10  ;;  %v2452_v52 = vld [vmem:[%s4541_s2 + $0x1c8] sm:$0xff] }
 0x375   :  { %v338_v56 = vmax.f32 %v336_v54, 0.0  ;;  %v333_v60 = vmul.f32 0.015625, %v331_v55  ;;  %2990 = vmatpush3.msra.mxu0 %v2426_v10  ;;  %v2450_v54 = vld [vmem:[%s4541_s2 + $0x1b8] sm:$0xff]  ;;  %v2449_v55 = vld [vmem:[%s4541_s2 + $0x1b0] sm:$0xff] }
 0x376   :  { %2991 = vmatprep.subr.mxu0 %v2425_v23 }
 0x377   :  { %v342_v61 = vadd.f32 1e-05, %v338_v56  ;;  %v337_v62 = vsub.f32 %v333_v60, %v335_v59  ;;  %2992 = vmatpush3.msra.mxu0 %v2425_v23  ;;  %v2448_v56 = vld [vmem:[%s4541_s2 + $0x1a8] sm:$0xff]  ;;  %v2447_v59 = vld [vmem:[%s4541_s2 + $0x1a0] sm:$0xff]  ;;  %v2446_v60 = vld [vmem:[%s4541_s2 + $0x198] sm:$0xff] }
 0x379   :  { %3423 = vrsqrt.f32 %v342_v61  ;;  %v339_v63 = vmax.f32 %v337_v62, 0.0  ;;  %v2445_v61 = vld [vmem:[%s4541_s2 + $0x190] sm:$0xff]  ;;  %v2444_v62 = vld [vmem:[%s4541_s2 + $0x188] sm:$0xff] }
 0x37b   :  { %v343_v0 = vadd.f32 1e-05, %v339_v63  ;;  %v2443_v63 = vld [vmem:[%s4541_s2 + $0x180] sm:$0xff] }
 0x37d   :  { %3425 = vrsqrt.f32 %v343_v0  ;;  %v3482_v0 = vmov 0.0  }
 0x386   :  { %v3424_v7 = vpop.eup %3423 }
 0x387   :  { %v346_v8 = vmul.f32 %v3424_v7, %v340_v4 }
 0x389   :  { %v352_v12 = vmul.f32 %v351_v5, %v346_v8 }
 0x38a   :  { %v3426_v13 = vpop.eup %3425 }
 0x38b   :  { %v358_v14 = vadd.f32 %v357_v9, %v352_v12  ;;  %v347_v15 = vmul.f32 %v3426_v13, %v341_v11 }
 0x38d   :  { %2958 = vmatprep.mubr.f32.mxu1 %v358_v14  ;;  %v353_v16 = vmul.f32 %v351_v5, %v347_v15 }
 0x38f   :  { %v359_v17 = vadd.f32 %v357_v9, %v353_v16 }
 0x391   :  { %2959 = vmatmul.mubr.f32.vlgmr.msra.gmra.mxu1 %v359_v17 }
 0x392   :  { %2997 = vmatpush3.msra.mxu1 %v2458_v44 }
 0x393   :  { %2998 = vmatprep.subr.mxu1 %v2457_v45 }
 0x394   :  { %2999 = vmatpush3.msra.mxu1 %v2457_v45 }
 0x395   :  { %3000 = vmatprep.subr.mxu1 %v2456_v47 }
 0x396   :  { %3001 = vmatpush3.msra.mxu1 %v2456_v47 }
 0x397   :  { %3002 = vmatprep.subr.mxu1 %v2455_v49 }
 0x398   :  { %3003 = vmatpush3.msra.mxu1 %v2455_v49 }
 0x399   :  { %3004 = vmatprep.subr.mxu1 %v2454_v50 }
 0x39a   :  { %3005 = vmatpush3.msra.mxu1 %v2454_v50 }
 0x39b   :  { %3006 = vmatprep.subr.mxu1 %v2453_v51 }
 0x39c   :  { %3007 = vmatpush3.msra.mxu1 %v2453_v51 }
 0x39d   :  { %3008 = vmatprep.subr.mxu1 %v2452_v52 }
 0x39e   :  { %3009 = vmatpush3.msra.mxu1 %v2452_v52  ;;  %v3483_v52 = vmov -inf  }
 0x39f   :  { %3010 = vmatprep.subr.mxu1 %v2451_v53 }
 0x3a0   :  { %3011 = vmatpush3.msra.mxu1 %v2451_v53  ;;  %v3838_v53 = vsel %vm172_vm1, -1e+30, %v3483_v52  ;;  %v2461_v52 = vld [vmem:[%s4541_s2 + $0x210] sm:$0xff] }
 0x3a1   :  { %3012 = vmatprep.subr.mxu1 %v2450_v54 }
 0x3a2   :  { %3013 = vmatpush3.msra.mxu1 %v2450_v54 }
 0x3a3   :  { %3014 = vmatprep.subr.mxu1 %v2449_v55 }
 0x3a4   :  { %3015 = vmatpush3.msra.mxu1 %v2449_v55 }
 0x3a5   :  { %3016 = vmatprep.subr.mxu1 %v2448_v56 }
 0x3a6   :  { %3017 = vmatpush3.msra.mxu1 %v2448_v56 }
 0x3a7   :  { %3018 = vmatprep.subr.mxu1 %v2447_v59 }
 0x3a8   :  { %3019 = vmatpush3.msra.mxu1 %v2447_v59 }
 0x3a9   :  { %3020 = vmatprep.subr.mxu1 %v2446_v60 }
 0x3aa   :  { %3021 = vmatpush3.msra.mxu1 %v2446_v60 }
 0x3ab   :  { %3022 = vmatprep.subr.mxu1 %v2445_v61 }
 0x3ac   :  { %3023 = vmatpush3.msra.mxu1 %v2445_v61 }
 0x3ad   :  { %3024 = vmatprep.subr.mxu1 %v2444_v62 }
 0x3ae   :  { %3025 = vmatpush3.msra.mxu1 %v2444_v62 }
 0x3af   :  { %3026 = vmatprep.subr.mxu1 %v2443_v63 }
 0x3b0   :  { %3027 = vmatpush3.msra.mxu1 %v2443_v63 }
 0x451   :  { %v2960_v26 = vpop.f32.mrf.mxu1 }
 0x452   :  { %v436_v27 = vadd.f32 %v2960_v26, %v363_v25 }
 0x453   :  { %v430_v28 = vpop.f32.mrf.mxu1 }
 0x454   :  { %v431_v29 = vadd.f32 %v430_v28, %v363_v25  ;;  %v440_v31 = vmax.f32 %v436_v27, 0.0  ;;  %v3818_v25 = vsub.s32 7, %v3574_v20 }
 0x456   :  { %v439_v30 = vmax.f32 %v431_v29, 0.0 }
 0x458   :  { %2993 = vmatprep.mubr.f32.mxu0 %v439_v30 }
 0x459   :  { %2994 = vmatmul.mubr.f32.vlgmr.msra.gmra.mxu0 %v440_v31 }
 0x519   :  { %v2995_v34 = vpop.f32.mrf.mxu0 }
 0x51a   :  { %v517_v35 = vadd.f32 %v2995_v34, %v444_v33 }
 0x51b   :  { %v511_v36 = vpop.f32.mrf.mxu0 }
 0x51c   :  { %v521_v37 = vmax.f32 %v517_v35, 0.0  ;;  %v512_v38 = vadd.f32 %v511_v36, %v444_v33  ;;  %v561_v33 = vrot.slane %v3582_v22, %v3818_v25 }
 0x51e   :  { %v3753_v39 = vadd.f32 %v521_v37, %v359_v17  ;;  %v520_v40 = vmax.f32 %v512_v38, 0.0 }
 0x520   :  { %v3755_v41 = vadd.f32 %v520_v40, %v358_v14  ;;  %526 = vadd.xlane.f32.xlu0 %v3753_v39  ;;  %v531_v42 = vmul.f32 %v3753_v39, %v3753_v39 }
 0x522   :  { %524 = vadd.xlane.f32.xlu1 %v3755_v41  ;;  %v530_v43 = vmul.f32 %v3755_v41, %v3755_v41 }
 0x524   :  { %534 = vadd.xlane.f32.xlu0 %v531_v42 }
 0x526   :  { %532 = vadd.xlane.f32.xlu1 %v530_v43 }
 0x537   :  { %736 = vperm.xlu1 %3408, %v3482_v0  }
 0x560   :  { %741 = vxpose.xlu1.b32.start [1/2] (short) (narrow) %v3591_v46, 16 }
 0x564   :  { %742 = vxpose.xlu1.b32.end [2/2] (short) (narrow) %v3610_v57, 16  ;;  %v3815_v57 = vsub.s32 6, %v3574_v20 }
 0x566   :  { %v555_v27 = vrot.slane %v3582_v22, %v3815_v57 }
 0x5a9   :  { %v527_v4 = vpop.xlane.xlu0 %526 }
 0x5aa   :  { %v529_v5 = vmul.f32 0.015625, %v527_v4 }
 0x5ab   :  { %v525_v7 = vpop.xlane.xlu1 %524 }
 0x5ac   :  { %v528_v8 = vmul.f32 0.015625, %v525_v7  ;;  %v539_v11 = vmul.f32 %v529_v5, %v529_v5  ;;  %v545_v26 = vsub.f32 %v3753_v39, %v529_v5  ;;  %v3829_v39 = vld [vmem:[%s4543_s3 + $0x8] sm:$0xff] }
 0x5ad   :  { %v535_v9 = vpop.xlane.xlu0 %534 }
 0x5ae   :  { %v537_v12 = vmul.f32 0.015625, %v535_v9  ;;  %v538_v14 = vmul.f32 %v528_v8, %v528_v8  ;;  %v544_v29 = vsub.f32 %v3755_v41, %v528_v8  ;;  %v622_v41 = vrot.slane %v3829_v39, %v3577_v21 }
 0x5af   :  { %v533_v13 = vpop.xlane.xlu1 %532 }
 0x5b0   :  { %v541_v15 = vsub.f32 %v537_v12, %v539_v11  ;;  %v536_v16 = vmul.f32 0.015625, %v533_v13 }
 0x5b2   :  { %v543_v17 = vmax.f32 %v541_v15, 0.0  ;;  %v540_v6 = vsub.f32 %v536_v16, %v538_v14 }
 0x5b3   :  { %v737_v44 = vpop.permute.xlu1 %736 }
 0x5b4   :  { %v547_v19 = vadd.f32 1e-05, %v543_v17  ;;  %v542_v10 = vmax.f32 %v540_v6, 0.0 }
 0x5b6   :  { %3427 = vrsqrt.f32 %v547_v19  ;;  %v546_v23 = vadd.f32 1e-05, %v542_v10 }
 0x5b8   :  { %3429 = vrsqrt.f32 %v546_v23 }
 0x5c3   :  { %v3428_v28 = vpop.eup %3427 }
 0x5c4   :  { %v551_v30 = vmul.f32 %v3428_v28, %v545_v26  ;;  %v877_v26 = vrot.slane %v3829_v39, %v3617_v1 }
 0x5c5   :  { %v3430_v31 = vpop.eup %3429 }
 0x5c6   :  { %v550_v34 = vmul.f32 %v3430_v31, %v544_v29  ;;  %v557_v35 = vmul.f32 %v555_v27, %v551_v30 }
 0x5c8   :  { %v556_v36 = vmul.f32 %v555_v27, %v550_v34  ;;  %v563_v37 = vadd.f32 %v561_v33, %v557_v35 }
 0x5ca   :  { %v562_v38 = vadd.f32 %v561_v33, %v556_v36  ;;  %v565_v40 = vmax.f32 %v563_v37, 0.0 }
 0x5cc   :  { %v564_v20 = vmax.f32 %v562_v38, 0.0  ;;  %v2474_v38 = vld [vmem:[%s4541_s2 + $0x278] sm:$0xff] }
 0x5ce   :  { %3028 = vmatprep.mubr.f32.mxu1 %v564_v20  ;;  %v2473_v20 = vld [vmem:[%s4541_s2 + $0x270] sm:$0xff] }
 0x5cf   :  { %3029 = vmatmul.mubr.f32.vlgmr.msra.gmra.mxu1 %v565_v40  ;;  %v2472_v40 = vld [vmem:[%s4541_s2 + $0x268] sm:$0xff] }
 0x5dc   :  { %v3842_v8 = vpop.trf.xlu1 }
 0x5dd   :  { %3035 = vmatprep.mubr.msk.f32.mxu0 %vm212_vm3, %v3842_v8 }
 0x5e0   :  { %v3851_v15 = vpop.trf.xlu1 }
 0x68f   :  { %v3030_v42 = vpop.f32.mrf.mxu1 }
 0x690   :  { %v695_v43 = vadd.f32 %v3030_v42, %v622_v41  ;;  %v2470_v42 = vld [vmem:[%s4541_s2 + $0x258] sm:$0xff] }
 0x691   :  { %v689_v22 = vpop.f32.mrf.mxu1 }
 0x692   :  { %v690_v45 = vadd.f32 %v689_v22, %v622_v41  ;;  %v726_v47 = vsel %vm191_vm4, 1.0, %v695_v43  ;;  %v2471_v41 = vld [vmem:[%s4541_s2 + $0x260] sm:$0xff]  ;;  %v2469_v43 = vld [vmem:[%s4541_s2 + $0x250] sm:$0xff]  ;;  %v2468_v22 = vld [vmem:[%s4541_s2 + $0x248] sm:$0xff] }
 0x693   :  { %v728_v49 = vsel %vm190_vm5, 0.0, %v726_v47  ;;  %v2465_v47 = vld [vmem:[%s4541_s2 + $0x230] sm:$0xff] }
 0x694   :  { %vm698_vm6 = vcmp.ge.f32.partialorder %v690_v45, 0.0  ;;  %v700_v50 = vmul.f32 0.2, %v690_v45  ;;  %v740_v51 = vmul.f32 %v737_v44, %v728_v49  ;;  %v725_v11 = vsel %vm191_vm4, 1.0, %v690_v45  ;;  %v2467_v44 = vld [vmem:[%s4541_s2 + $0x240] sm:$0xff]  ;;  %v2464_v49 = vld [vmem:[%s4541_s2 + $0x228] sm:$0xff] }
 0x695   :  { %v727_v12 = vsel %vm190_vm5, 0.0, %v725_v11  ;;  %v2480_v11 = vld [vmem:[%s4541_s2 + $0x2a8] sm:$0xff] }
 0x696   :  { %v702_v54 = vsel %vm698_vm6, %v690_v45, %v700_v50  ;;  %3031 = vmatprep.subr.mxu0 %v740_v51  ;;  %v2466_v45 = vld [vmem:[%s4541_s2 + $0x238] sm:$0xff]  ;;  %v2463_v50 = vld [vmem:[%s4541_s2 + $0x220] sm:$0xff] }
 0x697   :  { %v708_v55 = vsel %vm172_vm1, %v702_v54, -inf  ;;  %3032 = vmatpush3.msra.mxu0 %v740_v51  ;;  %v2462_v51 = vld [vmem:[%s4541_s2 + $0x218] sm:$0xff] }
 0x698   :  { %v710_v56 = vmax.f32 %v708_v55, %v3838_v53  ;;  %v2459_v55 = vld [vmem:[%s4541_s2 + $0x200] sm:$0xff] }
 0x69a   :  { %v711_v59 = vrot.slane %v710_v56, 4 }
 0x69c   :  { %v712_v60 = vmax.f32 %v710_v56, %v711_v59  ;;  %v2490_v56 = vld [vmem:[%s4541_s2 + $0x2f8] sm:$0xff]  ;;  %v2489_v59 = vld [vmem:[%s4541_s2 + $0x2f0] sm:$0xff] }
 0x69d   :  { %3073 = vmatprep.subr.mxu1 %v2490_v56 }
 0x69e   :  { %v713_v61 = vrot.slane %v712_v60, 2  ;;  %3074 = vmatpush3.msra.mxu1 %v2490_v56 }
 0x69f   :  { %3075 = vmatprep.subr.mxu1 %v2489_v59 }
 0x6a0   :  { %v714_v62 = vmax.f32 %v712_v60, %v713_v61  ;;  %v2488_v60 = vld [vmem:[%s4541_s2 + $0x2e8] sm:$0xff]  ;;  %3076 = vmatpush3.msra.mxu1 %v2489_v59  ;;  %v2487_v61 = vld [vmem:[%s4541_s2 + $0x2e0] sm:$0xff] }
 0x6a1   :  { %3077 = vmatprep.subr.mxu1 %v2488_v60 }
 0x6a2   :  { %v715_v63 = vrot.slane %v714_v62, 1  ;;  %3078 = vmatpush3.msra.mxu1 %v2488_v60 }
 0x6a3   :  { %3079 = vmatprep.subr.mxu1 %v2487_v61 }
 0x6a4   :  { %v716_v4 = vmax.f32 %v714_v62, %v715_v63  ;;  %v2486_v62 = vld [vmem:[%s4541_s2 + $0x2d8] sm:$0xff]  ;;  %3080 = vmatpush3.msra.mxu1 %v2487_v61  ;;  %v2485_v63 = vld [vmem:[%s4541_s2 + $0x2d0] sm:$0xff] }
 0x6a5   :  { %3081 = vmatprep.subr.mxu1 %v2486_v62 }
 0x6a6   :  { %v717_v5 = vsub.f32 %v702_v54, %v716_v4  ;;  %v2460_v54 = vld [vmem:[%s4541_s2 + $0x208] sm:$0xff]  ;;  %3082 = vmatpush3.msra.mxu1 %v2486_v62  ;;  %v1004_v62 = vrot.slane %v3829_v39, %v3749_v32 }
 0x6a7   :  { %v2484_v4 = vld [vmem:[%s4541_s2 + $0x2c8] sm:$0xff]  ;;  %3083 = vmatprep.subr.mxu1 %v2485_v63 }
 0x6a8   :  { %v719_v7 = vmul.f32 1.442695, %v717_v5  ;;  %3084 = vmatpush3.msra.mxu1 %v2485_v63  ;;  %v2483_v5 = vld [vmem:[%s4541_s2 + $0x2c0] sm:$0xff] }
 0x6a9   :  { %3085 = vmatprep.subr.mxu1 %v2484_v4 }
 0x6aa   :  { %3431 = vpow2.f32 %v719_v7  ;;  %3086 = vmatpush3.msra.mxu1 %v2484_v4  ;;  %v2482_v7 = vld [vmem:[%s4541_s2 + $0x2b8] sm:$0xff] }
 0x6ab   :  { %3087 = vmatprep.subr.mxu1 %v2483_v5 }
 0x6ac   :  { %3088 = vmatpush3.msra.mxu1 %v2483_v5 }
 0x6ad   :  { %3089 = vmatprep.subr.mxu1 %v2482_v7 }
 0x6ae   :  { %3090 = vmatpush3.msra.mxu1 %v2482_v7 }
 0x6b7   :  { %v3432_v9 = vpop.eup %3431 }
 0x6b8   :  { %731 = vperm.xlu0 %3406, %v3432_v9   ;;  %v2481_v9 = vld [vmem:[%s4541_s2 + $0x2b0] sm:$0xff] }
 0x6b9   :  { %3091 = vmatprep.subr.mxu1 %v2481_v9 }
 0x6ba   :  { %3092 = vmatpush3.msra.mxu1 %v2481_v9 }
 0x6bb   :  { %3093 = vmatprep.subr.mxu1 %v2480_v11 }
 0x6bc   :  { %3409 = vset.pattern.permute.xlu0 %v3481_v58  ;;  %3094 = vmatpush3.msra.mxu1 %v2480_v11 }
 0x733   :  { %v732_v13 = vpop.permute.xlu0 %731 }
 0x734   :  { %v739_v14 = vmul.f32 %v732_v13, %v727_v12  ;;  %v2479_v12 = vld [vmem:[%s4541_s2 + $0x2a0] sm:$0xff] }
 0x735   :  { %3095 = vmatprep.subr.mxu1 %v2479_v12 }
 0x736   :  { %3033 = vmatprep.subr.mxu0 %v739_v14  ;;  %3096 = vmatpush3.msra.mxu1 %v2479_v12 }
 0x737   :  { %3034 = vmatpush3.msra.mxu0 %v739_v14 }
 0x738   :  { %3036 = vmatmul.mubr.msk.f32.vlgmr.msra.gmra.mxu0 %vm212_vm3, %v3851_v15  ;;  %3038 = vmatprep.subr.mxu0 %v2474_v38 }
 0x739   :  { %3039 = vmatpush3.msra.mxu0 %v2474_v38  ;;  %v911_v38 = vrot.slane %v3829_v39, %v3720_v2 }
 0x73a   :  { %3040 = vmatprep.subr.mxu0 %v2473_v20 }
 0x73b   :  { %3041 = vmatpush3.msra.mxu0 %v2473_v20 }
 0x73c   :  { %3042 = vmatprep.subr.mxu0 %v2472_v40 }
 0x73d   :  { %3043 = vmatpush3.msra.mxu0 %v2472_v40 }
 0x73e   :  { %3044 = vmatprep.subr.mxu0 %v2471_v41 }
 0x73f   :  { %3045 = vmatpush3.msra.mxu0 %v2471_v41  ;;  %v917_v41 = vrot.slane %v3829_v39, %v3723_v3 }
 0x740   :  { %3046 = vmatprep.subr.mxu0 %v2470_v42 }
 0x741   :  { %3047 = vmatpush3.msra.mxu0 %v2470_v42 }
 0x742   :  { %3048 = vmatprep.subr.mxu0 %v2469_v43 }
 0x743   :  { %3049 = vmatpush3.msra.mxu0 %v2469_v43 }
 0x744   :  { %3050 = vmatprep.subr.mxu0 %v2468_v22 }
 0x745   :  { %3051 = vmatpush3.msra.mxu0 %v2468_v22 }
 0x746   :  { %3052 = vmatprep.subr.mxu0 %v2467_v44 }
 0x747   :  { %3053 = vmatpush3.msra.mxu0 %v2467_v44 }
 0x748   :  { %3054 = vmatprep.subr.mxu0 %v2466_v45 }
 0x749   :  { %3055 = vmatpush3.msra.mxu0 %v2466_v45 }
 0x74a   :  { %3056 = vmatprep.subr.mxu0 %v2465_v47 }
 0x74b   :  { %3057 = vmatpush3.msra.mxu0 %v2465_v47 }
 0x74c   :  { %3058 = vmatprep.subr.mxu0 %v2464_v49 }
 0x74d   :  { %3059 = vmatpush3.msra.mxu0 %v2464_v49 }
 0x74e   :  { %3060 = vmatprep.subr.mxu0 %v2463_v50 }
 0x74f   :  { %3061 = vmatpush3.msra.mxu0 %v2463_v50  ;;  %v2477_v50 = vld [vmem:[%s4541_s2 + $0x290] sm:$0xff] }
 0x750   :  { %3062 = vmatprep.subr.mxu0 %v2462_v51 }
 0x751   :  { %3063 = vmatpush3.msra.mxu0 %v2462_v51  ;;  %v2475_v51 = vld [vmem:[%s4541_s2 + $0x280] sm:$0xff] }
 0x752   :  { %3064 = vmatprep.subr.mxu0 %v2461_v52 }
 0x753   :  { %3065 = vmatpush3.msra.mxu0 %v2461_v52  ;;  %v923_v52 = vrot.slane %v3829_v39, %v3744_v24 }
 0x754   :  { %3066 = vmatprep.subr.mxu0 %v2460_v54 }
 0x755   :  { %3067 = vmatpush3.msra.mxu0 %v2460_v54 }
 0x756   :  { %3068 = vmatprep.subr.mxu0 %v2459_v55 }
 0x757   :  { %3069 = vmatpush3.msra.mxu0 %v2459_v55 }
 0x7f8   :  { %v3037_v16 = vpop.f32.mrf.mxu0 }
 0x7f9   :  { %v855_v19 = vmax.f32 %v3037_v16, 1e-30 }
 0x7fa   :  { %v845_v17 = vpop.f32.mrf.mxu0 }
 0x7fb   :  { %v854_v6 = vmax.f32 %v845_v17, 1e-30 }
 0x7fd   :  { %3433 = vrcp.f32 %v854_v6 }
 0x7fe   :  { %3435 = vrcp.f32 %v855_v19 }
 0x80a   :  { %v3434_v10 = vpop.eup %3433 }
 0x80b   :  { %862 = vperm.xlu0 %3409, %v3434_v10   ;;  %v3436_v23 = vpop.eup %3435 }
 0x80f   :  { %867 = vperm.xlu0 %3409, %v3436_v23  }
 0x813   :  { %3410 = vset.pattern.permute.xlu0 %v3480_v18 }
 0x886   :  { %v863_v27 = vpop.permute.xlu0 %862 }
 0x887   :  { %v870_v28 = vmul.f32 %v863_v27, %v845_v17 }
 0x889   :  { %v872_v29 = vsel %vm191_vm4, 0.0, %v870_v28 }
 0x88a   :  { %v3860_v30 = vadd.f32 %v877_v26, %v872_v29  ;;  %v868_v31 = vpop.permute.xlu0 %867 }
 0x88b   :  { %v871_v33 = vmul.f32 %v3037_v16, %v868_v31 }
 0x88c   :  { %880 = vadd.xlane.f32.xlu0 %v3860_v30  ;;  %v886_v36 = vmul.f32 %v3860_v30, %v3860_v30 }
 0x88d   :  { %v873_v34 = vsel %vm191_vm4, 0.0, %v871_v33 }
 0x88e   :  { %v3865_v35 = vadd.f32 %v877_v26, %v873_v34 }
 0x890   :  { %888 = vadd.xlane.f32.xlu0 %v886_v36  ;;  %882 = vadd.xlane.f32.xlu1 %v3865_v35  ;;  %v887_v37 = vmul.f32 %v3865_v35, %v3865_v35 }
 0x894   :  { %890 = vadd.xlane.f32.xlu0 %v887_v37 }
 0x915   :  { %v881_v13 = vpop.xlane.xlu0 %880 }
 0x916   :  { %v884_v14 = vmul.f32 0.015625, %v881_v13 }
 0x918   :  { %v894_v6 = vmul.f32 %v884_v14, %v884_v14  ;;  %v900_v37 = vsub.f32 %v3860_v30, %v884_v14  ;;  %v2478_v30 = vld [vmem:[%s4541_s2 + $0x298] sm:$0xff] }
 0x919   :  { %v883_v16 = vpop.xlane.xlu1 %882  ;;  %v889_v17 = vpop.xlane.xlu0 %888  ;;  %3097 = vmatprep.subr.mxu1 %v2478_v30 }
 0x91a   :  { %v885_v19 = vmul.f32 0.015625, %v883_v16  ;;  %v892_v10 = vmul.f32 0.015625, %v889_v17  ;;  %3098 = vmatpush3.msra.mxu1 %v2478_v30  ;;  %v2509_v16 = vld [vmem:[%s4541_s2 + $0x378] sm:$0xff]  ;;  %v2508_v17 = vld [vmem:[%s4541_s2 + $0x370] sm:$0xff] }
 0x91b   :  { %3099 = vmatprep.subr.mxu1 %v2477_v50  ;;  %3108 = vmatprep.subr.mxu0 %v2509_v16 }
 0x91c   :  { %v896_v23 = vsub.f32 %v892_v10, %v894_v6  ;;  %v895_v27 = vmul.f32 %v885_v19, %v885_v19  ;;  %v901_v42 = vsub.f32 %v3865_v35, %v885_v19  ;;  %3100 = vmatpush3.msra.mxu1 %v2477_v50  ;;  %v2476_v35 = vld [vmem:[%s4541_s2 + $0x288] sm:$0xff]  ;;  %v2506_v19 = vld [vmem:[%s4541_s2 + $0x360] sm:$0xff]  ;;  %v2505_v10 = vld [vmem:[%s4541_s2 + $0x358] sm:$0xff] }
 0x91d   :  { %v891_v26 = vpop.xlane.xlu0 %890  ;;  %3101 = vmatprep.subr.mxu1 %v2476_v35  ;;  %v2507_v6 = vld [vmem:[%s4541_s2 + $0x368] sm:$0xff] }
 0x91e   :  { %v898_v28 = vmax.f32 %v896_v23, 0.0  ;;  %v893_v29 = vmul.f32 0.015625, %v891_v26  ;;  %3102 = vmatpush3.msra.mxu1 %v2476_v35  ;;  %v2504_v23 = vld [vmem:[%s4541_s2 + $0x350] sm:$0xff]  ;;  %v2503_v26 = vld [vmem:[%s4541_s2 + $0x348] sm:$0xff] }
 0x91f   :  { %3103 = vmatprep.subr.mxu1 %v2475_v51 }
 0x920   :  { %v902_v31 = vadd.f32 1e-05, %v898_v28  ;;  %v897_v33 = vsub.f32 %v893_v29, %v895_v27  ;;  %3104 = vmatpush3.msra.mxu1 %v2475_v51  ;;  %v2502_v27 = vld [vmem:[%s4541_s2 + $0x340] sm:$0xff]  ;;  %v2501_v28 = vld [vmem:[%s4541_s2 + $0x338] sm:$0xff]  ;;  %v2500_v29 = vld [vmem:[%s4541_s2 + $0x330] sm:$0xff] }
 0x922   :  { %3437 = vrsqrt.f32 %v902_v31  ;;  %v899_v34 = vmax.f32 %v897_v33, 0.0  ;;  %v2499_v31 = vld [vmem:[%s4541_s2 + $0x328] sm:$0xff]  ;;  %v2498_v33 = vld [vmem:[%s4541_s2 + $0x320] sm:$0xff] }
 0x924   :  { %v903_v36 = vadd.f32 1e-05, %v899_v34  ;;  %v2497_v34 = vld [vmem:[%s4541_s2 + $0x318] sm:$0xff] }
 0x926   :  { %3439 = vrsqrt.f32 %v903_v36  ;;  %v2496_v36 = vld [vmem:[%s4541_s2 + $0x310] sm:$0xff] }
 0x92f   :  { %v3438_v20 = vpop.eup %3437 }
 0x930   :  { %v906_v40 = vmul.f32 %v3438_v20, %v900_v37  ;;  %v2495_v37 = vld [vmem:[%s4541_s2 + $0x308] sm:$0xff] }
 0x932   :  { %v912_v43 = vmul.f32 %v911_v38, %v906_v40 }
 0x933   :  { %v3440_v22 = vpop.eup %3439 }
 0x934   :  { %v918_v44 = vadd.f32 %v917_v41, %v912_v43  ;;  %v907_v45 = vmul.f32 %v3440_v22, %v901_v42 }
 0x936   :  { %3070 = vmatprep.mubr.f32.mxu0 %v918_v44  ;;  %v913_v47 = vmul.f32 %v911_v38, %v907_v45  ;;  %v2494_v38 = vld [vmem:[%s4541_s2 + $0x300] sm:$0xff] }
 0x938   :  { %v919_v49 = vadd.f32 %v917_v41, %v913_v47 }
 0x93a   :  { %3071 = vmatmul.mubr.f32.vlgmr.msra.gmra.mxu0 %v919_v49 }
 0x93b   :  { %3109 = vmatpush3.msra.mxu0 %v2509_v16 }
 0x93c   :  { %3110 = vmatprep.subr.mxu0 %v2508_v17 }
 0x93d   :  { %3111 = vmatpush3.msra.mxu0 %v2508_v17 }
 0x93e   :  { %3112 = vmatprep.subr.mxu0 %v2507_v6 }
 0x93f   :  { %3113 = vmatpush3.msra.mxu0 %v2507_v6 }
 0x940   :  { %3114 = vmatprep.subr.mxu0 %v2506_v19 }
 0x941   :  { %3115 = vmatpush3.msra.mxu0 %v2506_v19 }
 0x942   :  { %3116 = vmatprep.subr.mxu0 %v2505_v10 }
 0x943   :  { %3117 = vmatpush3.msra.mxu0 %v2505_v10 }
 0x944   :  { %3118 = vmatprep.subr.mxu0 %v2504_v23 }
 0x945   :  { %3119 = vmatpush3.msra.mxu0 %v2504_v23 }
 0x946   :  { %3120 = vmatprep.subr.mxu0 %v2503_v26 }
 0x947   :  { %3121 = vmatpush3.msra.mxu0 %v2503_v26 }
 0x948   :  { %3122 = vmatprep.subr.mxu0 %v2502_v27 }
 0x949   :  { %3123 = vmatpush3.msra.mxu0 %v2502_v27 }
 0x94a   :  { %3124 = vmatprep.subr.mxu0 %v2501_v28 }
 0x94b   :  { %3125 = vmatpush3.msra.mxu0 %v2501_v28 }
 0x94c   :  { %3126 = vmatprep.subr.mxu0 %v2500_v29 }
 0x94d   :  { %3127 = vmatpush3.msra.mxu0 %v2500_v29 }
 0x94e   :  { %3128 = vmatprep.subr.mxu0 %v2499_v31 }
 0x94f   :  { %3129 = vmatpush3.msra.mxu0 %v2499_v31 }
 0x950   :  { %3130 = vmatprep.subr.mxu0 %v2498_v33 }
 0x951   :  { %3131 = vmatpush3.msra.mxu0 %v2498_v33 }
 0x952   :  { %3132 = vmatprep.subr.mxu0 %v2497_v34 }
 0x953   :  { %3133 = vmatpush3.msra.mxu0 %v2497_v34 }
 0x954   :  { %3134 = vmatprep.subr.mxu0 %v2496_v36 }
 0x955   :  { %3135 = vmatpush3.msra.mxu0 %v2496_v36 }
 0x956   :  { %3136 = vmatprep.subr.mxu0 %v2495_v37 }
 0x957   :  { %3137 = vmatpush3.msra.mxu0 %v2495_v37 }
 0x958   :  { %3138 = vmatprep.subr.mxu0 %v2494_v38 }
 0x959   :  { %3139 = vmatpush3.msra.mxu0 %v2494_v38 }
 0x9fa   :  { %v3072_v54 = vpop.f32.mrf.mxu0 }
 0x9fb   :  { %v996_v55 = vadd.f32 %v3072_v54, %v923_v52 }
 0x9fc   :  { %v990_v56 = vpop.f32.mrf.mxu0 }
 0x9fd   :  { %v991_v59 = vadd.f32 %v990_v56, %v923_v52  ;;  %v1000_v61 = vmax.f32 %v996_v55, 0.0  ;;  %v1115_v56 = vrot.slane %v3829_v39, %v3815_v57 }
 0x9ff   :  { %v999_v60 = vmax.f32 %v991_v59, 0.0 }
 0xa01   :  { %3105 = vmatprep.mubr.f32.mxu1 %v999_v60 }
 0xa02   :  { %3106 = vmatmul.mubr.f32.vlgmr.msra.gmra.mxu1 %v1000_v61  ;;  %v1121_v61 = vrot.slane %v3829_v39, %v3818_v25 }
 0xa03   :  { %3147 = vmatprep.mubr.msk.f32.mxu1 %vm212_vm3, %v3591_v46 }
 0xac2   :  { %v3107_v63 = vpop.f32.mrf.mxu1 }
 0xac3   :  { %v1077_v4 = vadd.f32 %v3107_v63, %v1004_v62 }
 0xac4   :  { %v1071_v5 = vpop.f32.mrf.mxu1 }
 0xac5   :  { %v1081_v7 = vmax.f32 %v1077_v4, 0.0  ;;  %v1072_v9 = vadd.f32 %v1071_v5, %v1004_v62 }
 0xac7   :  { %v3980_v11 = vadd.f32 %v1081_v7, %v919_v49  ;;  %v1080_v12 = vmax.f32 %v1072_v9, 0.0 }
 0xac9   :  { %1086 = vadd.xlane.f32.xlu0 %v3980_v11  ;;  %v3983_v13 = vadd.f32 %v1080_v12, %v918_v44  ;;  %v1091_v14 = vmul.f32 %v3980_v11, %v3980_v11 }
 0xacb   :  { %v1090_v46 = vmul.f32 %v3983_v13, %v3983_v13 }
 0xacd   :  { %1084 = vadd.xlane.f32.xlu0 %v3983_v13 }
 0xad1   :  { %1092 = vadd.xlane.f32.xlu0 %v1090_v46 }
 0xad5   :  { %1094 = vadd.xlane.f32.xlu0 %v1091_v14 }
 0xb52   :  { %v1087_v20 = vpop.xlane.xlu0 %1086 }
 0xb53   :  { %v1089_v43 = vmul.f32 0.015625, %v1087_v20 }
 0xb55   :  { %v1099_v49 = vmul.f32 %v1089_v43, %v1089_v43  ;;  %v1105_v62 = vsub.f32 %v3980_v11, %v1089_v43 }
 0xb56   :  { %v1085_v40 = vpop.xlane.xlu0 %1084 }
 0xb57   :  { %v1088_v41 = vmul.f32 0.015625, %v1085_v40 }
 0xb59   :  { %v1098_v22 = vmul.f32 %v1088_v41, %v1088_v41  ;;  %v1104_v55 = vsub.f32 %v3983_v13, %v1088_v41  ;;  %v4047_v13 = vld [vmem:[%s4543_s3 + $0x10] sm:$0xff] }
 0xb5a   :  { %v1093_v42 = vpop.xlane.xlu0 %1092  ;;  %v1182_v39 = vrot.slane %v4047_v13, %v3577_v21 }
 0xb5b   :  { %v1096_v44 = vmul.f32 0.015625, %v1093_v42 }
 0xb5d   :  { %v1100_v45 = vsub.f32 %v1096_v44, %v1098_v22 }
 0xb5e   :  { %v1095_v47 = vpop.xlane.xlu0 %1094 }
 0xb5f   :  { %v1102_v30 = vmax.f32 %v1100_v45, 0.0  ;;  %v1097_v50 = vmul.f32 0.015625, %v1095_v47 }
 0xb61   :  { %v1106_v35 = vadd.f32 1e-05, %v1102_v30  ;;  %v1101_v51 = vsub.f32 %v1097_v50, %v1099_v49 }
 0xb63   :  { %3441 = vrsqrt.f32 %v1106_v35  ;;  %v1103_v52 = vmax.f32 %v1101_v51, 0.0 }
 0xb65   :  { %v1107_v54 = vadd.f32 1e-05, %v1103_v52  ;;  %v3479_v52 = vld [vmem:[%s4544_s1 + $0x8] sm:$0xff] }
 0xb67   :  { %3443 = vrsqrt.f32 %v1107_v54 }
 0xb70   :  { %v3442_v59 = vpop.eup %3441 }
 0xb71   :  { %v1110_v60 = vmul.f32 %v3442_v59, %v1104_v55 }
 0xb73   :  { %v1116_v63 = vmul.f32 %v1115_v56, %v1110_v60 }
 0xb74   :  { %v3444_v4 = vpop.eup %3443 }
 0xb75   :  { %v1122_v5 = vadd.f32 %v1121_v61, %v1116_v63  ;;  %v1111_v7 = vmul.f32 %v3444_v4, %v1105_v62  ;;  %v1397_v62 = vrot.slane %v4047_v13, %v3617_v1 }
 0xb77   :  { %v1124_v9 = vmax.f32 %v1122_v5, 0.0  ;;  %v1117_v12 = vmul.f32 %v1115_v56, %v1111_v7 }
 0xb79   :  { %3140 = vmatprep.mubr.f32.mxu0 %v1124_v9  ;;  %v1123_v46 = vadd.f32 %v1121_v61, %v1117_v12 }
 0xb7b   :  { %v1125_v14 = vmax.f32 %v1123_v46, 0.0 }
 0xb7d   :  { %3141 = vmatmul.mubr.f32.vlgmr.msra.gmra.mxu0 %v1125_v14 }
 0xc3d   :  { %v3142_v16 = vpop.f32.mrf.mxu0 }
 0xc3e   :  { %v1255_v11 = vadd.f32 %v3142_v16, %v1182_v39  ;;  %v2525_v16 = vld [vmem:[%s4541_s2 + $0x3f8] sm:$0xff] }
 0xc3f   :  { %v1249_v17 = vpop.f32.mrf.mxu0 }
 0xc40   :  { %vm1259_vm7 = vcmp.ge.f32.partialorder %v1255_v11, 0.0  ;;  %v1261_v6 = vmul.f32 0.2, %v1255_v11  ;;  %v1250_v19 = vadd.f32 %v1249_v17, %v1182_v39  ;;  %v1284_v44 = vsel %vm191_vm4, 1.0, %v1255_v11  ;;  %v2523_v17 = vld [vmem:[%s4541_s2 + $0x3e8] sm:$0xff] }
 0xc41   :  { %v1286_v47 = vsel %vm190_vm5, 0.0, %v1284_v44  ;;  %v2534_v44 = vld [vmem:[%s4541_s2 + $0x440] sm:$0xff] }
 0xc42   :  { %v1263_v10 = vsel %vm1259_vm7, %v1255_v11, %v1261_v6  ;;  %vm1258_vm8 = vcmp.ge.f32.partialorder %v1250_v19, 0.0  ;;  %v1260_v23 = vmul.f32 0.2, %v1250_v19  ;;  %v1283_v45 = vsel %vm191_vm4, 1.0, %v1250_v19  ;;  %v2524_v11 = vld [vmem:[%s4541_s2 + $0x3f0] sm:$0xff]  ;;  %v2522_v6 = vld [vmem:[%s4541_s2 + $0x3e0] sm:$0xff] }
 0xc43   :  { %v1267_v27 = vsel %vm172_vm1, %v1263_v10, -inf  ;;  %v1285_v35 = vsel %vm190_vm5, 0.0, %v1283_v45  ;;  %v2533_v45 = vld [vmem:[%s4541_s2 + $0x438] sm:$0xff] }
 0xc44   :  { %v1262_v26 = vsel %vm1258_vm8, %v1250_v19, %v1260_v23  ;;  %v2521_v19 = vld [vmem:[%s4541_s2 + $0x3d8] sm:$0xff]  ;;  %v2519_v23 = vld [vmem:[%s4541_s2 + $0x3c8] sm:$0xff] }
 0xc45   :  { %v1266_v28 = vsel %vm172_vm1, %v1262_v26, -inf }
 0xc46   :  { %v1268_v29 = vmax.f32 %v1266_v28, %v1267_v27  ;;  %v2517_v27 = vld [vmem:[%s4541_s2 + $0x3b8] sm:$0xff]  ;;  %v2516_v28 = vld [vmem:[%s4541_s2 + $0x3b0] sm:$0xff] }
 0xc48   :  { %v1269_v31 = vrot.slane %v1268_v29, 4 }
 0xc4a   :  { %v1270_v33 = vmax.f32 %v1268_v29, %v1269_v31  ;;  %v2515_v29 = vld [vmem:[%s4541_s2 + $0x3a8] sm:$0xff]  ;;  %v2514_v31 = vld [vmem:[%s4541_s2 + $0x3a0] sm:$0xff] }
 0xc4c   :  { %v1271_v34 = vrot.slane %v1270_v33, 2 }
 0xc4e   :  { %v1272_v36 = vmax.f32 %v1270_v33, %v1271_v34  ;;  %v2513_v33 = vld [vmem:[%s4541_s2 + $0x398] sm:$0xff]  ;;  %v2512_v34 = vld [vmem:[%s4541_s2 + $0x390] sm:$0xff] }
 0xc50   :  { %v1273_v37 = vrot.slane %v1272_v36, 1 }
 0xc52   :  { %v1274_v38 = vmax.f32 %v1272_v36, %v1273_v37  ;;  %v2511_v36 = vld [vmem:[%s4541_s2 + $0x388] sm:$0xff]  ;;  %v2510_v37 = vld [vmem:[%s4541_s2 + $0x380] sm:$0xff] }
 0xc54   :  { %v1275_v20 = vsub.f32 %v1262_v26, %v1274_v38  ;;  %v1276_v40 = vsub.f32 %v1263_v10, %v1274_v38  ;;  %v2520_v10 = vld [vmem:[%s4541_s2 + $0x3d0] sm:$0xff]  ;;  %v2518_v26 = vld [vmem:[%s4541_s2 + $0x3c0] sm:$0xff]  ;;  %v2541_v38 = vld [vmem:[%s4541_s2 + $0x478] sm:$0xff] }
 0xc55   :  { %3185 = vmatprep.subr.mxu0 %v2541_v38 }
 0xc56   :  { %v1277_v41 = vmul.f32 1.442695, %v1275_v20  ;;  %v1279_v42 = vmul.f32 1.442695, %v1276_v40  ;;  %v2540_v20 = vld [vmem:[%s4541_s2 + $0x470] sm:$0xff]  ;;  %3186 = vmatpush3.msra.mxu0 %v2541_v38  ;;  %v2539_v40 = vld [vmem:[%s4541_s2 + $0x468] sm:$0xff] }
 0xc57   :  { %3187 = vmatprep.subr.mxu0 %v2540_v20 }
 0xc58   :  { %3445 = vpow2.f32 %v1277_v41  ;;  %3188 = vmatpush3.msra.mxu0 %v2540_v20  ;;  %v2538_v41 = vld [vmem:[%s4541_s2 + $0x460] sm:$0xff] }
 0xc59   :  { %3447 = vpow2.f32 %v1279_v42  ;;  %3189 = vmatprep.subr.mxu0 %v2539_v40  ;;  %v2537_v42 = vld [vmem:[%s4541_s2 + $0x458] sm:$0xff] }
 0xc5a   :  { %3190 = vmatpush3.msra.mxu0 %v2539_v40  ;;  %v1524_v40 = vrot.slane %v4047_v13, %v3749_v32 }
 0xc5b   :  { %3191 = vmatprep.subr.mxu0 %v2538_v41 }
 0xc5c   :  { %3192 = vmatpush3.msra.mxu0 %v2538_v41 }
 0xc5d   :  { %3193 = vmatprep.subr.mxu0 %v2537_v42 }
 0xc5e   :  { %3194 = vmatpush3.msra.mxu0 %v2537_v42 }
 0xc65   :  { %v3446_v43 = vpop.eup %3445 }
 0xc66   :  { %v3448_v22 = vpop.eup %3447  ;;  %1289 = vperm.xlu1 %3408, %v3446_v43   ;;  %v2536_v43 = vld [vmem:[%s4541_s2 + $0x450] sm:$0xff] }
 0xc67   :  { %1294 = vperm.xlu0 %3410, %v3448_v22   ;;  %v2535_v22 = vld [vmem:[%s4541_s2 + $0x448] sm:$0xff]  ;;  %3195 = vmatprep.subr.mxu0 %v2536_v43 }
 0xc68   :  { %3196 = vmatpush3.msra.mxu0 %v2536_v43 }
 0xc69   :  { %3197 = vmatprep.subr.mxu0 %v2535_v22 }
 0xc6a   :  { %3411 = vset.pattern.permute.xlu1 %v3481_v58  ;;  %3198 = vmatpush3.msra.mxu0 %v2535_v22 }
 0xc6b   :  { %3199 = vmatprep.subr.mxu0 %v2534_v44 }
 0xc6c   :  { %3200 = vmatpush3.msra.mxu0 %v2534_v44 }
 0xc6d   :  { %3201 = vmatprep.subr.mxu0 %v2533_v45 }
 0xc6e   :  { %3202 = vmatpush3.msra.mxu0 %v2533_v45 }
 0xce1   :  { %v1290_v30 = vpop.permute.xlu1 %1289 }
 0xce2   :  { %v1295_v49 = vpop.permute.xlu0 %1294  ;;  %v1297_v51 = vmul.f32 %v1290_v30, %v1285_v35  ;;  %v2530_v30 = vld [vmem:[%s4541_s2 + $0x420] sm:$0xff] }
 0xce3   :  { %v1298_v50 = vmul.f32 %v1295_v49, %v1286_v47  ;;  %v2532_v47 = vld [vmem:[%s4541_s2 + $0x430] sm:$0xff]  ;;  %v2531_v49 = vld [vmem:[%s4541_s2 + $0x428] sm:$0xff] }
 0xce4   :  { %3203 = vmatprep.subr.mxu0 %v2532_v47 }
 0xce5   :  { %3143 = vmatprep.subr.mxu1 %v1298_v50  ;;  %3204 = vmatpush3.msra.mxu0 %v2532_v47 }
 0xce6   :  { %3144 = vmatpush3.msra.mxu1 %v1298_v50  ;;  %3205 = vmatprep.subr.mxu0 %v2531_v49 }
 0xce7   :  { %3145 = vmatprep.subr.mxu1 %v1297_v51  ;;  %3206 = vmatpush3.msra.mxu0 %v2531_v49 }
 0xce8   :  { %3146 = vmatpush3.msra.mxu1 %v1297_v51  ;;  %3207 = vmatprep.subr.mxu0 %v2530_v30 }
 0xce9   :  { %3148 = vmatmul.mubr.msk.f32.vlgmr.msra.gmra.mxu1 %vm212_vm3, %v3479_v52  ;;  %3150 = vmatprep.subr.mxu1 %v2525_v16 }
 0xcea   :  { %3151 = vmatpush3.msra.mxu1 %v2525_v16  ;;  %3208 = vmatpush3.msra.mxu0 %v2530_v30 }
 0xceb   :  { %3152 = vmatprep.subr.mxu1 %v2524_v11 }
 0xcec   :  { %3153 = vmatpush3.msra.mxu1 %v2524_v11  ;;  %v1437_v11 = vrot.slane %v4047_v13, %v3723_v3 }
 0xced   :  { %3154 = vmatprep.subr.mxu1 %v2523_v17 }
 0xcee   :  { %3155 = vmatpush3.msra.mxu1 %v2523_v17 }
 0xcef   :  { %3156 = vmatprep.subr.mxu1 %v2522_v6 }
 0xcf0   :  { %3157 = vmatpush3.msra.mxu1 %v2522_v6 }
 0xcf1   :  { %3158 = vmatprep.subr.mxu1 %v2521_v19 }
 0xcf2   :  { %3159 = vmatpush3.msra.mxu1 %v2521_v19 }
 0xcf3   :  { %3160 = vmatprep.subr.mxu1 %v2520_v10 }
 0xcf4   :  { %3161 = vmatpush3.msra.mxu1 %v2520_v10 }
 0xcf5   :  { %3162 = vmatprep.subr.mxu1 %v2519_v23 }
 0xcf6   :  { %3163 = vmatpush3.msra.mxu1 %v2519_v23 }
 0xcf7   :  { %3164 = vmatprep.subr.mxu1 %v2518_v26 }
 0xcf8   :  { %3165 = vmatpush3.msra.mxu1 %v2518_v26 }
 0xcf9   :  { %3166 = vmatprep.subr.mxu1 %v2517_v27 }
 0xcfa   :  { %3167 = vmatpush3.msra.mxu1 %v2517_v27 }
 0xcfb   :  { %3168 = vmatprep.subr.mxu1 %v2516_v28 }
 0xcfc   :  { %3169 = vmatpush3.msra.mxu1 %v2516_v28  ;;  %v2528_v28 = vld [vmem:[%s4541_s2 + $0x410] sm:$0xff] }
 0xcfd   :  { %3170 = vmatprep.subr.mxu1 %v2515_v29 }
 0xcfe   :  { %3171 = vmatpush3.msra.mxu1 %v2515_v29  ;;  %v2526_v29 = vld [vmem:[%s4541_s2 + $0x400] sm:$0xff] }
 0xcff   :  { %3172 = vmatprep.subr.mxu1 %v2514_v31 }
 0xd00   :  { %3173 = vmatpush3.msra.mxu1 %v2514_v31  ;;  %v1443_v31 = vrot.slane %v4047_v13, %v3744_v24 }
 0xd01   :  { %3174 = vmatprep.subr.mxu1 %v2513_v33 }
 0xd02   :  { %3175 = vmatpush3.msra.mxu1 %v2513_v33 }
 0xd03   :  { %3176 = vmatprep.subr.mxu1 %v2512_v34 }
 0xd04   :  { %3177 = vmatpush3.msra.mxu1 %v2512_v34 }
 0xd05   :  { %3178 = vmatprep.subr.mxu1 %v2511_v36 }
 0xd06   :  { %3179 = vmatpush3.msra.mxu1 %v2511_v36 }
 0xd07   :  { %3180 = vmatprep.subr.mxu1 %v2510_v37 }
 0xd08   :  { %3181 = vmatpush3.msra.mxu1 %v2510_v37 }
 0xda9   :  { %v3149_v54 = vpop.f32.mrf.mxu1 }
 0xdaa   :  { %v1375_v59 = vmax.f32 %v3149_v54, 1e-30 }
 0xdab   :  { %v1365_v55 = vpop.f32.mrf.mxu1 }
 0xdac   :  { %v1374_v56 = vmax.f32 %v1365_v55, 1e-30 }
 0xdae   :  { %3449 = vrcp.f32 %v1374_v56 }
 0xdaf   :  { %3451 = vrcp.f32 %v1375_v59 }
 0xdbb   :  { %v3450_v60 = vpop.eup %3449 }
 0xdbc   :  { %1382 = vperm.xlu1 %3411, %v3450_v60   ;;  %v3452_v61 = vpop.eup %3451 }
 0xdc0   :  { %1387 = vperm.xlu1 %3411, %v3452_v61  }
 0xdc4   :  { %3412 = vset.pattern.permute.xlu1 %v3480_v18 }
 0xe37   :  { %v1383_v63 = vpop.permute.xlu1 %1382 }
 0xe38   :  { %v1390_v4 = vmul.f32 %v1383_v63, %v1365_v55 }
 0xe3a   :  { %v1392_v5 = vsel %vm191_vm4, 0.0, %v1390_v4 }
 0xe3b   :  { %v4071_v7 = vadd.f32 %v1397_v62, %v1392_v5  ;;  %v1388_v9 = vpop.permute.xlu1 %1387 }
 0xe3c   :  { %v1391_v12 = vmul.f32 %v3149_v54, %v1388_v9 }
 0xe3d   :  { %1400 = vadd.xlane.f32.xlu1 %v4071_v7  ;;  %v1406_v18 = vmul.f32 %v4071_v7, %v4071_v7 }
 0xe3e   :  { %v1393_v46 = vsel %vm191_vm4, 0.0, %v1391_v12 }
 0xe3f   :  { %v4076_v14 = vadd.f32 %v1397_v62, %v1393_v46 }
 0xe41   :  { %1408 = vadd.xlane.f32.xlu1 %v1406_v18  ;;  %1402 = vadd.xlane.f32.xlu0 %v4076_v14  ;;  %v1407_v39 = vmul.f32 %v4076_v14, %v4076_v14  ;;  %v1431_v18 = vrot.slane %v4047_v13, %v3720_v2 }
 0xe45   :  { %1410 = vadd.xlane.f32.xlu1 %v1407_v39 }
 0xec6   :  { %v1401_v50 = vpop.xlane.xlu1 %1400 }
 0xec7   :  { %v1404_v35 = vmul.f32 0.015625, %v1401_v50  ;;  %v2560_v50 = vld [vmem:[%s4541_s2 + $0x4f8] sm:$0xff] }
 0xec8   :  { %3220 = vmatprep.subr.mxu1 %v2560_v50 }
 0xec9   :  { %v1414_v54 = vmul.f32 %v1404_v35, %v1404_v35  ;;  %v1420_v46 = vsub.f32 %v4071_v7, %v1404_v35  ;;  %v2529_v7 = vld [vmem:[%s4541_s2 + $0x418] sm:$0xff]  ;;  %v2559_v35 = vld [vmem:[%s4541_s2 + $0x4f0] sm:$0xff] }
 0xeca   :  { %v1403_v51 = vpop.xlane.xlu0 %1402  ;;  %v1409_v52 = vpop.xlane.xlu1 %1408  ;;  %3209 = vmatprep.subr.mxu0 %v2529_v7 }
 0xecb   :  { %v1405_v55 = vmul.f32 0.015625, %v1403_v51  ;;  %v1412_v56 = vmul.f32 0.015625, %v1409_v52  ;;  %3210 = vmatpush3.msra.mxu0 %v2529_v7  ;;  %v2558_v51 = vld [vmem:[%s4541_s2 + $0x4e8] sm:$0xff]  ;;  %v2557_v52 = vld [vmem:[%s4541_s2 + $0x4e0] sm:$0xff] }
 0xecc   :  { %3211 = vmatprep.subr.mxu0 %v2528_v28 }
 0xecd   :  { %v1416_v59 = vsub.f32 %v1412_v56, %v1414_v54  ;;  %v1415_v61 = vmul.f32 %v1405_v55, %v1405_v55  ;;  %v1421_v17 = vsub.f32 %v4076_v14, %v1405_v55  ;;  %3212 = vmatpush3.msra.mxu0 %v2528_v28  ;;  %v2527_v14 = vld [vmem:[%s4541_s2 + $0x408] sm:$0xff]  ;;  %v2556_v54 = vld [vmem:[%s4541_s2 + $0x4d8] sm:$0xff]  ;;  %v2555_v55 = vld [vmem:[%s4541_s2 + $0x4d0] sm:$0xff] }
 0xece   :  { %v1411_v60 = vpop.xlane.xlu1 %1410  ;;  %3213 = vmatprep.subr.mxu0 %v2527_v14  ;;  %v2554_v56 = vld [vmem:[%s4541_s2 + $0x4c8] sm:$0xff] }
 0xecf   :  { %v1418_v62 = vmax.f32 %v1416_v59, 0.0  ;;  %v1413_v63 = vmul.f32 0.015625, %v1411_v60  ;;  %3214 = vmatpush3.msra.mxu0 %v2527_v14  ;;  %v2553_v59 = vld [vmem:[%s4541_s2 + $0x4c0] sm:$0xff]  ;;  %v2552_v60 = vld [vmem:[%s4541_s2 + $0x4b8] sm:$0xff] }
 0xed0   :  { %3215 = vmatprep.subr.mxu0 %v2526_v29 }
 0xed1   :  { %v1422_v4 = vadd.f32 1e-05, %v1418_v62  ;;  %v1417_v5 = vsub.f32 %v1413_v63, %v1415_v61  ;;  %3216 = vmatpush3.msra.mxu0 %v2526_v29  ;;  %v2551_v61 = vld [vmem:[%s4541_s2 + $0x4b0] sm:$0xff]  ;;  %v2550_v62 = vld [vmem:[%s4541_s2 + $0x4a8] sm:$0xff]  ;;  %v2548_v63 = vld [vmem:[%s4541_s2 + $0x498] sm:$0xff] }
 0xed3   :  { %3453 = vrsqrt.f32 %v1422_v4  ;;  %v1419_v9 = vmax.f32 %v1417_v5, 0.0  ;;  %v2547_v4 = vld [vmem:[%s4541_s2 + $0x490] sm:$0xff]  ;;  %v2546_v5 = vld [vmem:[%s4541_s2 + $0x488] sm:$0xff] }
 0xed5   :  { %v1423_v12 = vadd.f32 1e-05, %v1419_v9  ;;  %v2545_v9 = vld [vmem:[%s4541_s2 + $0x480] sm:$0xff] }
 0xed7   :  { %3455 = vrsqrt.f32 %v1423_v12 }
 0xee0   :  { %v3454_v39 = vpop.eup %3453 }
 0xee1   :  { %v1426_v16 = vmul.f32 %v3454_v39, %v1420_v46 }
 0xee3   :  { %v1432_v6 = vmul.f32 %v1431_v18, %v1426_v16 }
 0xee4   :  { %v3456_v19 = vpop.eup %3455 }
 0xee5   :  { %v1438_v10 = vadd.f32 %v1437_v11, %v1432_v6  ;;  %v1427_v23 = vmul.f32 %v3456_v19, %v1421_v17 }
 0xee7   :  { %3182 = vmatprep.mubr.f32.mxu1 %v1438_v10  ;;  %v1433_v26 = vmul.f32 %v1431_v18, %v1427_v23 }
 0xee9   :  { %v1439_v27 = vadd.f32 %v1437_v11, %v1433_v26 }
 0xeeb   :  { %3183 = vmatmul.mubr.f32.vlgmr.msra.gmra.mxu1 %v1439_v27 }
 0xeec   :  { %3221 = vmatpush3.msra.mxu1 %v2560_v50 }
 0xeed   :  { %3222 = vmatprep.subr.mxu1 %v2559_v35 }
 0xeee   :  { %3223 = vmatpush3.msra.mxu1 %v2559_v35 }
 0xeef   :  { %3224 = vmatprep.subr.mxu1 %v2558_v51 }
 0xef0   :  { %3225 = vmatpush3.msra.mxu1 %v2558_v51 }
 0xef1   :  { %3226 = vmatprep.subr.mxu1 %v2557_v52 }
 0xef2   :  { %3227 = vmatpush3.msra.mxu1 %v2557_v52 }
 0xef3   :  { %3228 = vmatprep.subr.mxu1 %v2556_v54 }
 0xef4   :  { %3229 = vmatpush3.msra.mxu1 %v2556_v54 }
 0xef5   :  { %3230 = vmatprep.subr.mxu1 %v2555_v55 }
 0xef6   :  { %3231 = vmatpush3.msra.mxu1 %v2555_v55 }
 0xef7   :  { %3232 = vmatprep.subr.mxu1 %v2554_v56 }
 0xef8   :  { %3233 = vmatpush3.msra.mxu1 %v2554_v56 }
 0xef9   :  { %3234 = vmatprep.subr.mxu1 %v2553_v59 }
 0xefa   :  { %3235 = vmatpush3.msra.mxu1 %v2553_v59 }
 0xefb   :  { %3236 = vmatprep.subr.mxu1 %v2552_v60 }
 0xefc   :  { %3237 = vmatpush3.msra.mxu1 %v2552_v60 }
 0xefd   :  { %3238 = vmatprep.subr.mxu1 %v2551_v61 }
 0xefe   :  { %3239 = vmatpush3.msra.mxu1 %v2551_v61 }
 0xeff   :  { %3240 = vmatprep.subr.mxu1 %v2550_v62 }
 0xf00   :  { %3241 = vmatpush3.msra.mxu1 %v2550_v62 }
 0xfab   :  { %v3184_v33 = vpop.f32.mrf.mxu1 }
 0xfac   :  { %v1516_v34 = vadd.f32 %v3184_v33, %v1443_v31 }
 0xfad   :  { %v1510_v36 = vpop.f32.mrf.mxu1 }
 0xfae   :  { %v1511_v37 = vadd.f32 %v1510_v36, %v1443_v31  ;;  %v1520_v20 = vmax.f32 %v1516_v34, 0.0  ;;  %v1635_v31 = vrot.slane %v4047_v13, %v3815_v57 }
 0xfb0   :  { %v1519_v38 = vmax.f32 %v1511_v37, 0.0 }
 0xfb2   :  { %3217 = vmatprep.mubr.f32.mxu0 %v1519_v38  ;;  %v1641_v38 = vrot.slane %v4047_v13, %v3818_v25 }
 0xfb3   :  { %3218 = vmatmul.mubr.f32.vlgmr.msra.gmra.mxu0 %v1520_v20 }
 0xfb4   :  { %3259 = vmatprep.mubr.msk.f32.mxu0 %vm212_vm3, %v3842_v8 }
0x1073   :  { %v3219_v41 = vpop.f32.mrf.mxu0 }
0x1074   :  { %v1597_v42 = vadd.f32 %v3219_v41, %v1524_v40 }
0x1075   :  { %v1591_v43 = vpop.f32.mrf.mxu0 }
0x1076   :  { %v1601_v22 = vmax.f32 %v1597_v42, 0.0  ;;  %v1592_v44 = vadd.f32 %v1591_v43, %v1524_v40 }
0x1078   :  { %v4191_v45 = vadd.f32 %v1601_v22, %v1439_v27  ;;  %v1600_v47 = vmax.f32 %v1592_v44, 0.0 }
0x107a   :  { %v4193_v49 = vadd.f32 %v1600_v47, %v1438_v10  ;;  %1606 = vadd.xlane.f32.xlu1 %v4191_v45  ;;  %v1611_v8 = vmul.f32 %v4191_v45, %v4191_v45 }
0x107c   :  { %1604 = vadd.xlane.f32.xlu0 %v4193_v49  ;;  %v1610_v30 = vmul.f32 %v4193_v49, %v4193_v49 }
0x107e   :  { %1614 = vadd.xlane.f32.xlu1 %v1611_v8 }
0x1080   :  { %1612 = vadd.xlane.f32.xlu0 %v1610_v30 }
0x1096   :  { %1814 = vperm.xlu0 %3410, %v3482_v0   ;;  %v2549_v0 = vld [vmem:[%s4541_s2 + $0x4a0] sm:$0xff] }
0x1097   :  { %3242 = vmatprep.subr.mxu1 %v2549_v0 }
0x1098   :  { %3243 = vmatpush3.msra.mxu1 %v2549_v0 }
0x1099   :  { %3244 = vmatprep.subr.mxu1 %v2548_v63 }
0x109a   :  { %3414 = vset.pattern.permute.xlu0 %v3481_v58  ;;  %3245 = vmatpush3.msra.mxu1 %v2548_v63 }
0x109b   :  { %3246 = vmatprep.subr.mxu1 %v2547_v4 }
0x109c   :  { %3247 = vmatpush3.msra.mxu1 %v2547_v4 }
0x109d   :  { %3248 = vmatprep.subr.mxu1 %v2546_v5 }
0x109e   :  { %3249 = vmatpush3.msra.mxu1 %v2546_v5 }
0x109f   :  { %3250 = vmatprep.subr.mxu1 %v2545_v9 }
0x10a0   :  { %3251 = vmatpush3.msra.mxu1 %v2545_v9 }
0x1103   :  { %v1607_v12 = vpop.xlane.xlu1 %1606 }
0x1104   :  { %v1609_v46 = vmul.f32 0.015625, %v1607_v12 }
0x1105   :  { %v1605_v18 = vpop.xlane.xlu0 %1604 }
0x1106   :  { %v1608_v39 = vmul.f32 0.015625, %v1605_v18  ;;  %v1619_v11 = vmul.f32 %v1609_v46, %v1609_v46  ;;  %v1625_v29 = vsub.f32 %v4191_v45, %v1609_v46  ;;  %v4260_v45 = vld [vmem:[%s4543_s3 + $0x18] sm:$0xff] }
0x1107   :  { %v1615_v16 = vpop.xlane.xlu1 %1614  ;;  %v1702_v47 = vrot.slane %v4260_v45, %v3577_v21 }
0x1108   :  { %v1617_v17 = vmul.f32 0.015625, %v1615_v16  ;;  %v1618_v19 = vmul.f32 %v1608_v39, %v1608_v39  ;;  %v1624_v34 = vsub.f32 %v4193_v49, %v1608_v39 }
0x1109   :  { %v1613_v6 = vpop.xlane.xlu0 %1612 }
0x110a   :  { %v1621_v10 = vsub.f32 %v1617_v17, %v1619_v11  ;;  %v1616_v23 = vmul.f32 0.015625, %v1613_v6 }
0x110c   :  { %v1623_v26 = vmax.f32 %v1621_v10, 0.0  ;;  %v1620_v27 = vsub.f32 %v1616_v23, %v1618_v19  ;;  %v1917_v19 = vrot.slane %v4260_v45, %v3617_v1 }
0x110e   :  { %v1627_v7 = vadd.f32 1e-05, %v1623_v26  ;;  %v1622_v28 = vmax.f32 %v1620_v27, 0.0 }
0x1110   :  { %3457 = vrsqrt.f32 %v1627_v7  ;;  %v1626_v14 = vadd.f32 1e-05, %v1622_v28 }
0x1111   :  { %v1815_v35 = vpop.permute.xlu0 %1814 }
0x1112   :  { %3459 = vrsqrt.f32 %v1626_v14 }
0x111d   :  { %v3458_v33 = vpop.eup %3457 }
0x111e   :  { %v1631_v36 = vmul.f32 %v3458_v33, %v1625_v29  ;;  %v2574_v33 = vld [vmem:[%s4541_s2 + $0x568] sm:$0xff] }
0x111f   :  { %v3460_v37 = vpop.eup %3459 }
0x1120   :  { %v1630_v20 = vmul.f32 %v3460_v37, %v1624_v34  ;;  %v1637_v40 = vmul.f32 %v1635_v31, %v1631_v36  ;;  %v2573_v34 = vld [vmem:[%s4541_s2 + $0x560] sm:$0xff]  ;;  %v2572_v36 = vld [vmem:[%s4541_s2 + $0x558] sm:$0xff]  ;;  %v2571_v37 = vld [vmem:[%s4541_s2 + $0x550] sm:$0xff] }
0x1122   :  { %v1636_v41 = vmul.f32 %v1635_v31, %v1630_v20  ;;  %v1643_v42 = vadd.f32 %v1641_v38, %v1637_v40  ;;  %v2576_v31 = vld [vmem:[%s4541_s2 + $0x578] sm:$0xff]  ;;  %v2569_v20 = vld [vmem:[%s4541_s2 + $0x540] sm:$0xff] }
0x1123   :  { %v2568_v40 = vld [vmem:[%s4541_s2 + $0x538] sm:$0xff] }
0x1124   :  { %v1642_v43 = vadd.f32 %v1641_v38, %v1636_v41  ;;  %v1645_v44 = vmax.f32 %v1643_v42, 0.0  ;;  %v2570_v38 = vld [vmem:[%s4541_s2 + $0x548] sm:$0xff]  ;;  %v2567_v41 = vld [vmem:[%s4541_s2 + $0x530] sm:$0xff] }
0x1125   :  { %v2566_v42 = vld [vmem:[%s4541_s2 + $0x528] sm:$0xff] }
0x1126   :  { %v1644_v22 = vmax.f32 %v1642_v43, 0.0  ;;  %v2565_v43 = vld [vmem:[%s4541_s2 + $0x520] sm:$0xff] }
0x1128   :  { %3252 = vmatprep.mubr.f32.mxu1 %v1644_v22  ;;  %v2564_v22 = vld [vmem:[%s4541_s2 + $0x518] sm:$0xff] }
0x1129   :  { %3253 = vmatmul.mubr.f32.vlgmr.msra.gmra.mxu1 %v1645_v44  ;;  %v2563_v44 = vld [vmem:[%s4541_s2 + $0x510] sm:$0xff] }
0x11e9   :  { %v3254_v49 = vpop.f32.mrf.mxu1 }
0x11ea   :  { %v1775_v8 = vadd.f32 %v3254_v49, %v1702_v47  ;;  %v2561_v49 = vld [vmem:[%s4541_s2 + $0x500] sm:$0xff] }
0x11eb   :  { %v1769_v13 = vpop.f32.mrf.mxu1 }
0x11ec   :  { %v1804_v30 = vsel %vm191_vm4, 1.0, %v1775_v8  ;;  %v1770_v50 = vadd.f32 %v1769_v13, %v1702_v47  ;;  %v2562_v47 = vld [vmem:[%s4541_s2 + $0x508] sm:$0xff]  ;;  %v2592_v8 = vld [vmem:[%s4541_s2 + $0x5f8] sm:$0xff]  ;;  %v2591_v13 = vld [vmem:[%s4541_s2 + $0x5f0] sm:$0xff] }
0x11ed   :  { %v1806_v51 = vsel %vm190_vm5, 0.0, %v1804_v30  ;;  %3297 = vmatprep.subr.mxu1 %v2592_v8  ;;  %v2590_v30 = vld [vmem:[%s4541_s2 + $0x5e8] sm:$0xff] }
0x11ee   :  { %vm1778_vm9 = vcmp.ge.f32.partialorder %v1770_v50, 0.0  ;;  %v1780_v52 = vmul.f32 0.2, %v1770_v50  ;;  %v1818_v54 = vmul.f32 %v1815_v35, %v1806_v51  ;;  %v1803_v12 = vsel %vm191_vm4, 1.0, %v1770_v50  ;;  %3298 = vmatpush3.msra.mxu1 %v2592_v8  ;;  %v2588_v35 = vld [vmem:[%s4541_s2 + $0x5d8] sm:$0xff]  ;;  %v2587_v51 = vld [vmem:[%s4541_s2 + $0x5d0] sm:$0xff] }
0x11ef   :  { %v1805_v46 = vsel %vm190_vm5, 0.0, %v1803_v12  ;;  %3299 = vmatprep.subr.mxu1 %v2591_v13 }
0x11f0   :  { %v1782_v55 = vsel %vm1778_vm9, %v1770_v50, %v1780_v52  ;;  %3255 = vmatprep.subr.mxu0 %v1818_v54  ;;  %3300 = vmatpush3.msra.mxu1 %v2591_v13  ;;  %v2589_v50 = vld [vmem:[%s4541_s2 + $0x5e0] sm:$0xff]  ;;  %v2586_v52 = vld [vmem:[%s4541_s2 + $0x5c8] sm:$0xff]  ;;  %v2181_v13 = vld [vmem:[%s4545_s4 + $0x78] sm:$0xff] }
0x11f1   :  { %v1786_v56 = vsel %vm172_vm1, %v1782_v55, -inf  ;;  %3256 = vmatpush3.msra.mxu0 %v1818_v54  ;;  %3301 = vmatprep.subr.mxu1 %v2590_v30  ;;  %v2585_v54 = vld [vmem:[%s4541_s2 + $0x5c0] sm:$0xff] }
0x11f2   :  { %v1788_v21 = vmax.f32 %v1786_v56, %v3838_v53  ;;  %3302 = vmatpush3.msra.mxu1 %v2590_v30  ;;  %v2583_v56 = vld [vmem:[%s4541_s2 + $0x5b0] sm:$0xff] }
0x11f3   :  { %3303 = vmatprep.subr.mxu1 %v2589_v50  ;;  %v2180_v30 = vld [vmem:[%s4545_s4 + $0x70] sm:$0xff] }
0x11f4   :  { %v1789_v59 = vrot.slane %v1788_v21, 4  ;;  %3304 = vmatpush3.msra.mxu1 %v2589_v50  ;;  %v2179_v50 = vld [vmem:[%s4545_s4 + $0x68] sm:$0xff] }
0x11f5   :  { %3305 = vmatprep.subr.mxu1 %v2588_v35 }
0x11f6   :  { %v1790_v60 = vmax.f32 %v1788_v21, %v1789_v59  ;;  %3306 = vmatpush3.msra.mxu1 %v2588_v35  ;;  %v2582_v21 = vld [vmem:[%s4541_s2 + $0x5a8] sm:$0xff]  ;;  %v2581_v59 = vld [vmem:[%s4541_s2 + $0x5a0] sm:$0xff] }
0x11f7   :  { %3307 = vmatprep.subr.mxu1 %v2587_v51  ;;  %v2178_v35 = vld [vmem:[%s4545_s4 + $0x60] sm:$0xff] }
0x11f8   :  { %v1791_v61 = vrot.slane %v1790_v60, 2  ;;  %3308 = vmatpush3.msra.mxu1 %v2587_v51  ;;  %v2177_v51 = vld [vmem:[%s4545_s4 + $0x58] sm:$0xff] }
0x11f9   :  { %3309 = vmatprep.subr.mxu1 %v2586_v52 }
0x11fa   :  { %v1792_v62 = vmax.f32 %v1790_v60, %v1791_v61  ;;  %3310 = vmatpush3.msra.mxu1 %v2586_v52  ;;  %v2176_v52 = vld [vmem:[%s4545_s4 + $0x50] sm:$0xff] }
0x11fb   :  { %3311 = vmatprep.subr.mxu1 %v2585_v54 }
0x11fc   :  { %v1793_v0 = vrot.slane %v1792_v62, 1  ;;  %3312 = vmatpush3.msra.mxu1 %v2585_v54  ;;  %v2175_v54 = vld [vmem:[%s4545_s4 + $0x48] sm:$0xff] }
0x11fe   :  { %v1794_v63 = vmax.f32 %v1792_v62, %v1793_v0 }
0x1200   :  { %v1795_v4 = vsub.f32 %v1782_v55, %v1794_v63  ;;  %v2584_v55 = vld [vmem:[%s4541_s2 + $0x5b8] sm:$0xff] }
0x1201   :  { %3313 = vmatprep.subr.mxu1 %v2584_v55 }
0x1202   :  { %v1797_v5 = vmul.f32 1.442695, %v1795_v4  ;;  %3314 = vmatpush3.msra.mxu1 %v2584_v55  ;;  %v2174_v55 = vld [vmem:[%s4545_s4 + $0x40] sm:$0xff] }
0x1203   :  { %3315 = vmatprep.subr.mxu1 %v2583_v56 }
0x1204   :  { %3461 = vpow2.f32 %v1797_v5  ;;  %3316 = vmatpush3.msra.mxu1 %v2583_v56  ;;  %v2173_v56 = vld [vmem:[%s4545_s4 + $0x38] sm:$0xff] }
0x1205   :  { %3317 = vmatprep.subr.mxu1 %v2582_v21 }
0x1206   :  { %3318 = vmatpush3.msra.mxu1 %v2582_v21  ;;  %v2172_v21 = vld [vmem:[%s4545_s4 + $0x30] sm:$0xff] }
0x1207   :  { %3319 = vmatprep.subr.mxu1 %v2581_v59 }
0x1208   :  { %3320 = vmatpush3.msra.mxu1 %v2581_v59  ;;  %v2171_v59 = vld [vmem:[%s4545_s4 + $0x28] sm:$0xff] }
0x1211   :  { %v3462_v9 = vpop.eup %3461 }
0x1212   :  { %1809 = vperm.xlu1 %3412, %v3462_v9  }
0x1216   :  { %3413 = vset.pattern.permute.xlu1 %v3481_v58 }
0x128d   :  { %v1810_v53 = vpop.permute.xlu1 %1809 }
0x128e   :  { %v1817_v18 = vmul.f32 %v1810_v53, %v1805_v46 }
0x1290   :  { %3257 = vmatprep.subr.mxu0 %v1817_v18 }
0x1291   :  { %3258 = vmatpush3.msra.mxu0 %v1817_v18 }
0x1292   :  { %3260 = vmatmul.mubr.msk.f32.vlgmr.msra.gmra.mxu0 %vm212_vm3, %v3851_v15  ;;  %3262 = vmatprep.subr.mxu0 %v2576_v31 }
0x1293   :  { %3263 = vmatpush3.msra.mxu0 %v2576_v31 }
0x1294   :  { %3264 = vmatprep.subr.mxu0 %v2575_v48 }
0x1295   :  { %3265 = vmatpush3.msra.mxu0 %v2575_v48  ;;  %v1963_v48 = vrot.slane %v4260_v45, %v3744_v24 }
0x1296   :  { %3266 = vmatprep.subr.mxu0 %v2574_v33 }
0x1297   :  { %3267 = vmatpush3.msra.mxu0 %v2574_v33 }
0x1298   :  { %3268 = vmatprep.subr.mxu0 %v2573_v34 }
0x1299   :  { %3269 = vmatpush3.msra.mxu0 %v2573_v34 }
0x129a   :  { %3270 = vmatprep.subr.mxu0 %v2572_v36 }
0x129b   :  { %3271 = vmatpush3.msra.mxu0 %v2572_v36 }
0x129c   :  { %3272 = vmatprep.subr.mxu0 %v2571_v37 }
0x129d   :  { %3273 = vmatpush3.msra.mxu0 %v2571_v37 }
0x129e   :  { %3274 = vmatprep.subr.mxu0 %v2570_v38 }
0x129f   :  { %3275 = vmatpush3.msra.mxu0 %v2570_v38 }
0x12a0   :  { %3276 = vmatprep.subr.mxu0 %v2569_v20 }
0x12a1   :  { %3277 = vmatpush3.msra.mxu0 %v2569_v20 }
0x12a2   :  { %3278 = vmatprep.subr.mxu0 %v2568_v40 }
0x12a3   :  { %3279 = vmatpush3.msra.mxu0 %v2568_v40  ;;  %v2044_v40 = vrot.slane %v4260_v45, %v3749_v32 }
0x12a4   :  { %3280 = vmatprep.subr.mxu0 %v2567_v41 }
0x12a5   :  { %3281 = vmatpush3.msra.mxu0 %v2567_v41 }
0x12a6   :  { %3282 = vmatprep.subr.mxu0 %v2566_v42 }
0x12a7   :  { %3283 = vmatpush3.msra.mxu0 %v2566_v42 }
0x12a8   :  { %3284 = vmatprep.subr.mxu0 %v2565_v43 }
0x12a9   :  { %3285 = vmatpush3.msra.mxu0 %v2565_v43 }
0x12aa   :  { %3286 = vmatprep.subr.mxu0 %v2564_v22 }
0x12ab   :  { %3287 = vmatpush3.msra.mxu0 %v2564_v22 }
0x12ac   :  { %3288 = vmatprep.subr.mxu0 %v2563_v44 }
0x12ad   :  { %3289 = vmatpush3.msra.mxu0 %v2563_v44 }
0x12ae   :  { %3290 = vmatprep.subr.mxu0 %v2562_v47 }
0x12af   :  { %3291 = vmatpush3.msra.mxu0 %v2562_v47 }
0x12b0   :  { %3292 = vmatprep.subr.mxu0 %v2561_v49 }
0x12b1   :  { %3293 = vmatpush3.msra.mxu0 %v2561_v49 }
0x12b2   :  { %3332 = vmatprep.subr.mxu0 %v2181_v13 }
0x1352   :  { %v3261_v39 = vpop.f32.mrf.mxu0 }
0x1353   :  { %v1895_v16 = vmax.f32 %v3261_v39, 1e-30 }
0x1354   :  { %v1885_v11 = vpop.f32.mrf.mxu0 }
0x1355   :  { %3463 = vrcp.f32 %v1895_v16  ;;  %v1894_v17 = vmax.f32 %v1885_v11, 1e-30 }
0x1357   :  { %3465 = vrcp.f32 %v1894_v17 }
0x1362   :  { %v3464_v58 = vpop.eup %3463 }
0x1363   :  { %1907 = vperm.xlu0 %3414, %v3464_v58  }
0x1364   :  { %v3466_v6 = vpop.eup %3465 }
0x1365   :  { %1902 = vperm.xlu1 %3413, %v3466_v6  }
0x13de   :  { %v1908_v10 = vpop.permute.xlu0 %1907 }
0x13df   :  { %v1911_v23 = vmul.f32 %v3261_v39, %v1908_v10 }
0x13e0   :  { %v1903_v26 = vpop.permute.xlu1 %1902 }
0x13e1   :  { %v1913_v27 = vsel %vm191_vm4, 0.0, %v1911_v23  ;;  %v1910_v15 = vmul.f32 %v1903_v26, %v1885_v11 }
0x13e2   :  { %v4281_v7 = vadd.f32 %v1917_v19, %v1913_v27 }
0x13e3   :  { %v1912_v28 = vsel %vm191_vm4, 0.0, %v1910_v15  ;;  %v1957_v15 = vrot.slane %v4260_v45, %v3723_v3  ;;  %v2578_v3 = vld [vmem:[%s4541_s2 + $0x588] sm:$0xff] }
0x13e4   :  { %v4285_v14 = vadd.f32 %v1917_v19, %v1912_v28  ;;  %1922 = vadd.xlane.f32.xlu0 %v4281_v7  ;;  %v1927_v1 = vmul.f32 %v4281_v7, %v4281_v7  ;;  %v1951_v19 = vrot.slane %v4260_v45, %v3720_v2  ;;  %v2579_v2 = vld [vmem:[%s4541_s2 + $0x590] sm:$0xff] }
0x13e6   :  { %1920 = vadd.xlane.f32.xlu1 %v4285_v14  ;;  %v1926_v29 = vmul.f32 %v4285_v14, %v4285_v14 }
0x13e8   :  { %1930 = vadd.xlane.f32.xlu0 %v1927_v1 }
0x13ea   :  { %1928 = vadd.xlane.f32.xlu1 %v1926_v29 }
0x146d   :  { %v1923_v60 = vpop.xlane.xlu0 %1922 }
0x146e   :  { %v1925_v61 = vmul.f32 0.015625, %v1923_v60  ;;  %v2170_v60 = vld [vmem:[%s4545_s4 + $0x20] sm:$0xff] }
0x146f   :  { %v1921_v62 = vpop.xlane.xlu1 %1920 }
0x1470   :  { %v1924_v0 = vmul.f32 0.015625, %v1921_v62  ;;  %v1935_v4 = vmul.f32 %v1925_v61, %v1925_v61  ;;  %v1941_v58 = vsub.f32 %v4281_v7, %v1925_v61  ;;  %v2580_v7 = vld [vmem:[%s4541_s2 + $0x598] sm:$0xff]  ;;  %v2168_v62 = vld [vmem:[%s4545_s4 + $0x10] sm:$0xff] }
0x1471   :  { %v1931_v63 = vpop.xlane.xlu0 %1930  ;;  %3321 = vmatprep.subr.mxu1 %v2580_v7  ;;  %v2169_v61 = vld [vmem:[%s4545_s4 + $0x18] sm:$0xff] }
0x1472   :  { %v1933_v5 = vmul.f32 0.015625, %v1931_v63  ;;  %v1934_v12 = vmul.f32 %v1924_v0, %v1924_v0  ;;  %v1940_v10 = vsub.f32 %v4285_v14, %v1924_v0  ;;  %3322 = vmatpush3.msra.mxu1 %v2580_v7  ;;  %v2577_v14 = vld [vmem:[%s4541_s2 + $0x580] sm:$0xff]  ;;  %v2167_v0 = vld [vmem:[%s4545_s4 + $0x8] sm:$0xff] }
0x1473   :  { %v1929_v9 = vpop.xlane.xlu1 %1928  ;;  %3323 = vmatprep.subr.mxu1 %v2579_v2  ;;  %v2166_v63 = vld [vmem:[%s4545_s4] sm:$0xff] }
0x1474   :  { %v1937_v46 = vsub.f32 %v1933_v5, %v1935_v4  ;;  %v1932_v53 = vmul.f32 0.015625, %v1929_v9  ;;  %3324 = vmatpush3.msra.mxu1 %v2579_v2 }
0x1475   :  { %3325 = vmatprep.subr.mxu1 %v2578_v3 }
0x1476   :  { %v1939_v18 = vmax.f32 %v1937_v46, 0.0  ;;  %v1936_v39 = vsub.f32 %v1932_v53, %v1934_v12  ;;  %3326 = vmatpush3.msra.mxu1 %v2578_v3 }
0x1477   :  { %3327 = vmatprep.subr.mxu1 %v2577_v14 }
0x1478   :  { %v1943_v16 = vadd.f32 1e-05, %v1939_v18  ;;  %v1938_v11 = vmax.f32 %v1936_v39, 0.0  ;;  %3328 = vmatpush3.msra.mxu1 %v2577_v14 }
0x147a   :  { %3467 = vrsqrt.f32 %v1943_v16  ;;  %v1942_v17 = vadd.f32 1e-05, %v1938_v11 }
0x147c   :  { %3469 = vrsqrt.f32 %v1942_v17 }
0x1487   :  { %v3468_v6 = vpop.eup %3467 }
0x1488   :  { %v1947_v23 = vmul.f32 %v3468_v6, %v1941_v58 }
0x1489   :  { %v3470_v26 = vpop.eup %3469 }
0x148a   :  { %v1946_v27 = vmul.f32 %v3470_v26, %v1940_v10  ;;  %v1953_v28 = vmul.f32 %v1951_v19, %v1947_v23 }
0x148c   :  { %v1952_v1 = vmul.f32 %v1951_v19, %v1946_v27  ;;  %v1959_v31 = vadd.f32 %v1957_v15, %v1953_v28  ;;  %v2155_v27 = vrot.slane %v4260_v45, %v3815_v57  ;;  %v2612_v57 = vld [vmem:[%s4546_s5] ss:$0 sm:$0xff] }
0x148e   :  { %v1958_v29 = vadd.f32 %v1957_v15, %v1952_v1 }
0x1490   :  { %3294 = vmatprep.mubr.f32.mxu0 %v1958_v29 }
0x1491   :  { %3295 = vmatmul.mubr.f32.vlgmr.msra.gmra.mxu0 %v1959_v31 }
0x1492   :  { %3333 = vmatpush3.msra.mxu0 %v2181_v13  ;;  %v2602_v13 = vld [vmem:[%s4545_s4 + $0xb0] sm:$0xff] }
0x1493   :  { %3334 = vmatprep.subr.mxu0 %v2180_v30 }
0x1494   :  { %3335 = vmatpush3.msra.mxu0 %v2180_v30  ;;  %v2601_v30 = vld [vmem:[%s4545_s4 + $0xa8] sm:$0xff] }
0x1495   :  { %3336 = vmatprep.subr.mxu0 %v2179_v50 }
0x1496   :  { %3337 = vmatpush3.msra.mxu0 %v2179_v50  ;;  %v2600_v50 = vld [vmem:[%s4545_s4 + $0xa0] sm:$0xff] }
0x1497   :  { %3338 = vmatprep.subr.mxu0 %v2178_v35 }
0x1498   :  { %3339 = vmatpush3.msra.mxu0 %v2178_v35  ;;  %v2599_v35 = vld [vmem:[%s4545_s4 + $0x98] sm:$0xff] }
0x1499   :  { %3340 = vmatprep.subr.mxu0 %v2177_v51 }
0x149a   :  { %3341 = vmatpush3.msra.mxu0 %v2177_v51  ;;  %v2598_v51 = vld [vmem:[%s4545_s4 + $0x90] sm:$0xff] }
0x149b   :  { %3342 = vmatprep.subr.mxu0 %v2176_v52 }
0x149c   :  { %3343 = vmatpush3.msra.mxu0 %v2176_v52  ;;  %v2597_v52 = vld [vmem:[%s4545_s4 + $0x88] sm:$0xff] }
0x149d   :  { %3344 = vmatprep.subr.mxu0 %v2175_v54 }
0x149e   :  { %3345 = vmatpush3.msra.mxu0 %v2175_v54  ;;  %v2596_v54 = vld [vmem:[%s4545_s4 + $0x80] sm:$0xff] }
0x149f   :  { %3346 = vmatprep.subr.mxu0 %v2174_v55 }
0x14a0   :  { %3347 = vmatpush3.msra.mxu0 %v2174_v55 }
0x14a1   :  { %3348 = vmatprep.subr.mxu0 %v2173_v56 }
0x14a2   :  { %3349 = vmatpush3.msra.mxu0 %v2173_v56 }
0x14a3   :  { %3350 = vmatprep.subr.mxu0 %v2172_v21 }
0x14a4   :  { %3351 = vmatpush3.msra.mxu0 %v2172_v21 }
0x14a5   :  { %3352 = vmatprep.subr.mxu0 %v2171_v59 }
0x14a6   :  { %3353 = vmatpush3.msra.mxu0 %v2171_v59 }
0x14a7   :  { %3354 = vmatprep.subr.mxu0 %v2170_v60 }
0x14a8   :  { %3355 = vmatpush3.msra.mxu0 %v2170_v60 }
0x14a9   :  { %3356 = vmatprep.subr.mxu0 %v2169_v61 }
0x14aa   :  { %3357 = vmatpush3.msra.mxu0 %v2169_v61 }
0x14ab   :  { %3358 = vmatprep.subr.mxu0 %v2168_v62 }
0x14ac   :  { %3359 = vmatpush3.msra.mxu0 %v2168_v62 }
0x14ad   :  { %3360 = vmatprep.subr.mxu0 %v2167_v0 }
0x14ae   :  { %3361 = vmatpush3.msra.mxu0 %v2167_v0 }
0x14af   :  { %3362 = vmatprep.subr.mxu0 %v2166_v63 }
0x14b0   :  { %3363 = vmatpush3.msra.mxu0 %v2166_v63 }
0x1551   :  { %v3296_v33 = vpop.f32.mrf.mxu0 }
0x1552   :  { %v2036_v34 = vadd.f32 %v3296_v33, %v1963_v48 }
0x1553   :  { %v2030_v36 = vpop.f32.mrf.mxu0 }
0x1554   :  { %v2031_v37 = vadd.f32 %v2030_v36, %v1963_v48  ;;  %v2040_v20 = vmax.f32 %v2036_v34, 0.0 }
0x1556   :  { %v2039_v38 = vmax.f32 %v2031_v37, 0.0 }
0x1558   :  { %3329 = vmatprep.mubr.f32.mxu1 %v2039_v38 }
0x1559   :  { %3330 = vmatmul.mubr.f32.vlgmr.msra.gmra.mxu1 %v2040_v20 }
0x1619   :  { %v3331_v41 = vpop.f32.mrf.mxu1 }
0x161a   :  { %v2117_v42 = vadd.f32 %v3331_v41, %v2044_v40 }
0x161b   :  { %v2111_v43 = vpop.f32.mrf.mxu1 }
0x161c   :  { %v2121_v22 = vmax.f32 %v2117_v42, 0.0  ;;  %v2112_v44 = vadd.f32 %v2111_v43, %v2044_v40  ;;  %v2611_v42 = vld [vmem:[%s4545_s4 + $0xf8] sm:$0xff]  ;;  %v2610_v43 = vld [vmem:[%s4545_s4 + $0xf0] sm:$0xff] }
0x161d   :  { %3367 = vmatprep.subr.mxu1 %v2611_v42 }
0x161e   :  { %v4399_v47 = vadd.f32 %v2121_v22, %v1959_v31  ;;  %v2120_v49 = vmax.f32 %v2112_v44, 0.0  ;;  %v2161_v31 = vrot.slane %v4260_v45, %v3818_v25  ;;  %3368 = vmatpush3.msra.mxu1 %v2611_v42  ;;  %v2609_v22 = vld [vmem:[%s4545_s4 + $0xe8] sm:$0xff]  ;;  %v2608_v44 = vld [vmem:[%s4545_s4 + $0xe0] sm:$0xff] }
0x161f   :  { %3369 = vmatprep.subr.mxu1 %v2610_v43 }
0x1620   :  { %v4401_v24 = vadd.f32 %v2120_v49, %v1958_v29  ;;  %2126 = vadd.xlane.f32.xlu0 %v4399_v47  ;;  %v2131_v8 = vmul.f32 %v4399_v47, %v4399_v47  ;;  %3370 = vmatpush3.msra.mxu1 %v2610_v43  ;;  %v2606_v49 = vld [vmem:[%s4545_s4 + $0xd0] sm:$0xff] }
0x1621   :  { %3371 = vmatprep.subr.mxu1 %v2609_v22 }
0x1622   :  { %2124 = vadd.xlane.f32.xlu1 %v4401_v24  ;;  %v2130_v32 = vmul.f32 %v4401_v24, %v4401_v24  ;;  %3372 = vmatpush3.msra.mxu1 %v2609_v22 }
0x1623   :  { %3373 = vmatprep.subr.mxu1 %v2608_v44 }
0x1624   :  { %2134 = vadd.xlane.f32.xlu0 %v2131_v8  ;;  %3374 = vmatpush3.msra.mxu1 %v2608_v44  ;;  %v2604_v8 = vld [vmem:[%s4545_s4 + $0xc0] sm:$0xff] }
0x1626   :  { %2132 = vadd.xlane.f32.xlu1 %v2130_v32  ;;  %v2603_v32 = vld [vmem:[%s4545_s4 + $0xb8] sm:$0xff] }
0x16a9   :  { %v2127_v4 = vpop.xlane.xlu0 %2126 }
0x16aa   :  { %v2129_v5 = vmul.f32 0.015625, %v2127_v4 }
0x16ab   :  { %v2125_v9 = vpop.xlane.xlu1 %2124 }
0x16ac   :  { %v2128_v12 = vmul.f32 0.015625, %v2125_v9  ;;  %v2139_v53 = vmul.f32 %v2129_v5, %v2129_v5  ;;  %v2145_v26 = vsub.f32 %v4399_v47, %v2129_v5  ;;  %v2607_v47 = vld [vmem:[%s4545_s4 + $0xd8] sm:$0xff] }
0x16ad   :  { %v2135_v46 = vpop.xlane.xlu0 %2134  ;;  %3375 = vmatprep.subr.mxu1 %v2607_v47 }
0x16ae   :  { %v2137_v18 = vmul.f32 0.015625, %v2135_v46  ;;  %v2138_v16 = vmul.f32 %v2128_v12, %v2128_v12  ;;  %v2144_v28 = vsub.f32 %v4401_v24, %v2128_v12  ;;  %3376 = vmatpush3.msra.mxu1 %v2607_v47  ;;  %v2605_v24 = vld [vmem:[%s4545_s4 + $0xc8] sm:$0xff] }
0x16af   :  { %v2133_v39 = vpop.xlane.xlu1 %2132  ;;  %3377 = vmatprep.subr.mxu1 %v2606_v49 }
0x16b0   :  { %v2141_v11 = vsub.f32 %v2137_v18, %v2139_v53  ;;  %v2136_v17 = vmul.f32 0.015625, %v2133_v39  ;;  %3378 = vmatpush3.msra.mxu1 %v2606_v49 }
0x16b1   :  { %3379 = vmatprep.subr.mxu1 %v2605_v24 }
0x16b2   :  { %v2143_v58 = vmax.f32 %v2141_v11, 0.0  ;;  %v2140_v6 = vsub.f32 %v2136_v17, %v2138_v16  ;;  %3380 = vmatpush3.msra.mxu1 %v2605_v24  ;;  %v2613_v17 = vld [vmem:[%s4546_s5 + $0x2] ss:$0 sm:$0xff] }
0x16b3   :  { %3381 = vmatprep.subr.mxu1 %v2604_v8 }
0x16b4   :  { %v2147_v19 = vadd.f32 1e-05, %v2143_v58  ;;  %v2142_v10 = vmax.f32 %v2140_v6, 0.0  ;;  %3382 = vmatpush3.msra.mxu1 %v2604_v8 }
0x16b5   :  { %3383 = vmatprep.subr.mxu1 %v2603_v32 }
0x16b6   :  { %3471 = vrsqrt.f32 %v2147_v19  ;;  %v2146_v23 = vadd.f32 1e-05, %v2142_v10  ;;  %3384 = vmatpush3.msra.mxu1 %v2603_v32 }
0x16b7   :  { %3385 = vmatprep.subr.mxu1 %v2602_v13 }
0x16b8   :  { %3473 = vrsqrt.f32 %v2146_v23  ;;  %3386 = vmatpush3.msra.mxu1 %v2602_v13  ;;  %v2614_v23 = vld [vmem:[%s4546_s5 + $0x3] ss:$0 sm:$0xff] }
0x16b9   :  { %3387 = vmatprep.subr.mxu1 %v2601_v30 }
0x16ba   :  { %3388 = vmatpush3.msra.mxu1 %v2601_v30 }
0x16bb   :  { %3389 = vmatprep.subr.mxu1 %v2600_v50 }
0x16bc   :  { %3390 = vmatpush3.msra.mxu1 %v2600_v50 }
0x16bd   :  { %3391 = vmatprep.subr.mxu1 %v2599_v35 }
0x16be   :  { %3392 = vmatpush3.msra.mxu1 %v2599_v35 }
0x16bf   :  { %3393 = vmatprep.subr.mxu1 %v2598_v51 }
0x16c0   :  { %3394 = vmatpush3.msra.mxu1 %v2598_v51 }
0x16c1   :  { %3395 = vmatprep.subr.mxu1 %v2597_v52 }
0x16c2   :  { %3396 = vmatpush3.msra.mxu1 %v2597_v52 }
0x16c3   :  { %v3472_v15 = vpop.eup %3471  ;;  %3397 = vmatprep.subr.mxu1 %v2596_v54 }
0x16c4   :  { %v2151_v1 = vmul.f32 %v3472_v15, %v2145_v26  ;;  %3398 = vmatpush3.msra.mxu1 %v2596_v54 }
0x16c5   :  { %v3474_v29 = vpop.eup %3473 }
0x16c6   :  { %v2150_v7 = vmul.f32 %v3474_v29, %v2144_v28  ;;  %v2157_v2 = vmul.f32 %v2155_v27, %v2151_v1  ;;  %v2615_v28 = vld [vmem:[%s4546_s5 + $0x1] ss:$0 sm:$0xff] }
0x16c8   :  { %v2156_v3 = vmul.f32 %v2155_v27, %v2150_v7  ;;  %v2163_v14 = vadd.f32 %v2161_v31, %v2157_v2 }
0x16ca   :  { %v2162_v48 = vadd.f32 %v2161_v31, %v2156_v3  ;;  %v2165_v34 = vmax.f32 %v2163_v14, 0.0 }
0x16cc   :  { %v2164_v33 = vmax.f32 %v2162_v48, 0.0 }
0x16ce   :  { %3364 = vmatprep.mubr.f32.mxu0 %v2164_v33 }
0x16cf   :  { %3365 = vmatmul.mubr.f32.vlgmr.msra.gmra.mxu0 %v2165_v34 }
0x178f   :  { %v3366_v36 = vpop.f32.mrf.mxu0 }
0x1790   :  { %v2279_v37 = vadd.f32 %v3366_v36, %v2612_v57 }
0x1791   :  { %v2273_v38 = vpop.f32.mrf.mxu0 }
0x1792   :  { %v4466_v20 = vmax.f32 %v2279_v37, 0.0  ;;  %v2274_v40 = vadd.f32 %v2612_v57, %v2273_v38 }
0x1794   :  { %v4468_v25 = vmax.f32 %v2274_v40, 0.0  ;;  %2286 = vadd.xlane.f32.xlu0 %v4466_v20  ;;  %v2291_v45 = vmul.f32 %v4466_v20, %v4466_v20 }
0x1796   :  { %2284 = vadd.xlane.f32.xlu1 %v4468_v25  ;;  %v2290_v41 = vmul.f32 %v4468_v25, %v4468_v25 }
0x1798   :  { %2294 = vadd.xlane.f32.xlu0 %v2291_v45 }
0x179a   :  { %2292 = vadd.xlane.f32.xlu1 %v2290_v41 }
0x181d   :  { %v2287_v55 = vpop.xlane.xlu0 %2286 }
0x181e   :  { %v2289_v56 = vmul.f32 0.015625, %v2287_v55 }
0x181f   :  { %v2285_v21 = vpop.xlane.xlu1 %2284 }
0x1820   :  { %v2288_v59 = vmul.f32 0.015625, %v2285_v21  ;;  %v2299_v61 = vmul.f32 %v2289_v56, %v2289_v56  ;;  %v2305_v39 = vsub.f32 %v4466_v20, %v2289_v56 }
0x1821   :  { %v2295_v60 = vpop.xlane.xlu0 %2294 }
0x1822   :  { %v2297_v62 = vmul.f32 0.015625, %v2295_v60  ;;  %v2298_v63 = vmul.f32 %v2288_v59, %v2288_v59  ;;  %v2304_v11 = vsub.f32 %v4468_v25, %v2288_v59 }
0x1823   :  { %v2293_v0 = vpop.xlane.xlu1 %2292 }
0x1824   :  { %v2301_v4 = vsub.f32 %v2297_v62, %v2299_v61  ;;  %v2296_v5 = vmul.f32 0.015625, %v2293_v0 }
0x1826   :  { %v2303_v9 = vmax.f32 %v2301_v4, 0.0  ;;  %v2300_v12 = vsub.f32 %v2296_v5, %v2298_v63 }
0x1828   :  { %v2307_v46 = vadd.f32 1e-05, %v2303_v9  ;;  %v2302_v53 = vmax.f32 %v2300_v12, 0.0 }
0x182a   :  { %3475 = vrsqrt.f32 %v2307_v46  ;;  %v2306_v18 = vadd.f32 1e-05, %v2302_v53 }
0x182c   :  { %3477 = vrsqrt.f32 %v2306_v18 }
0x1837   :  { %v3476_v16 = vpop.eup %3475 }
0x1838   :  { %v2311_v58 = vmul.f32 %v3476_v16, %v2305_v39 }
0x1839   :  { %v3478_v6 = vpop.eup %3477 }
0x183a   :  { %v2310_v19 = vmul.f32 %v3478_v6, %v2304_v11  ;;  %v2317_v10 = vmul.f32 %v2613_v17, %v2311_v58 }
0x183c   :  { %v2316_v26 = vmul.f32 %v2613_v17, %v2310_v19  ;;  %v2323_v15 = vadd.f32 %v2614_v23, %v2317_v10 }
0x183e   :  { %v2322_v27 = vadd.f32 %v2614_v23, %v2316_v26 }
0x1840   :  { %3399 = vmatprep.mubr.f32.mxu1 %v2322_v27 }
0x1841   :  { %3400 = vmatmul.mubr.f32.vlgmr.msra.gmra.mxu1 %v2323_v15 }
0x1901   :  { %v3401_v1 = vpop.f32.mrf.mxu1 }
0x1902   :  { %v2400_v29 = vadd.f32 %v3401_v1, %v2615_v28 }
0x1903   :  { %v2394_v31 = vpop.f32.mrf.mxu1 }
0x1904   :  { %2404 = vst [vmem:[%s4547_s6 + $0x8] sm:$0xff] %v2400_v29  ;;  %v2395_v7 = vadd.f32 %v2615_v28, %v2394_v31 }
0x1906   :  { %2403 = vst [vmem:[%s4547_s6] sm:$0xff] %v2395_v7 }

</bundles_post_ra>
